<compile_context>
chip_gen: v7x
topology: tpu7x:2x2x1
jax: 0.10.0
libtpu: 0.0.40
codegen_flags: <defaults>
</compile_context>

<pallas_src>
import jax
import jax.numpy as jnp
from jax.experimental import pallas as pl
from jax.experimental.pallas import tpu as pltpu

LEAKY_SLOPE = 0.01   # torch.nn.LeakyReLU default
BN_EPS = 1e-5
LANE = 128

INPUT_CHANNELS = 4
LAYERS = [8, 16]
NUM_CONVS = 2


def _cdiv(a, b):
    return -(-a // b)


def _choose_batch(n):
    """Images per grid step (B) and number of grid steps."""
    steps = 2 if n >= 2 else 1          # keep both v7x TensorCores busy
    b = _cdiv(n, steps)
    b = max(1, min(b, 32))              # VMEM safety cap (per-step live data << 32 MiB)
    steps = _cdiv(n, b)
    return b, steps


# ----------------------------- in-kernel helpers -----------------------------

def _matmul_bn_act(patches_bf16, w_bf16, scale, shift):
    """im2col-patches @ weights (MXU, f32 acc) + fused eval-mode BN + LeakyReLU."""
    acc = jnp.dot(patches_bf16, w_bf16, preferred_element_type=jnp.float32)
    y = acc * scale + shift
    return jnp.maximum(y, LEAKY_SLOPE * y)            # LeakyReLU, lane-dense f32


def _conv3x3_bn_act(x, w_bf16, scale, shift):
    """3x3 conv (pad=1, stride=1) as a single im2col matmul.

    x:      (B, h, w, cin) f32 activation (real channels only, value in VMEM/vregs)
    w_bf16: (9*cin, 128)   bf16 weights, taps ordered (dy, dx, ci), cout padded to 128
    scale:  (1, 128) f32
    shift:  (1, 128) f32
    returns (B*h*w, 128) f32
    """
    b, hh, ww, cin = x.shape
    # zero-pad H and W by 1 entirely in VMEM (value-level, no HBM traffic)
    zr = jnp.zeros((b, 1, ww, cin), x.dtype)
    xp = jnp.concatenate([zr, x, zr], axis=1)                       # (B, h+2, w, cin)
    zc = jnp.zeros((b, hh + 2, 1, cin), x.dtype)
    xp = jnp.concatenate([zc, xp, zc], axis=2)                      # (B, h+2, w+2, cin)
    # im2col: 9 shifted windows concatenated along the K (lane) axis
    cols = [xp[:, dy:dy + hh, dx:dx + ww, :].reshape(b * hh * ww, cin)
            for dy in range(3) for dx in range(3)]
    patches = jnp.concatenate(cols, axis=1).astype(jnp.bfloat16)    # (B*h*w, 9*cin)
    return _matmul_bn_act(patches, w_bf16, scale, shift)


def _maxpool2x2(x):
    """2x2 / stride-2 max pool on (B, h, w, 128), vectorized (no per-column loop)."""
    b, hh, ww, c = x.shape
    a = x.reshape(b, hh // 2, 2, ww, c)
    a = jnp.maximum(a[:, :, 0, :, :], a[:, :, 1, :, :])             # pool rows
    a = a.reshape(b, hh // 2, ww // 2, 2, c)
    return jnp.maximum(a[:, :, :, 0, :], a[:, :, :, 1, :])          # pool columns


def _make_fused_kernel(B, H, W, c0, layers, num_convs):
    """Fused forward kernel: B images per grid step, everything resident in VMEM."""
    n_blocks = len(layers)
    n_conv = n_blocks * num_convs

    def kernel(*refs):
        p1_ref = refs[0]                       # (B, H*W, 9*c0) bf16 conv-1 patches
        w_refs = refs[1:1 + n_conv]            # (9*cin, 128) bf16 each
        ss_ref = refs[1 + n_conv]              # (2*n_conv, 128) f32 BN scale/shift
        o_ref = refs[2 + n_conv]               # (B, h_out*w_out, 128) f32

        ss = ss_ref[...]

        hh, ww = H, W
        cin = c0
        k = 0
        y = None
        x128 = None
        for bi, cout in enumerate(layers):
            res = None
            for j in range(num_convs):
                scale = ss[2 * k:2 * k + 1, :]                       # (1, 128)
                shift = ss[2 * k + 1:2 * k + 2, :]
                if k == 0:
                    # first conv: im2col precomputed in the wrapper (bf16)
                    patches = p1_ref[...].reshape(B * hh * ww, 9 * cin)
                    y = _matmul_bn_act(patches, w_refs[k][...], scale, shift)
                else:
                    # slice back to real channels only for the matmul K axis
                    y = _conv3x3_bn_act(x128[..., :cin], w_refs[k][...], scale, shift)
                if j > 0:                                            # skip connection
                    y = y + res
                res = y
                x128 = y.reshape(B, hh, ww, LANE)                    # lane-dense
                cin = cout
                k += 1
            if bi != n_blocks - 1:
                x128 = _maxpool2x2(x128)
                hh //= 2
                ww //= 2
        o_ref[...] = y.reshape(B, hh * ww, LANE).astype(o_ref.dtype)  # dense store

    return kernel


# --------------------------------- wrapper -----------------------------------

def pallas_forward(x_nchw, params):
    N, C0, H, W = x_nchw.shape
    n_blocks = len(LAYERS)
    n_pools = n_blocks - 1
    h_out, w_out = H >> n_pools, W >> n_pools
    c_out = LAYERS[-1]
    assert c_out <= LANE

    B, steps = _choose_batch(N)
    N_pad = B * steps

    # ---- conv-1 im2col in XLA: (N, H*W, 9*C0) bf16 patches -------------------
    x_nhwc = jnp.transpose(x_nchw, (0, 2, 3, 1)).astype(jnp.float32)
    xp = jnp.pad(x_nhwc, ((0, 0), (1, 1), (1, 1), (0, 0)))
    cols = [xp[:, dy:dy + H, dx:dx + W, :] for dy in range(3) for dx in range(3)]
    p1 = jnp.concatenate(cols, axis=-1).reshape(N, H * W, 9 * C0).astype(jnp.bfloat16)
    if N_pad != N:
        p1 = jnp.pad(p1, ((0, N_pad - N), (0, 0), (0, 0)))

    # ---- pack weights (im2col layout, cout zero-padded to 128) + BN table ----
    # Padded lanes MUST have scale == shift == 0 so LeakyReLU keeps them exactly 0.
    w_list, ss_rows = [], []
    cin = C0
    for i, cout in enumerate(LAYERS):
        for j in range(NUM_CONVS):
            w, b, gamma, beta, mean, var = params[i][j]
            scale = gamma * jax.lax.rsqrt(var + BN_EPS)
            shift = beta + scale * (b - mean)
            w2d = w.reshape(9 * cin, cout)
            w2d = jnp.pad(w2d, ((0, 0), (0, LANE - cout)))
            w_list.append(w2d.astype(jnp.bfloat16))
            ss_rows.append(jnp.pad(scale, (0, LANE - cout)))
            ss_rows.append(jnp.pad(shift, (0, LANE - cout)))
            cin = cout
    ss = jnp.stack(ss_rows).astype(jnp.float32)                  # (2*n_conv, 128)

    kernel = _make_fused_kernel(B, H, W, C0, tuple(LAYERS), NUM_CONVS)

    in_specs = [pl.BlockSpec((B, H * W, 9 * C0), lambda n: (n, 0, 0))]
    for wl in w_list:
        in_specs.append(pl.BlockSpec(wl.shape, lambda n: (0, 0)))
    in_specs.append(pl.BlockSpec(ss.shape, lambda n: (0, 0)))

    # ---- cost estimate (hint for XLA scheduling of surrounding glue) ---------
    flops = 0
    cin = C0
    for i, cout in enumerate(LAYERS):
        m = (H >> i) * (W >> i)
        for j in range(NUM_CONVS):
            flops += 2 * m * (9 * cin) * LANE
            cin = cout
    flops *= N_pad
    bytes_accessed = (int(p1.size) * 2
                      + sum(int(wl.size) * 2 for wl in w_list)
                      + int(ss.size) * 4
                      + N_pad * h_out * w_out * LANE * 4)

    out = pl.pallas_call(
        kernel,
        out_shape=jax.ShapeDtypeStruct((N_pad, h_out * w_out, LANE), jnp.float32),
        grid=(steps,),
        in_specs=in_specs,
        out_specs=pl.BlockSpec((B, h_out * w_out, LANE), lambda n: (n, 0, 0)),
        compiler_params=pltpu.CompilerParams(dimension_semantics=("parallel",)),
        cost_estimate=pl.CostEstimate(flops=int(flops), transcendentals=0,
                                      bytes_accessed=int(bytes_accessed)),
    )(p1, *w_list, ss)

    out = out[:N, :, :c_out].reshape(N, h_out, w_out, c_out)
    return jnp.transpose(out, (0, 3, 1, 2))                      # NHWC -> NCHW


# --------------------------- params & JAX reference --------------------------

def init_params(key):
    """Deterministic synthetic parameters: conv (w, b) + BN (gamma, beta, mean, var)."""
    params = []
    cin = INPUT_CHANNELS
    for layer in LAYERS:
        block = []
        for _ in range(NUM_CONVS):
            key, k1, k2, k3, k4, k5, k6 = jax.random.split(key, 7)
            w = jax.random.normal(k1, (3, 3, cin, layer), jnp.float32) * ((9 * cin) ** -0.5)
            b = jax.random.normal(k2, (layer,), jnp.float32) * 0.1
            gamma = jax.random.uniform(k3, (layer,), jnp.float32, 0.8, 1.2)
            beta = jax.random.normal(k4, (layer,), jnp.float32) * 0.1
            mean = jax.random.normal(k5, (layer,), jnp.float32) * 0.1
            var = jax.random.uniform(k6, (layer,), jnp.float32, 0.5, 1.5)
            block.append((w, b, gamma, beta, mean, var))
            cin = layer
        params.append(block)
    return params


def reference_forward(x_nchw, params):
    """Pure-JAX f32 reference mirroring the PyTorch forward (eval-mode BN)."""
    x = x_nchw
    for i in range(len(LAYERS)):
        for j in range(NUM_CONVS):
            w, b, gamma, beta, mean, var = params[i][j]
            w_oihw = jnp.transpose(w, (3, 2, 0, 1))
            if j > 0:
                x_copy = x
            y = jax.lax.conv_general_dilated(
                x, w_oihw, window_strides=(1, 1), padding=((1, 1), (1, 1)),
                dimension_numbers=("NCHW", "OIHW", "NCHW"),
            )
            y = y + b[None, :, None, None]
            y = (
                gamma[None, :, None, None]
                * (y - mean[None, :, None, None])
                / jnp.sqrt(var + BN_EPS)[None, :, None, None]
                + beta[None, :, None, None]
            )
            y = jnp.where(y >= 0, y, LEAKY_SLOPE * y)
            if j > 0:
                y = y + x_copy
            x = y
        if i != len(LAYERS) - 1:
            x = jax.lax.reduce_window(
                x, -jnp.inf, jax.lax.max,
                window_dimensions=(1, 1, 2, 2),
                window_strides=(1, 1, 2, 2),
                padding="VALID",
            )
    return x


if __name__ == "__main__":
    key = jax.random.PRNGKey(0)
    key, xkey = jax.random.split(key)
    x = jax.random.normal(xkey, (2, INPUT_CHANNELS, 16, 16), jnp.float32)  # NCHW

    params = init_params(key)

    fwd = jax.jit(pallas_forward)
    out = jax.block_until_ready(fwd(x, params))

    ref = reference_forward(x, params)
    assert out.shape == ref.shape == (2, LAYERS[-1], 8, 8), out.shape
    # bf16 MXU operands vs. the pure-f32 reference -> loose tolerance.
    assert jnp.allclose(out, ref, rtol=2e-2, atol=5e-2), float(jnp.max(jnp.abs(out - ref)))

    print("KERNEL_OK")
</pallas_src>

<mosaic_0001>
module attributes {stable_mosaic.version = 11 : i64} {
  func.func @kernel(%arg0: i32, %arg1: memref<1x256x36xbf16, #tpu.memory_space<vmem>>, %arg2: memref<36x128xbf16, #tpu.memory_space<vmem>>, %arg3: memref<72x128xbf16, #tpu.memory_space<vmem>>, %arg4: memref<72x128xbf16, #tpu.memory_space<vmem>>, %arg5: memref<144x128xbf16, #tpu.memory_space<vmem>>, %arg6: memref<8x128xf32, #tpu.memory_space<vmem>>, %arg7: memref<1x64x128xf32, #tpu.memory_space<vmem>>) attributes {dimension_semantics = [#tpu.dimension_semantics<parallel>], iteration_bounds = array<i64: 2>, scalar_prefetch = 0 : i64, scratch_operands = 0 : i64, tpu.core_type = #tpu.core_type<tc>, window_params = [{transform_indices = @transform_0, window_bounds = array<i64: 1, 256, 36>}, {pipeline_mode = #tpu.pipeline_mode<synchronous>, transform_indices = @transform_1, window_bounds = array<i64: 36, 128>}, {pipeline_mode = #tpu.pipeline_mode<synchronous>, transform_indices = @transform_2, window_bounds = array<i64: 72, 128>}, {pipeline_mode = #tpu.pipeline_mode<synchronous>, transform_indices = @transform_3, window_bounds = array<i64: 72, 128>}, {pipeline_mode = #tpu.pipeline_mode<synchronous>, transform_indices = @transform_4, window_bounds = array<i64: 144, 128>}, {pipeline_mode = #tpu.pipeline_mode<synchronous>, transform_indices = @transform_5, window_bounds = array<i64: 8, 128>}, {transform_indices = @transform_6, window_bounds = array<i64: 1, 64, 128>}]} {
    %c0 = arith.constant 0 : index
    %c0_0 = arith.constant 0 : index
    %0 = vector.load %arg6[%c0, %c0_0] : memref<8x128xf32, #tpu.memory_space<vmem>>, vector<8x128xf32>
    %1 = vector.extract_strided_slice %0 {offsets = [0, 0], sizes = [1, 128], strides = [1, 1]} : vector<8x128xf32> to vector<1x128xf32>
    %2 = vector.extract_strided_slice %0 {offsets = [1, 0], sizes = [1, 128], strides = [1, 1]} : vector<8x128xf32> to vector<1x128xf32>
    %c0_1 = arith.constant 0 : index
    %c0_2 = arith.constant 0 : index
    %c0_3 = arith.constant 0 : index
    %3 = vector.load %arg1[%c0_1, %c0_2, %c0_3] : memref<1x256x36xbf16, #tpu.memory_space<vmem>>, vector<1x256x36xbf16>
    %4 = vector.shape_cast %3 : vector<1x256x36xbf16> to vector<256x36xbf16>
    %c0_4 = arith.constant 0 : index
    %c0_5 = arith.constant 0 : index
    %5 = vector.load %arg2[%c0_4, %c0_5] : memref<36x128xbf16, #tpu.memory_space<vmem>>, vector<36x128xbf16>
    %cst = arith.constant dense<0.000000e+00> : vector<256x128xf32>
    %6 = tpu.matmul %4, %5, %cst {dimension_numbers = #tpu.dot_dimension_numbers<[1], [0], [0], [1], [0, 0, 1, 1], [], []>} : vector<256x36xbf16>, vector<36x128xbf16>, vector<256x128xf32> -> vector<256x128xf32>
    %7 = vector.broadcast %1 : vector<1x128xf32> to vector<256x128xf32>
    %8 = arith.mulf %6, %7 : vector<256x128xf32>
    %9 = vector.broadcast %2 : vector<1x128xf32> to vector<256x128xf32>
    %10 = arith.addf %8, %9 : vector<256x128xf32>
    %cst_6 = arith.constant 0.00999999977 : f32
    %11 = vector.broadcast %cst_6 : f32 to vector<256x128xf32>
    %12 = arith.mulf %11, %10 : vector<256x128xf32>
    %13 = arith.maximumf %10, %12 : vector<256x128xf32>
    %14 = vector.shape_cast %13 : vector<256x128xf32> to vector<1x16x16x128xf32>
    %15 = vector.extract_strided_slice %0 {offsets = [2, 0], sizes = [1, 128], strides = [1, 1]} : vector<8x128xf32> to vector<1x128xf32>
    %16 = vector.extract_strided_slice %0 {offsets = [3, 0], sizes = [1, 128], strides = [1, 1]} : vector<8x128xf32> to vector<1x128xf32>
    %17 = vector.extract_strided_slice %14 {offsets = [0, 0, 0, 0], sizes = [1, 16, 16, 8], strides = [1, 1, 1, 1]} : vector<1x16x16x128xf32> to vector<1x16x16x8xf32>
    %c0_7 = arith.constant 0 : index
    %c0_8 = arith.constant 0 : index
    %18 = vector.load %arg3[%c0_7, %c0_8] : memref<72x128xbf16, #tpu.memory_space<vmem>>, vector<72x128xbf16>
    %cst_9 = arith.constant 0.000000e+00 : f32
    %19 = vector.broadcast %cst_9 : f32 to vector<1x1x16x8xf32>
    %20 = tpu.concatenate %19, %17, %19 in 1 : vector<1x1x16x8xf32>, vector<1x16x16x8xf32>, vector<1x1x16x8xf32> -> vector<1x18x16x8xf32>
    %cst_10 = arith.constant 0.000000e+00 : f32
    %21 = vector.broadcast %cst_10 : f32 to vector<1x18x1x8xf32>
    %22 = tpu.concatenate %21, %20, %21 in 2 : vector<1x18x1x8xf32>, vector<1x18x16x8xf32>, vector<1x18x1x8xf32> -> vector<1x18x18x8xf32>
    %23 = vector.extract_strided_slice %22 {offsets = [0, 0, 0, 0], sizes = [1, 16, 16, 8], strides = [1, 1, 1, 1]} : vector<1x18x18x8xf32> to vector<1x16x16x8xf32>
    %24 = vector.shape_cast %23 : vector<1x16x16x8xf32> to vector<256x8xf32>
    %25 = vector.extract_strided_slice %22 {offsets = [0, 0, 1, 0], sizes = [1, 16, 16, 8], strides = [1, 1, 1, 1]} : vector<1x18x18x8xf32> to vector<1x16x16x8xf32>
    %26 = vector.shape_cast %25 : vector<1x16x16x8xf32> to vector<256x8xf32>
    %27 = vector.extract_strided_slice %22 {offsets = [0, 0, 2, 0], sizes = [1, 16, 16, 8], strides = [1, 1, 1, 1]} : vector<1x18x18x8xf32> to vector<1x16x16x8xf32>
    %28 = vector.shape_cast %27 : vector<1x16x16x8xf32> to vector<256x8xf32>
    %29 = vector.extract_strided_slice %22 {offsets = [0, 1, 0, 0], sizes = [1, 16, 16, 8], strides = [1, 1, 1, 1]} : vector<1x18x18x8xf32> to vector<1x16x16x8xf32>
    %30 = vector.shape_cast %29 : vector<1x16x16x8xf32> to vector<256x8xf32>
    %31 = vector.extract_strided_slice %22 {offsets = [0, 1, 1, 0], sizes = [1, 16, 16, 8], strides = [1, 1, 1, 1]} : vector<1x18x18x8xf32> to vector<1x16x16x8xf32>
    %32 = vector.shape_cast %31 : vector<1x16x16x8xf32> to vector<256x8xf32>
    %33 = vector.extract_strided_slice %22 {offsets = [0, 1, 2, 0], sizes = [1, 16, 16, 8], strides = [1, 1, 1, 1]} : vector<1x18x18x8xf32> to vector<1x16x16x8xf32>
    %34 = vector.shape_cast %33 : vector<1x16x16x8xf32> to vector<256x8xf32>
    %35 = vector.extract_strided_slice %22 {offsets = [0, 2, 0, 0], sizes = [1, 16, 16, 8], strides = [1, 1, 1, 1]} : vector<1x18x18x8xf32> to vector<1x16x16x8xf32>
    %36 = vector.shape_cast %35 : vector<1x16x16x8xf32> to vector<256x8xf32>
    %37 = vector.extract_strided_slice %22 {offsets = [0, 2, 1, 0], sizes = [1, 16, 16, 8], strides = [1, 1, 1, 1]} : vector<1x18x18x8xf32> to vector<1x16x16x8xf32>
    %38 = vector.shape_cast %37 : vector<1x16x16x8xf32> to vector<256x8xf32>
    %39 = vector.extract_strided_slice %22 {offsets = [0, 2, 2, 0], sizes = [1, 16, 16, 8], strides = [1, 1, 1, 1]} : vector<1x18x18x8xf32> to vector<1x16x16x8xf32>
    %40 = vector.shape_cast %39 : vector<1x16x16x8xf32> to vector<256x8xf32>
    %41 = tpu.concatenate %24, %26, %28, %30, %32, %34, %36, %38, %40 in 1 : vector<256x8xf32>, vector<256x8xf32>, vector<256x8xf32>, vector<256x8xf32>, vector<256x8xf32>, vector<256x8xf32>, vector<256x8xf32>, vector<256x8xf32>, vector<256x8xf32> -> vector<256x72xf32>
    %42 = arith.truncf %41 : vector<256x72xf32> to vector<256x72xbf16>
    %cst_11 = arith.constant dense<0.000000e+00> : vector<256x128xf32>
    %43 = tpu.matmul %42, %18, %cst_11 {dimension_numbers = #tpu.dot_dimension_numbers<[1], [0], [0], [1], [0, 0, 1, 1], [], []>} : vector<256x72xbf16>, vector<72x128xbf16>, vector<256x128xf32> -> vector<256x128xf32>
    %44 = vector.broadcast %15 : vector<1x128xf32> to vector<256x128xf32>
    %45 = arith.mulf %43, %44 : vector<256x128xf32>
    %46 = vector.broadcast %16 : vector<1x128xf32> to vector<256x128xf32>
    %47 = arith.addf %45, %46 : vector<256x128xf32>
    %cst_12 = arith.constant 0.00999999977 : f32
    %48 = vector.broadcast %cst_12 : f32 to vector<256x128xf32>
    %49 = arith.mulf %48, %47 : vector<256x128xf32>
    %50 = arith.maximumf %47, %49 : vector<256x128xf32>
    %51 = arith.addf %50, %13 : vector<256x128xf32>
    %52 = vector.shape_cast %51 : vector<256x128xf32> to vector<1x16x16x128xf32>
    %53 = vector.shape_cast %52 : vector<1x16x16x128xf32> to vector<1x8x2x16x128xf32>
    %54 = vector.extract_strided_slice %53 {offsets = [0, 0, 0, 0, 0], sizes = [1, 8, 1, 16, 128], strides = [1, 1, 1, 1, 1]} : vector<1x8x2x16x128xf32> to vector<1x8x1x16x128xf32>
    %55 = vector.shape_cast %54 : vector<1x8x1x16x128xf32> to vector<1x8x16x128xf32>
    %56 = vector.extract_strided_slice %53 {offsets = [0, 0, 1, 0, 0], sizes = [1, 8, 1, 16, 128], strides = [1, 1, 1, 1, 1]} : vector<1x8x2x16x128xf32> to vector<1x8x1x16x128xf32>
    %57 = vector.shape_cast %56 : vector<1x8x1x16x128xf32> to vector<1x8x16x128xf32>
    %58 = arith.maximumf %55, %57 : vector<1x8x16x128xf32>
    %59 = vector.shape_cast %58 : vector<1x8x16x128xf32> to vector<1x8x8x2x128xf32>
    %60 = vector.extract_strided_slice %59 {offsets = [0, 0, 0, 0, 0], sizes = [1, 8, 8, 1, 128], strides = [1, 1, 1, 1, 1]} : vector<1x8x8x2x128xf32> to vector<1x8x8x1x128xf32>
    %61 = vector.shape_cast %60 : vector<1x8x8x1x128xf32> to vector<1x8x8x128xf32>
    %62 = vector.extract_strided_slice %59 {offsets = [0, 0, 0, 1, 0], sizes = [1, 8, 8, 1, 128], strides = [1, 1, 1, 1, 1]} : vector<1x8x8x2x128xf32> to vector<1x8x8x1x128xf32>
    %63 = vector.shape_cast %62 : vector<1x8x8x1x128xf32> to vector<1x8x8x128xf32>
    %64 = arith.maximumf %61, %63 : vector<1x8x8x128xf32>
    %65 = vector.extract_strided_slice %0 {offsets = [4, 0], sizes = [1, 128], strides = [1, 1]} : vector<8x128xf32> to vector<1x128xf32>
    %66 = vector.extract_strided_slice %0 {offsets = [5, 0], sizes = [1, 128], strides = [1, 1]} : vector<8x128xf32> to vector<1x128xf32>
    %67 = vector.extract_strided_slice %64 {offsets = [0, 0, 0, 0], sizes = [1, 8, 8, 8], strides = [1, 1, 1, 1]} : vector<1x8x8x128xf32> to vector<1x8x8x8xf32>
    %c0_13 = arith.constant 0 : index
    %c0_14 = arith.constant 0 : index
    %68 = vector.load %arg4[%c0_13, %c0_14] : memref<72x128xbf16, #tpu.memory_space<vmem>>, vector<72x128xbf16>
    %cst_15 = arith.constant 0.000000e+00 : f32
    %69 = vector.broadcast %cst_15 : f32 to vector<1x1x8x8xf32>
    %70 = tpu.concatenate %69, %67, %69 in 1 : vector<1x1x8x8xf32>, vector<1x8x8x8xf32>, vector<1x1x8x8xf32> -> vector<1x10x8x8xf32>
    %cst_16 = arith.constant 0.000000e+00 : f32
    %71 = vector.broadcast %cst_16 : f32 to vector<1x10x1x8xf32>
    %72 = tpu.concatenate %71, %70, %71 in 2 : vector<1x10x1x8xf32>, vector<1x10x8x8xf32>, vector<1x10x1x8xf32> -> vector<1x10x10x8xf32>
    %73 = vector.extract_strided_slice %72 {offsets = [0, 0, 0, 0], sizes = [1, 8, 8, 8], strides = [1, 1, 1, 1]} : vector<1x10x10x8xf32> to vector<1x8x8x8xf32>
    %74 = vector.shape_cast %73 : vector<1x8x8x8xf32> to vector<64x8xf32>
    %75 = vector.extract_strided_slice %72 {offsets = [0, 0, 1, 0], sizes = [1, 8, 8, 8], strides = [1, 1, 1, 1]} : vector<1x10x10x8xf32> to vector<1x8x8x8xf32>
    %76 = vector.shape_cast %75 : vector<1x8x8x8xf32> to vector<64x8xf32>
    %77 = vector.extract_strided_slice %72 {offsets = [0, 0, 2, 0], sizes = [1, 8, 8, 8], strides = [1, 1, 1, 1]} : vector<1x10x10x8xf32> to vector<1x8x8x8xf32>
    %78 = vector.shape_cast %77 : vector<1x8x8x8xf32> to vector<64x8xf32>
    %79 = vector.extract_strided_slice %72 {offsets = [0, 1, 0, 0], sizes = [1, 8, 8, 8], strides = [1, 1, 1, 1]} : vector<1x10x10x8xf32> to vector<1x8x8x8xf32>
    %80 = vector.shape_cast %79 : vector<1x8x8x8xf32> to vector<64x8xf32>
    %81 = vector.extract_strided_slice %72 {offsets = [0, 1, 1, 0], sizes = [1, 8, 8, 8], strides = [1, 1, 1, 1]} : vector<1x10x10x8xf32> to vector<1x8x8x8xf32>
    %82 = vector.shape_cast %81 : vector<1x8x8x8xf32> to vector<64x8xf32>
    %83 = vector.extract_strided_slice %72 {offsets = [0, 1, 2, 0], sizes = [1, 8, 8, 8], strides = [1, 1, 1, 1]} : vector<1x10x10x8xf32> to vector<1x8x8x8xf32>
    %84 = vector.shape_cast %83 : vector<1x8x8x8xf32> to vector<64x8xf32>
    %85 = vector.extract_strided_slice %72 {offsets = [0, 2, 0, 0], sizes = [1, 8, 8, 8], strides = [1, 1, 1, 1]} : vector<1x10x10x8xf32> to vector<1x8x8x8xf32>
    %86 = vector.shape_cast %85 : vector<1x8x8x8xf32> to vector<64x8xf32>
    %87 = vector.extract_strided_slice %72 {offsets = [0, 2, 1, 0], sizes = [1, 8, 8, 8], strides = [1, 1, 1, 1]} : vector<1x10x10x8xf32> to vector<1x8x8x8xf32>
    %88 = vector.shape_cast %87 : vector<1x8x8x8xf32> to vector<64x8xf32>
    %89 = vector.extract_strided_slice %72 {offsets = [0, 2, 2, 0], sizes = [1, 8, 8, 8], strides = [1, 1, 1, 1]} : vector<1x10x10x8xf32> to vector<1x8x8x8xf32>
    %90 = vector.shape_cast %89 : vector<1x8x8x8xf32> to vector<64x8xf32>
    %91 = tpu.concatenate %74, %76, %78, %80, %82, %84, %86, %88, %90 in 1 : vector<64x8xf32>, vector<64x8xf32>, vector<64x8xf32>, vector<64x8xf32>, vector<64x8xf32>, vector<64x8xf32>, vector<64x8xf32>, vector<64x8xf32>, vector<64x8xf32> -> vector<64x72xf32>
    %92 = arith.truncf %91 : vector<64x72xf32> to vector<64x72xbf16>
    %cst_17 = arith.constant dense<0.000000e+00> : vector<64x128xf32>
    %93 = tpu.matmul %92, %68, %cst_17 {dimension_numbers = #tpu.dot_dimension_numbers<[1], [0], [0], [1], [0, 0, 1, 1], [], []>} : vector<64x72xbf16>, vector<72x128xbf16>, vector<64x128xf32> -> vector<64x128xf32>
    %94 = vector.broadcast %65 : vector<1x128xf32> to vector<64x128xf32>
    %95 = arith.mulf %93, %94 : vector<64x128xf32>
    %96 = vector.broadcast %66 : vector<1x128xf32> to vector<64x128xf32>
    %97 = arith.addf %95, %96 : vector<64x128xf32>
    %cst_18 = arith.constant 0.00999999977 : f32
    %98 = vector.broadcast %cst_18 : f32 to vector<64x128xf32>
    %99 = arith.mulf %98, %97 : vector<64x128xf32>
    %100 = arith.maximumf %97, %99 : vector<64x128xf32>
    %101 = vector.shape_cast %100 : vector<64x128xf32> to vector<1x8x8x128xf32>
    %102 = vector.extract_strided_slice %0 {offsets = [6, 0], sizes = [1, 128], strides = [1, 1]} : vector<8x128xf32> to vector<1x128xf32>
    %103 = vector.extract_strided_slice %0 {offsets = [7, 0], sizes = [1, 128], strides = [1, 1]} : vector<8x128xf32> to vector<1x128xf32>
    %104 = vector.extract_strided_slice %101 {offsets = [0, 0, 0, 0], sizes = [1, 8, 8, 16], strides = [1, 1, 1, 1]} : vector<1x8x8x128xf32> to vector<1x8x8x16xf32>
    %c0_19 = arith.constant 0 : index
    %c0_20 = arith.constant 0 : index
    %105 = vector.load %arg5[%c0_19, %c0_20] : memref<144x128xbf16, #tpu.memory_space<vmem>>, vector<144x128xbf16>
    %cst_21 = arith.constant 0.000000e+00 : f32
    %106 = vector.broadcast %cst_21 : f32 to vector<1x1x8x16xf32>
    %107 = tpu.concatenate %106, %104, %106 in 1 : vector<1x1x8x16xf32>, vector<1x8x8x16xf32>, vector<1x1x8x16xf32> -> vector<1x10x8x16xf32>
    %cst_22 = arith.constant 0.000000e+00 : f32
    %108 = vector.broadcast %cst_22 : f32 to vector<1x10x1x16xf32>
    %109 = tpu.concatenate %108, %107, %108 in 2 : vector<1x10x1x16xf32>, vector<1x10x8x16xf32>, vector<1x10x1x16xf32> -> vector<1x10x10x16xf32>
    %110 = vector.extract_strided_slice %109 {offsets = [0, 0, 0, 0], sizes = [1, 8, 8, 16], strides = [1, 1, 1, 1]} : vector<1x10x10x16xf32> to vector<1x8x8x16xf32>
    %111 = vector.shape_cast %110 : vector<1x8x8x16xf32> to vector<64x16xf32>
    %112 = vector.extract_strided_slice %109 {offsets = [0, 0, 1, 0], sizes = [1, 8, 8, 16], strides = [1, 1, 1, 1]} : vector<1x10x10x16xf32> to vector<1x8x8x16xf32>
    %113 = vector.shape_cast %112 : vector<1x8x8x16xf32> to vector<64x16xf32>
    %114 = vector.extract_strided_slice %109 {offsets = [0, 0, 2, 0], sizes = [1, 8, 8, 16], strides = [1, 1, 1, 1]} : vector<1x10x10x16xf32> to vector<1x8x8x16xf32>
    %115 = vector.shape_cast %114 : vector<1x8x8x16xf32> to vector<64x16xf32>
    %116 = vector.extract_strided_slice %109 {offsets = [0, 1, 0, 0], sizes = [1, 8, 8, 16], strides = [1, 1, 1, 1]} : vector<1x10x10x16xf32> to vector<1x8x8x16xf32>
    %117 = vector.shape_cast %116 : vector<1x8x8x16xf32> to vector<64x16xf32>
    %118 = vector.extract_strided_slice %109 {offsets = [0, 1, 1, 0], sizes = [1, 8, 8, 16], strides = [1, 1, 1, 1]} : vector<1x10x10x16xf32> to vector<1x8x8x16xf32>
    %119 = vector.shape_cast %118 : vector<1x8x8x16xf32> to vector<64x16xf32>
    %120 = vector.extract_strided_slice %109 {offsets = [0, 1, 2, 0], sizes = [1, 8, 8, 16], strides = [1, 1, 1, 1]} : vector<1x10x10x16xf32> to vector<1x8x8x16xf32>
    %121 = vector.shape_cast %120 : vector<1x8x8x16xf32> to vector<64x16xf32>
    %122 = vector.extract_strided_slice %109 {offsets = [0, 2, 0, 0], sizes = [1, 8, 8, 16], strides = [1, 1, 1, 1]} : vector<1x10x10x16xf32> to vector<1x8x8x16xf32>
    %123 = vector.shape_cast %122 : vector<1x8x8x16xf32> to vector<64x16xf32>
    %124 = vector.extract_strided_slice %109 {offsets = [0, 2, 1, 0], sizes = [1, 8, 8, 16], strides = [1, 1, 1, 1]} : vector<1x10x10x16xf32> to vector<1x8x8x16xf32>
    %125 = vector.shape_cast %124 : vector<1x8x8x16xf32> to vector<64x16xf32>
    %126 = vector.extract_strided_slice %109 {offsets = [0, 2, 2, 0], sizes = [1, 8, 8, 16], strides = [1, 1, 1, 1]} : vector<1x10x10x16xf32> to vector<1x8x8x16xf32>
    %127 = vector.shape_cast %126 : vector<1x8x8x16xf32> to vector<64x16xf32>
    %128 = tpu.concatenate %111, %113, %115, %117, %119, %121, %123, %125, %127 in 1 : vector<64x16xf32>, vector<64x16xf32>, vector<64x16xf32>, vector<64x16xf32>, vector<64x16xf32>, vector<64x16xf32>, vector<64x16xf32>, vector<64x16xf32>, vector<64x16xf32> -> vector<64x144xf32>
    %129 = arith.truncf %128 : vector<64x144xf32> to vector<64x144xbf16>
    %cst_23 = arith.constant dense<0.000000e+00> : vector<64x128xf32>
    %130 = tpu.matmul %129, %105, %cst_23 {dimension_numbers = #tpu.dot_dimension_numbers<[1], [0], [0], [1], [0, 0, 1, 1], [], []>} : vector<64x144xbf16>, vector<144x128xbf16>, vector<64x128xf32> -> vector<64x128xf32>
    %131 = vector.broadcast %102 : vector<1x128xf32> to vector<64x128xf32>
    %132 = arith.mulf %130, %131 : vector<64x128xf32>
    %133 = vector.broadcast %103 : vector<1x128xf32> to vector<64x128xf32>
    %134 = arith.addf %132, %133 : vector<64x128xf32>
    %cst_24 = arith.constant 0.00999999977 : f32
    %135 = vector.broadcast %cst_24 : f32 to vector<64x128xf32>
    %136 = arith.mulf %135, %134 : vector<64x128xf32>
    %137 = arith.maximumf %134, %136 : vector<64x128xf32>
    %138 = arith.addf %137, %100 : vector<64x128xf32>
    %139 = vector.shape_cast %138 : vector<64x128xf32> to vector<1x64x128xf32>
    %c0_25 = arith.constant 0 : index
    %c0_26 = arith.constant 0 : index
    %c0_27 = arith.constant 0 : index
    %140 = vector.load %arg7[%c0_25, %c0_26, %c0_27] : memref<1x64x128xf32, #tpu.memory_space<vmem>>, vector<1x64x128xf32>
    tpu.vector_store %arg7[%c0_25, %c0_26, %c0_27], %139 {strides = array<i32>} : memref<1x64x128xf32, #tpu.memory_space<vmem>>, vector<1x64x128xf32>,
    return
  }
  func.func @transform_0(%arg0: i32) -> (i32, i32, i32) {
    %c0_i32 = arith.constant 0 : i32
    %c0_i32_0 = arith.constant 0 : i32
    %c0_i32_1 = arith.constant 0 : i32
    return %arg0, %c0_i32, %c0_i32_0 : i32, i32, i32
  }
  func.func @transform_1(%arg0: i32) -> (i32, i32) {
    %c0_i32 = arith.constant 0 : i32
    %c0_i32_0 = arith.constant 0 : i32
    %c0_i32_1 = arith.constant 0 : i32
    return %c0_i32, %c0_i32_0 : i32, i32
  }
  func.func @transform_2(%arg0: i32) -> (i32, i32) {
    %c0_i32 = arith.constant 0 : i32
    %c0_i32_0 = arith.constant 0 : i32
    %c0_i32_1 = arith.constant 0 : i32
    return %c0_i32, %c0_i32_0 : i32, i32
  }
  func.func @transform_3(%arg0: i32) -> (i32, i32) {
    %c0_i32 = arith.constant 0 : i32
    %c0_i32_0 = arith.constant 0 : i32
    %c0_i32_1 = arith.constant 0 : i32
    return %c0_i32, %c0_i32_0 : i32, i32
  }
  func.func @transform_4(%arg0: i32) -> (i32, i32) {
    %c0_i32 = arith.constant 0 : i32
    %c0_i32_0 = arith.constant 0 : i32
    %c0_i32_1 = arith.constant 0 : i32
    return %c0_i32, %c0_i32_0 : i32, i32
  }
  func.func @transform_5(%arg0: i32) -> (i32, i32) {
    %c0_i32 = arith.constant 0 : i32
    %c0_i32_0 = arith.constant 0 : i32
    %c0_i32_1 = arith.constant 0 : i32
    return %c0_i32, %c0_i32_0 : i32, i32
  }
  func.func @transform_6(%arg0: i32) -> (i32, i32, i32) {
    %c0_i32 = arith.constant 0 : i32
    %c0_i32_0 = arith.constant 0 : i32
    %c0_i32_1 = arith.constant 0 : i32
    return %arg0, %c0_i32, %c0_i32_0 : i32, i32, i32
  }
}

</mosaic_0001>

<bundles_post_ra>
// kernel: pallas_forward.1
= control target key start
LH: loop header
LB: loop body
LE: loop exit
PB: predicated region body
PF: predicated region fallthrough
CT: control target
= control target key end

     0   :  { %s6059_s21 = smov 0   ;;  %s8491_s0 = inlined_call_operand.vmem [shape: bf16[2,256,36], index: 0, kind: input, shape index: {}]   ;;  %s8492_s1 = inlined_call_operand.vmem [shape: bf16[36,128], index: 1, kind: input, shape index: {}]   ;;  %s8493_s2 = inlined_call_operand.vmem [shape: bf16[72,128], index: 2, kind: input, shape index: {}]   ;;  %s8494_s3 = inlined_call_operand.vmem [shape: bf16[72,128], index: 3, kind: input, shape index: {}]   ;;  %s8495_s4 = inlined_call_operand.vmem [shape: bf16[144,128], index: 4, kind: input, shape index: {}]   ;;  %s8496_s5 = inlined_call_operand.vmem [shape: f32[8,128], index: 5, kind: input, shape index: {}]   ;;  %s8497_s6 = inlined_call_operand.vmem [shape: f32[2,64,128], index: 6, kind: output, shape index: {}]  }
   0x1 LB: > { %s4700_s22 = sadd.s32 4294967295, %s6008_s21   ;;  %p4704_p0 = scmp.ge.s32.totalorder %s6008_s21, 1  ;;  %s6008_s21 = sphi %s6059_s21, %s16_s21  }
   0x2   : > { %p212_p1 = scmp.lt.s32.totalorder %s6008_s21, 3 }
   0x4   : > { %p213_p2 = pnand %p4704_p0, %p212_p1 }
   0x6   : > { %216 = sbr.rel (%p213_p2) target bundleno = 1620 (0x654), region = 44 }
   0xd   : > { %v5962_v0 = vld [vmem:[%s8492_s1] sm:$0xff]   ;;  %v5963_v1 = vld [vmem:[%s8492_s1 + $0x8] sm:$0xff]   ;;  %p242_p3 = scmp.lt.s32.totalorder %s4700_s22, 1  ;;  %v5964_v2 = vld [vmem:[%s8492_s1 + $0x10] ss:$0 sps:$4 sm:$0x33]   ;;  %v600_v37 = vlaneseq }
   0xe   : > { %4904 = vmatprep.subr.bf16.mxu0 %v5962_v0  ;;  %vm435_vm0 = vcmask 1041408   ;;  %vm386_vm1 = vcmask 293888   ;;  %v6010_v20 = vmov 0.0   ;;  %vm778_vm2 = vcmask 1040384   ;;  %s6011_s9 = smov 48   ;;  %s6012_s10 = smov 16  }
   0xf   : > { %4905 = vmatpush3.bf16.msra.mxu0 %v5962_v0  ;;  %s8708_s22 = smov (!%p242_p3, %s4700_s22), 1  ;;  %v437_v4 = vsel %vm435_vm0, %v5964_v2, 0  ;;  %v6116_v21 = vrot.slane %v6010_v20, 7  ;;  %vm1025_vm3 = vcmask 1045504   ;;  %vm944_vm4 = vcmask 1046528   ;;  %s6013_s11 = smov 8  }
  0x10   : > { %4906 = vmatprep.subr.bf16.mxu0 %v5963_v1  ;;  %s4853_s29 = sshll.u32 %s8708_s22, 7  ;;  %v6155_v38 = vshrl.u32 %v600_v37, 7  ;;  %v253_v40 = vld [vmem:[%s8496_s5] sm:$0xff]  ;;  %s6014_s14 = smov 24   ;;  %vm2242_vm5 = vcmask 1043456   ;;  %vm1886_vm6 = vcmask 64512  }
  0x11   : > { %s6082_s8 = scalar_lea.vmem %s8491_s0, %s4853_s29  ;;  %v6120_v22 = vsel %vm778_vm2, 0.0, %v6116_v21  ;;  %v6126_v24 = vsel %vm778_vm2, %v6116_v21, 0.0  ;;  %v1027_v26 = vrot.slane %v6116_v21, 2  ;;  %v946_v29 = vrot.slane %v6116_v21, 1  ;;  %s6015_s15 = smov 32  }
  0x12   : > { %v5965_v3 = vld [vmem:[%s6082_s8] sm:$0xff]   ;;  %v5966_v5 = vld [vmem:[%s6082_s8 + $0x8] sm:$0xff]   ;;  %v5967_v6 = vld [vmem:[%s6082_s8 + $0x10] sm:$0xff]   ;;  %8554 = vst [vmem:[#allocation2_spill] sm:$0xff] %v6120_v22  ;;  %v5027_v23 = vpack.i.bf16 %v6116_v21, %v6120_v22  ;;  %v8498_v25 = vrot.slane %v6120_v22, 2  ;;  %v8499_v27 = vrot.slane %v6126_v24, 2 }
  0x13   : > { %4907 = vmatpush3.bf16.msra.mxu0 %v5963_v1  ;;  %4910 = vmatprep.mubr.msk.bf16.mxu0 %vm386_vm1, %v5965_v3  ;;  %v5968_v7 = vld [vmem:[%s6082_s8 + $0x18] sm:$0xff]   ;;  %v5969_v8 = vld [vmem:[%s6082_s8 + $0x20] sm:$0xff]   ;;  %v5970_v9 = vld [vmem:[%s6082_s8 + $0x28] sm:$0xff]   ;;  %8555 = vst [vmem:[#allocation3_spill] sm:$0xff] %v6126_v24  ;;  %v8500_v28 = vrot.slane %v6120_v22, 1  ;;  %v8501_v30 = vrot.slane %v6126_v24, 1 }
  0x14   : > { %5002 = vmatprep.subr.msk.bf16.mxu0 %vm435_vm0, %v5964_v2  ;;  %v5971_v10 = vld [vmem:[%s6082_s8 + $0x30] sm:$0xff]   ;;  %v5972_v11 = vld [vmem:[%s6082_s8 + $0x38] sm:$0xff]   ;;  %v5973_v12 = vld [vmem:[%s6082_s8 + $0x40] sm:$0xff]   ;;  %5028 = vrot.lane.b32.xlu1 %v5027_v23, %s6011_s9  ;;  %v1028_v31 = vsel %vm1025_vm3, %v8498_v25, %v1027_v26  ;;  %v1030_v32 = vsel %vm1025_vm3, %v1027_v26, %v8499_v27  ;;  %8558 = vst [vmem:[#allocation6_spill] sm:$0xff] %v6155_v38  ;;  %v6158_v39 = vsub.s32 0, %v6155_v38  ;;  %v638_v41 = vsub.s32 1, %v6155_v38 }
  0x15   : > { %v5974_v13 = vld [vmem:[%s6082_s8 + $0x48] sm:$0xff]   ;;  %v5975_v14 = vld [vmem:[%s6082_s8 + $0x50] sm:$0xff]   ;;  %v5976_v15 = vld [vmem:[%s6082_s8 + $0x58] sm:$0xff]   ;;  %v6141_v33 = vpack.i.bf16 %v1030_v32, %v1028_v31  ;;  %v947_v34 = vsel %vm944_vm4, %v8500_v28, %v946_v29  ;;  %v949_v35 = vsel %vm944_vm4, %v946_v29, %v8501_v30  ;;  %s6016_s16 = smov 56   ;;  %s6017_s17 = smov 40   ;;  %vm1919_vm7 = vcmask 130048  }
  0x16   : > { %v5977_v16 = vld [vmem:[%s6082_s8 + $0x60] sm:$0xff]   ;;  %v5978_v17 = vld [vmem:[%s6082_s8 + $0x68] sm:$0xff]   ;;  %v5979_v18 = vld [vmem:[%s6082_s8 + $0x70] sm:$0xff]   ;;  %v6149_v36 = vpack.i.bf16 %v949_v35, %v947_v34  ;;  %8559 = vst [vmem:[#allocation7_spill] sm:$0xff] %v6158_v39  ;;  %v6165_v42 = vrot.slane %v253_v40, %v6158_v39  ;;  %v6167_v43 = vrot.slane %v253_v40, %v638_v41  ;;  %s6018_s18 = smov 64   ;;  %vm8553_vm8 = vcmask 195584  }
  0x17   : > { %4909 = vmatpush3.bf16.msra.mxu0 %v437_v4  ;;  %v5980_v19 = vld [vmem:[%s6082_s8 + $0x78] sm:$0xff]   ;;  %8556 = vst [vmem:[#allocation4_spill] sm:$0xff] %v6141_v33  ;;  %vm8552_vm9 = vcmask 261120   ;;  %vm8551_vm10 = vcmask 326656   ;;  %vm8549_vm11 = vcmask 392192   ;;  %vm8548_vm12 = vcmask 457728  }
  0x18   : > { %8557 = vst [vmem:[#allocation5_spill] sm:$0xff] %v6149_v36  ;;  %5038 = vrot.lane.b32.xlu1 %v6141_v33, %s6012_s10  ;;  %5033 = vrot.lane.b32.xlu0 %v6149_v36, %s6013_s11  ;;  %vm8547_vm13 = vcmask 523264   ;;  %vm8546_vm14 = vcmask 588800   ;;  %vm3528_vm15 = vcmask 1041409   ;;  %vm3530_vm0 = vcmask 1042434   ;;  %s6021_s25 = smov 96  }
  0x19   : > { %s6023_s29 = smov 112  }
  0x1a   : > { %4911 = vmatmul.mubr.msk.bf16.vlgmr.msra.gmra.mrb[0].mxu0 %vm386_vm1, %v5966_v5 }
  0x1b   : > { %4914 = vmatprep.mubr.msk.bf16.mxu0 %vm386_vm1, %v5967_v6 }
  0x22   : > { %4915 = vmatmul.mubr.msk.bf16.gmra.mrb[4].mxu0 %vm386_vm1, %v5968_v7 }
  0x23   : > { %4918 = vmatprep.mubr.msk.bf16.mxu0 %vm386_vm1, %v5969_v8 }
  0x2a   : > { %4919 = vmatmul.mubr.msk.bf16.gmra.mrb[8].mxu0 %vm386_vm1, %v5970_v9 }
  0x2b   : > { %4922 = vmatprep.mubr.msk.bf16.mxu0 %vm386_vm1, %v5971_v10 }
  0x32   : > { %4923 = vmatmul.mubr.msk.bf16.gmra.mrb[12].mxu0 %vm386_vm1, %v5972_v11 }
  0x33   : > { %4926 = vmatprep.mubr.msk.bf16.mxu0 %vm386_vm1, %v5973_v12 }
  0x3a   : > { %4927 = vmatmul.mubr.msk.bf16.gmra.mrb[16].mxu0 %vm386_vm1, %v5974_v13 }
  0x3b   : > { %4930 = vmatprep.mubr.msk.bf16.mxu0 %vm386_vm1, %v5975_v14 }
  0x42   : > { %4931 = vmatmul.mubr.msk.bf16.gmra.mrb[20].mxu0 %vm386_vm1, %v5976_v15 }
  0x43   : > { %4934 = vmatprep.mubr.msk.bf16.mxu0 %vm386_vm1, %v5977_v16 }
  0x4a   : > { %4935 = vmatmul.mubr.msk.bf16.gmra.mrb[24].mxu0 %vm386_vm1, %v5978_v17 }
  0x4b   : > { %4938 = vmatprep.mubr.msk.bf16.mxu0 %vm386_vm1, %v5979_v18 }
  0x52   : > { %4939 = vmatmul.mubr.msk.bf16.gmra.mrb[28].mxu0 %vm386_vm1, %v5980_v19  ;;  %vm3532_vm1 = vcmask 1043459  }
  0xed   : > { %v4912_v44 = vpop.f32.mrb[0].mxu0 }
  0xee   : > { %v606_v45 = vmul.f32 %v4912_v44, %v6165_v42  ;;  %v473_v46 = vpop.f32.mrb[1].mxu0 }
  0xef   : > { %v604_v47 = vmul.f32 %v6165_v42, %v473_v46  ;;  %v4913_v48 = vpop.f32.mrb[2].mxu0 }
  0xf0   : > { %v642_v49 = vadd.f32 %v6167_v43, %v606_v45  ;;  %v607_v50 = vmul.f32 %v4913_v48, %v6165_v42  ;;  %v476_v51 = vpop.f32.mrb[3].mxu0 }
  0xf1   : > { %v640_v52 = vadd.f32 %v6167_v43, %v604_v47  ;;  %v605_v53 = vmul.f32 %v6165_v42, %v476_v51 }
  0xf2   : > { %v674_v54 = vmul.f32 0.01, %v642_v49  ;;  %v643_v55 = vadd.f32 %v6167_v43, %v607_v50 }
  0xf3   : > { %v672_v56 = vmul.f32 0.01, %v640_v52  ;;  %v641_v57 = vadd.f32 %v6167_v43, %v605_v53 }
  0xf4   : > { %v6177_v58 = vmax.f32 %v642_v49, %v674_v54  ;;  %v675_v59 = vmul.f32 0.01, %v643_v55 }
  0xf5   : > { %v673_v60 = vmul.f32 0.01, %v641_v57  ;;  %v4916_v61 = vpop.f32.mrb[4].mxu0  ;;  %v6180_v63 = vmax.f32 %v640_v52, %v672_v56 }
  0xf6   : > { %8560 = vst [vmem:[#allocation8_spill] sm:$0xff] %v6177_v58  ;;  %v784_v62 = vrot.slane %v6177_v58, 7  ;;  %v6182_v0 = vmax.f32 %v643_v55, %v675_v59  ;;  %v489_v1 = vpop.f32.mrb[5].mxu0  ;;  %v610_v3 = vmul.f32 %v4916_v61, %v6165_v42 }
  0xf7   : > { %8561 = vst [vmem:[#allocation9_spill] sm:$0xff] %v6180_v63  ;;  %v6184_v2 = vmax.f32 %v641_v57, %v673_v60  ;;  %v4917_v4 = vpop.f32.mrb[6].mxu0  ;;  %v781_v10 = vrot.slane %v6180_v63, 7  ;;  %v608_v13 = vmul.f32 %v6165_v42, %v489_v1 }
  0xf8   : > { %8562 = vst [vmem:[#allocation10_spill] sm:$0xff] %v6182_v0  ;;  %v785_v5 = vrot.slane %v6182_v0, 7  ;;  %v611_v6 = vmul.f32 %v4917_v4, %v6165_v42  ;;  %v492_v7 = vpop.f32.mrb[7].mxu0  ;;  %v6190_v8 = vsel %vm778_vm2, 0.0, %v784_v62  ;;  %v646_v16 = vadd.f32 %v6167_v43, %v610_v3 }
  0xf9   : > { %8563 = vst [vmem:[#allocation11_spill] sm:$0xff] %v6184_v2  ;;  %v782_v9 = vrot.slane %v6184_v2, 7  ;;  %v955_v18 = vrot.slane %v6190_v8, 1  ;;  %v609_v23 = vmul.f32 %v6165_v42, %v492_v7  ;;  %v6216_v34 = vsel %vm778_vm2, 0.0, %v781_v10 }
  0xfa   : > { %v897_v11 = vsel %vm778_vm2, %v785_v5, 0.0  ;;  %v6196_v12 = vsel %vm778_vm2, %v784_v62, %v785_v5  ;;  %v647_v17 = vadd.f32 %v6167_v43, %v611_v6  ;;  %v678_v41 = vmul.f32 0.01, %v646_v16 }
  0xfb   : > { %v958_v14 = vrot.slane %v897_v11, 1  ;;  %v5047_v15 = vpack.i.bf16 %v6196_v12, %v6190_v8  ;;  %v956_v19 = vrot.slane %v6196_v12, 1  ;;  %v6206_v20 = vsel %vm778_vm2, %v781_v10, %v782_v9 }
  0xfc   : > { %v1039_v29 = vrot.slane %v897_v11, 2  ;;  %v5052_v40 = vpack.i.bf16 %v6206_v20, %v6216_v34  ;;  %v679_v44 = vmul.f32 0.01, %v647_v17  ;;  %v644_v46 = vadd.f32 %v6167_v43, %v608_v13 }
  0xfd   : > { %5048 = vrot.lane.b32.xlu0 %v5047_v15, %s6011_s9  ;;  %v6210_v26 = vpop.f32.mrb[8].mxu0  ;;  %5043 = vrot.lane.b32.xlu1 %v5047_v15, %s6014_s14  ;;  %v957_v31 = vsel %vm944_vm4, %v955_v18, %v956_v19  ;;  %v959_v32 = vsel %vm944_vm4, %v956_v19, %v958_v14  ;;  %v1036_v47 = vrot.slane %v6190_v8, 2  ;;  %v1037_v48 = vrot.slane %v6196_v12, 2 }
  0xfe   : > { %v6218_v35 = vpop.f32.mrb[9].mxu0  ;;  %v5057_v37 = vpack.i.bf16 %v959_v32, %v957_v31  ;;  %v645_v50 = vadd.f32 %v6167_v43, %v609_v23  ;;  %v896_v51 = vsel %vm778_vm2, %v782_v9, 0.0  ;;  %v6235_v54 = vmax.f32 %v646_v16, %v678_v41 }
  0xff   : > { %v6222_v45 = vpop.f32.mrb[10].mxu0  ;;  %v1038_v52 = vsel %vm1025_vm3, %v1036_v47, %v1037_v48  ;;  %v1040_v53 = vsel %vm1025_vm3, %v1037_v48, %v1039_v29  ;;  %v6237_v55 = vmax.f32 %v647_v17, %v679_v44  ;;  %v676_v56 = vmul.f32 0.01, %v644_v46 }
 0x100   : > { %v6227_v49 = vpop.f32.mrb[11].mxu0  ;;  %8564 = vst [vmem:[#allocation12_spill] sm:$0xff] %v6235_v54  ;;  %v5062_v57 = vpack.i.bf16 %v1040_v53, %v1038_v52  ;;  %v677_v59 = vmul.f32 0.01, %v645_v50  ;;  %v1032_v60 = vrot.slane %v6206_v20, 2  ;;  %v1034_v61 = vrot.slane %v896_v51, 2 }
 0x101   : > { %5053 = vrot.lane.b32.xlu0 %v5052_v40, %s6014_s14  ;;  %5058 = vrot.lane.b32.xlu1 %v5057_v37, %s6015_s15  ;;  %8565 = vst [vmem:[#allocation13_spill] sm:$0xff] %v6237_v55  ;;  %v790_v3 = vrot.slane %v6235_v54, 7  ;;  %v791_v4 = vrot.slane %v6237_v55, 7  ;;  %v1031_v5 = vrot.slane %v6216_v34, 2  ;;  %v6251_v7 = vmax.f32 %v644_v46, %v676_v56 }
 0x102   : > { %v951_v9 = vrot.slane %v6206_v20, 1  ;;  %v953_v10 = vrot.slane %v896_v51, 1  ;;  %v6256_v13 = vmax.f32 %v645_v50, %v677_v59  ;;  %v1035_v15 = vsel %vm1025_vm3, %v1032_v60, %v1034_v61 }
 0x103   : > { %8566 = vst [vmem:[#allocation14_spill] sm:$0xff] %v6251_v7  ;;  %v1033_v14 = vsel %vm1025_vm3, %v1031_v5, %v1032_v60  ;;  %v950_v16 = vrot.slane %v6216_v34, 1  ;;  %v6264_v17 = vsel %vm778_vm2, 0.0, %v790_v3  ;;  %v6267_v18 = vsel %vm778_vm2, %v790_v3, %v791_v4 }
 0x104   : > { %8567 = vst [vmem:[#allocation15_spill] sm:$0xff] %v6256_v13  ;;  %v787_v19 = vrot.slane %v6251_v7, 7  ;;  %v5092_v23 = vpack.i.bf16 %v1035_v15, %v1033_v14  ;;  %v954_v31 = vsel %vm944_vm4, %v951_v9, %v953_v10  ;;  %v788_v32 = vrot.slane %v6256_v13, 7 }
 0x105   : > { %5068 = vrot.lane.b32.xlu0 %v5057_v37, %s6016_s16  ;;  %v6241_v62 = vpop.f32.mrb[12].mxu0  ;;  %5063 = vrot.lane.b32.xlu1 %v5062_v57, %s6017_s17  ;;  %v952_v29 = vsel %vm944_vm4, %v950_v16, %v951_v9  ;;  %v899_v40 = vsel %vm778_vm2, %v791_v4, 0.0  ;;  %v5107_v41 = vpack.i.bf16 %v6267_v18, %v6264_v17  ;;  %v965_v53 = vrot.slane %v6264_v17, 1  ;;  %v5981_v16 = vld [vmem:[%s8493_s2] sm:$0xff]  }
 0x106   : > { %v6244_v1 = vpop.f32.mrb[13].mxu0  ;;  %v5087_v46 = vpack.i.bf16 %v954_v31, %v952_v29  ;;  %v6285_v48 = vsel %vm778_vm2, 0.0, %v787_v19  ;;  %v968_v51 = vrot.slane %v899_v40, 1  ;;  %v6291_v52 = vsel %vm778_vm2, %v787_v19, %v788_v32  ;;  %4942 = vmatprep.subr.bf16.mxu1 %v5981_v16 }
 0x107   : > { %v6249_v6 = vpop.f32.mrb[14].mxu0  ;;  %v966_v56 = vrot.slane %v6267_v18, 1  ;;  %v5117_v59 = vpack.i.bf16 %v6291_v52, %v6285_v48  ;;  %v1046_v3 = vrot.slane %v6264_v17, 2  ;;  %v1047_v4 = vrot.slane %v6267_v18, 2  ;;  %4943 = vmatpush3.bf16.msra.mxu1 %v5981_v16 }
 0x108   : > { %v6254_v11 = vpop.f32.mrb[15].mxu0  ;;  %v614_v10 = vmul.f32 %v6210_v26, %v6165_v42  ;;  %v615_v14 = vmul.f32 %v6222_v45, %v6165_v42  ;;  %v898_v26 = vsel %vm778_vm2, %v788_v32, 0.0  ;;  %v613_v32 = vmul.f32 %v6165_v42, %v6227_v49 }
 0x109   : > { %5073 = vrot.lane.b32.xlu0 %v5062_v57, %s6018_s18  ;;  %5078 = vrot.lane.b32.xlu1 %v5057_v37, %s6013_s11  ;;  %v967_v60 = vsel %vm944_vm4, %v965_v53, %v966_v56  ;;  %v969_v61 = vsel %vm944_vm4, %v966_v56, %v968_v51  ;;  %v1048_v31 = vsel %vm1025_vm3, %v1046_v3, %v1047_v4  ;;  %v5982_v51 = vld [vmem:[%s8493_s2 + $0x8] sm:$0xff]   ;;  %v963_v56 = vrot.slane %v898_v26, 1 }
 0x10a   : > { %v5127_v19 = vpack.i.bf16 %v969_v61, %v967_v60  ;;  %v650_v45 = vadd.f32 %v6167_v43, %v614_v10  ;;  %v961_v60 = vrot.slane %v6291_v52, 1  ;;  %4944 = vmatprep.subr.bf16.mxu1 %v5982_v51  ;;  %v649_v49 = vadd.f32 %v6167_v43, %v613_v32 }
 0x10b   : > { %4945 = vmatpush3.bf16.msra.mxu1 %v5982_v51  ;;  %v618_v30 = vmul.f32 %v6241_v62, %v6165_v42  ;;  %v616_v62 = vmul.f32 %v6165_v42, %v6244_v1 }
 0x10c   : > { %v682_v61 = vmul.f32 0.01, %v650_v45  ;;  %v964_v10 = vsel %vm944_vm4, %v961_v60, %v963_v56  ;;  %v681_v32 = vmul.f32 0.01, %v649_v49  ;;  %v1041_v56 = vrot.slane %v6285_v48, 2 }
 0x10d   : > { %5083 = vrot.lane.b32.xlu0 %v5062_v57, %s6012_s10  ;;  %v6274_v37 = vpop.f32.mrb[16].mxu0  ;;  %5093 = vrot.lane.b32.xlu1 %v5092_v23, %s6012_s10  ;;  %v1049_v57 = vrot.slane %v899_v40, 2 }
 0x10e   : > { %v6280_v44 = vpop.f32.mrb[17].mxu0 }
 0x10f   : > { %v6282_v47 = vpop.f32.mrb[18].mxu0  ;;  %v1050_v40 = vsel %vm1025_vm3, %v1047_v4, %v1049_v57  ;;  %v960_v57 = vrot.slane %v6285_v48, 1 }
 0x110   : > { %v6287_v50 = vpop.f32.mrb[19].mxu0  ;;  %v5132_v53 = vpack.i.bf16 %v1050_v40, %v1048_v31  ;;  %v623_v13 = vmul.f32 %v6282_v47, %v6165_v42 }
 0x111   : > { %5088 = vrot.lane.b32.xlu0 %v5087_v46, %s6013_s11  ;;  %5108 = vrot.lane.b32.xlu1 %v5107_v41, %s6014_s14 }
 0x115   : > { %5098 = vrot.lane.b32.xlu0 %v5087_v46, %s6015_s15  ;;  %v6303_v5 = vpop.f32.mrb[20].mxu0  ;;  %5118 = vrot.lane.b32.xlu1 %v5117_v59, %s6011_s9  ;;  %v651_v46 = vadd.f32 %v6167_v43, %v615_v14  ;;  %v6346_v14 = vmax.f32 %v650_v45, %v682_v61 }
 0x116   : > { %v6306_v9 = vpop.f32.mrb[21].mxu0 }
 0x117   : > { %v6312_v15 = vpop.f32.mrb[22].mxu0  ;;  %v683_v3 = vmul.f32 0.01, %v651_v46  ;;  %8568 = vst [vmem:[#allocation16_spill] sm:$0xff] %v6346_v14  ;;  %v624_v24 = vmul.f32 %v6165_v42, %v6306_v9 }
 0x118   : > { %v6317_v29 = vpop.f32.mrb[23].mxu0 }
 0x119   : > { %5103 = vrot.lane.b32.xlu0 %v5092_v23, %s6017_s17  ;;  %5128 = vrot.lane.b32.xlu1 %v5127_v19, %s6015_s15  ;;  %v612_v23 = vmul.f32 %v6165_v42, %v6218_v35  ;;  %v5983_v35 = vld [vmem:[%s8493_s2 + $0x10] sm:$0xff]   ;;  %v6348_v16 = vmax.f32 %v651_v46, %v683_v3 }
 0x11a   : > { %4946 = vmatprep.subr.bf16.mxu1 %v5983_v35 }
 0x11b   : > { %v648_v4 = vadd.f32 %v6167_v43, %v612_v23  ;;  %4947 = vmatpush3.bf16.msra.mxu1 %v5983_v35  ;;  %8569 = vst [vmem:[#allocation17_spill] sm:$0xff] %v6348_v16  ;;  %v1044_v23 = vrot.slane %v898_v26, 2  ;;  %v797_v61 = vrot.slane %v6348_v16, 7 }
 0x11d   : > { %5113 = vrot.lane.b32.xlu0 %v5107_v41, %s6011_s9  ;;  %5133 = vrot.lane.b32.xlu1 %v5132_v53, %s6017_s17  ;;  %v962_v41 = vsel %vm944_vm4, %v960_v57, %v961_v60  ;;  %v680_v31 = vmul.f32 0.01, %v648_v4  ;;  %v6353_v51 = vpop.f32.mrb[24].mxu0  ;;  %v1042_v57 = vrot.slane %v6291_v52, 2  ;;  %v796_v60 = vrot.slane %v6346_v14, 7 }
 0x11e   : > { %v5157_v40 = vpack.i.bf16 %v964_v10, %v962_v41  ;;  %v6358_v45 = vpop.f32.mrb[25].mxu0 }
 0x11f   : > { %v6361_v46 = vpop.f32.mrb[26].mxu0  ;;  %v6367_v3 = vmax.f32 %v648_v4, %v680_v31  ;;  %v1043_v35 = vsel %vm1025_vm3, %v1041_v56, %v1042_v57  ;;  %v1045_v41 = vsel %vm1025_vm3, %v1042_v57, %v1044_v23  ;;  %v6376_v10 = vsel %vm778_vm2, 0.0, %v796_v60 }
 0x120   : > { %v6365_v26 = vpop.f32.mrb[27].mxu0  ;;  %v6379_v25 = vsel %vm778_vm2, %v796_v60, %v797_v61  ;;  %v5172_v4 = vpack.i.bf16 %v1045_v41, %v1043_v35  ;;  %v901_v31 = vsel %vm778_vm2, %v797_v61, 0.0  ;;  %v975_v60 = vrot.slane %v6376_v10, 1 }
 0x121   : > { %5123 = vrot.lane.b32.xlu0 %v5117_v59, %s6014_s14  ;;  %5148 = vrot.lane.b32.xlu1 %v5127_v19, %s6013_s11  ;;  %v5984_v59 = vld [vmem:[%s8493_s2 + $0x18] sm:$0xff]   ;;  %8570 = vst [vmem:[#allocation18_spill] sm:$0xff] %v6367_v3  ;;  %v5187_v23 = vpack.i.bf16 %v6379_v25, %v6376_v10  ;;  %v978_v56 = vrot.slane %v901_v31, 1  ;;  %v1059_v61 = vrot.slane %v901_v31, 2  ;;  %v1056_v28 = vrot.slane %v6376_v10, 2 }
 0x122   : > { %4948 = vmatprep.subr.bf16.mxu1 %v5984_v59  ;;  %v619_v31 = vmul.f32 %v6249_v6, %v6165_v42 }
 0x123   : > { %4949 = vmatpush3.bf16.msra.mxu1 %v5984_v59  ;;  %v793_v59 = vrot.slane %v6367_v3, 7 }
 0x124   : > { %v655_v16 = vadd.f32 %v6167_v43, %v619_v31 }
 0x125   : > { %5138 = vrot.lane.b32.xlu0 %v5127_v19, %s6016_s16  ;;  %5158 = vrot.lane.b32.xlu1 %v5157_v40, %s6016_s16  ;;  %v6369_v19 = vmax.f32 %v649_v49, %v681_v32  ;;  %v6389_v32 = vsel %vm778_vm2, 0.0, %v793_v59 }
 0x127   : > { %8571 = vst [vmem:[#allocation19_spill] sm:$0xff] %v6369_v19  ;;  %v794_v49 = vrot.slane %v6369_v19, 7 }
 0x129   : > { %5143 = vrot.lane.b32.xlu0 %v5132_v53, %s6018_s18  ;;  %5168 = vrot.lane.b32.xlu1 %v5157_v40, %s6013_s11  ;;  %v6393_v57 = vsel %vm778_vm2, %v793_v59, %v794_v49  ;;  %v1057_v59 = vrot.slane %v6379_v25, 2 }
 0x12a   : > { %v5197_v35 = vpack.i.bf16 %v6393_v57, %v6389_v32 }
 0x12d   : > { %5153 = vrot.lane.b32.xlu0 %v5132_v53, %s6012_s10  ;;  %5173 = vrot.lane.b32.xlu1 %v5172_v4, %s6012_s10  ;;  %v976_v53 = vrot.slane %v6379_v25, 1 }
 0x12f   : > { %v977_v41 = vsel %vm944_vm4, %v975_v60, %v976_v53  ;;  %v979_v27 = vsel %vm944_vm4, %v976_v53, %v978_v56  ;;  %v1060_v60 = vsel %vm1025_vm3, %v1057_v59, %v1059_v61  ;;  %v900_v56 = vsel %vm778_vm2, %v794_v49, 0.0 }
 0x130   : > { %v5207_v19 = vpack.i.bf16 %v979_v27, %v977_v41  ;;  %v654_v53 = vadd.f32 %v6167_v43, %v618_v30  ;;  %v973_v6 = vrot.slane %v900_v56, 1  ;;  %v617_v27 = vmul.f32 %v6165_v42, %v6254_v11 }
 0x131   : > { %5163 = vrot.lane.b32.xlu0 %v5172_v4, %s6018_s18  ;;  %5188 = vrot.lane.b32.xlu1 %v5187_v23, %s6014_s14  ;;  %v687_v30 = vmul.f32 0.01, %v655_v16  ;;  %v652_v61 = vadd.f32 %v6167_v43, %v616_v62  ;;  %v1054_v14 = vrot.slane %v900_v56, 2 }
 0x132   : > { %v686_v49 = vmul.f32 0.01, %v654_v53  ;;  %v653_v1 = vadd.f32 %v6167_v43, %v617_v27  ;;  %v1052_v27 = vrot.slane %v6393_v57, 2 }
 0x133   : > { %v684_v31 = vmul.f32 0.01, %v652_v61 }
 0x134   : > { %v6431_v11 = vmax.f32 %v654_v53, %v686_v49  ;;  %v685_v62 = vmul.f32 0.01, %v653_v1 }
 0x135   : > { %5178 = vrot.lane.b32.xlu0 %v5157_v40, %s6015_s15  ;;  %5198 = vrot.lane.b32.xlu1 %v5197_v35, %s6011_s9  ;;  %v1058_v40 = vsel %vm1025_vm3, %v1056_v28, %v1057_v59  ;;  %v970_v28 = vrot.slane %v6389_v32, 1  ;;  %v6433_v59 = vmax.f32 %v655_v16, %v687_v30  ;;  %v6449_v56 = vmax.f32 %v652_v61, %v684_v31  ;;  %v5985_v61 = vld [vmem:[%s8493_s2 + $0x20] ss:$0 sps:$4 sm:$0xff]  }
 0x136   : > { %v5212_v3 = vpack.i.bf16 %v1060_v60, %v1058_v40  ;;  %8572 = vst [vmem:[#allocation20_spill] sm:$0xff] %v6431_v11  ;;  %v6435_v60 = vpop.f32.mrb[28].mxu0  ;;  %v802_v16 = vrot.slane %v6431_v11, 7  ;;  %v6451_v49 = vmax.f32 %v653_v1, %v685_v62  ;;  %v1055_v30 = vsel %vm1025_vm3, %v1052_v27, %v1054_v14  ;;  %5003 = vmatprep.subr.msk.bf16.mxu1 %vm2242_vm5, %v5985_v61 }
 0x137   : > { %8573 = vst [vmem:[#allocation21_spill] sm:$0xff] %v6433_v59  ;;  %8574 = vst [vmem:[#allocation22_spill] sm:$0xff] %v6449_v56  ;;  %v799_v1 = vrot.slane %v6449_v56, 7 }
 0x138   : > { %8575 = vst [vmem:[#allocation23_spill] sm:$0xff] %v6451_v49  ;;  %v800_v62 = vrot.slane %v6451_v49, 7 }
 0x139   : > { %5183 = vrot.lane.b32.xlu0 %v5172_v4, %s6017_s17  ;;  %5208 = vrot.lane.b32.xlu1 %v5207_v19, %s6015_s15  ;;  %v971_v4 = vrot.slane %v6393_v57, 1 }
 0x13b   : > { %v972_v41 = vsel %vm944_vm4, %v970_v28, %v971_v4  ;;  %v6440_v28 = vpop.f32.mrb[29].mxu0 }
 0x13c   : > { %v6443_v53 = vpop.f32.mrb[30].mxu0 }
 0x13d   : > { %5193 = vrot.lane.b32.xlu0 %v5187_v23, %s6011_s9  ;;  %5213 = vrot.lane.b32.xlu1 %v5212_v3, %s6017_s17  ;;  %v974_v23 = vsel %vm944_vm4, %v971_v4, %v973_v6  ;;  %v803_v6 = vrot.slane %v6433_v59, 7  ;;  %v6447_v4 = vpop.f32.mrb[31].mxu0 }
 0x13e   : > { %v5237_v40 = vpack.i.bf16 %v974_v23, %v972_v41  ;;  %v6458_v41 = vsel %vm778_vm2, 0.0, %v802_v16 }
 0x13f   : > { %8576 = vst [vmem:[#allocation24_spill] sm:$0xff] %v6458_v41  ;;  %v6461_v23 = vsel %vm778_vm2, %v802_v16, %v803_v6  ;;  %v903_v14 = vsel %vm778_vm2, %v803_v6, 0.0  ;;  %v2244_v16 = vsel %vm2242_vm5, %v5985_v61, 0  ;;  %v985_v6 = vrot.slane %v6458_v41, 1 }
 0x140   : > { %8577 = vst [vmem:[#allocation25_spill] sm:$0xff] %v6461_v23  ;;  %4951 = vmatpush3.bf16.msra.mxu1 %v2244_v16  ;;  %v1066_v59 = vrot.slane %v6458_v41, 2  ;;  %v1069_v56 = vrot.slane %v903_v14, 2  ;;  %v1067_v11 = vrot.slane %v6461_v23, 2  ;;  %v622_v16 = vmul.f32 %v6274_v37, %v6165_v42 }
 0x141   : > { %5203 = vrot.lane.b32.xlu0 %v5197_v35, %s6014_s14  ;;  %5228 = vrot.lane.b32.xlu1 %v5207_v19, %s6013_s11  ;;  %v1051_v35 = vrot.slane %v6389_v32, 2  ;;  %v620_v37 = vmul.f32 %v6165_v42, %v6280_v44 }
 0x145   : > { %5218 = vrot.lane.b32.xlu0 %v5207_v19, %s6016_s16  ;;  %5238 = vrot.lane.b32.xlu1 %v5237_v40, %s6016_s16  ;;  %v1053_v19 = vsel %vm1025_vm3, %v1051_v35, %v1052_v27  ;;  %v5267_v35 = vpack.i.bf16 %v6461_v23, %v6458_v41  ;;  %v6475_v27 = vsel %vm778_vm2, 0.0, %v799_v1 }
 0x146   : > { %v5252_v31 = vpack.i.bf16 %v1055_v30, %v1053_v19  ;;  %8578 = vst [vmem:[#allocation26_spill] sm:$0xff] %v6475_v27  ;;  %v988_v19 = vrot.slane %v903_v14, 1  ;;  %v986_v30 = vrot.slane %v6461_v23, 1  ;;  %v1068_v14 = vsel %vm1025_vm3, %v1066_v59, %v1067_v11 }
 0x147   : > { %v621_v59 = vmul.f32 %v6165_v42, %v6287_v50 }
 0x148   : > { %v987_v61 = vsel %vm944_vm4, %v985_v6, %v986_v30  ;;  %v902_v6 = vsel %vm778_vm2, %v800_v62, 0.0 }
 0x149   : > { %5223 = vrot.lane.b32.xlu0 %v5212_v3, %s6018_s18  ;;  %5248 = vrot.lane.b32.xlu1 %v5237_v40, %s6013_s11  ;;  %v983_v47 = vrot.slane %v902_v6, 1  ;;  %v657_v44 = vadd.f32 %v6167_v43, %v621_v59  ;;  %v1064_v54 = vrot.slane %v902_v6, 2  ;;  %v6535_v6 = vpop.permute.xlu0 %5033 }
 0x14d   : > { %5233 = vrot.lane.b32.xlu0 %v5212_v3, %s6012_s10  ;;  %5253 = vrot.lane.b32.xlu1 %v5252_v31, %s6012_s10  ;;  %v6480_v3 = vsel %vm778_vm2, %v799_v1, %v800_v62  ;;  %v989_v1 = vsel %vm944_vm4, %v986_v30, %v988_v19  ;;  %v658_v19 = vadd.f32 %v6167_v43, %v622_v16 }
 0x14e   : > { %8579 = vst [vmem:[#allocation27_spill] sm:$0xff] %v6480_v3  ;;  %v5277_v49 = vpack.i.bf16 %v6480_v3, %v6475_v27  ;;  %v5287_v55 = vpack.i.bf16 %v989_v1, %v987_v61  ;;  %v659_v30 = vadd.f32 %v6167_v43, %v623_v13  ;;  %v656_v13 = vadd.f32 %v6167_v43, %v620_v37 }
 0x14f   : > { %v689_v37 = vmul.f32 0.01, %v657_v44  ;;  %v1062_v59 = vrot.slane %v6480_v3, 2 }
 0x150   : > { %v691_v62 = vmul.f32 0.01, %v659_v30  ;;  %v688_v16 = vmul.f32 0.01, %v656_v13 }
 0x151   : > { %5243 = vrot.lane.b32.xlu0 %v5252_v31, %s6018_s18  ;;  %5268 = vrot.lane.b32.xlu1 %v5267_v35, %s6014_s14 }
 0x152   : > { %v6520_v1 = vmax.f32 %v659_v30, %v691_v62  ;;  %v6530_v30 = vmax.f32 %v656_v13, %v688_v16 }
 0x154   : > { %8581 = vst [vmem:[#allocation29_spill] sm:$0xff] %v6520_v1  ;;  %8583 = vst [vmem:[#allocation31_spill] sm:$0xff] %v6530_v30 }
 0x155   : > { %5258 = vrot.lane.b32.xlu0 %v5237_v40, %s6015_s15  ;;  %5278 = vrot.lane.b32.xlu1 %v5277_v49, %s6011_s9  ;;  %v1070_v40 = vsel %vm1025_vm3, %v1067_v11, %v1069_v56  ;;  %v980_v11 = vrot.slane %v6475_v27, 1  ;;  %v981_v56 = vrot.slane %v6480_v3, 1 }
 0x156   : > { %v5292_v7 = vpack.i.bf16 %v1070_v40, %v1068_v14  ;;  %v6522_v40 = vpop.permute.xlu1 %5028 }
 0x157   : > { %v982_v61 = vsel %vm944_vm4, %v980_v11, %v981_v56  ;;  %8582 = vst [vmem:[#allocation30_spill] sm:$0xff] %v6522_v40  ;;  %v6532_v11 = vmax.f32 %v657_v44, %v689_v37  ;;  %v805_v44 = vrot.slane %v6530_v30, 7 }
 0x159   : > { %5263 = vrot.lane.b32.xlu0 %v5252_v31, %s6017_s17  ;;  %5288 = vrot.lane.b32.xlu1 %v5287_v55, %s6015_s15  ;;  %v690_v31 = vmul.f32 0.01, %v658_v19  ;;  %8584 = vst [vmem:[#allocation32_spill] sm:$0xff] %v6532_v11 }
 0x15b   : > { %v6518_v50 = vmax.f32 %v658_v19, %v690_v31  ;;  %v809_v19 = vrot.slane %v6520_v1, 7  ;;  %v6540_v31 = vpop.permute.xlu1 %5038  ;;  %v627_v1 = vmul.f32 %v6312_v15, %v6165_v42 }
 0x15d   : > { %5273 = vrot.lane.b32.xlu0 %v5267_v35, %s6011_s9  ;;  %5293 = vrot.lane.b32.xlu1 %v5292_v7, %s6017_s17  ;;  %v984_v35 = vsel %vm944_vm4, %v981_v56, %v983_v47  ;;  %8580 = vst [vmem:[#allocation28_spill] sm:$0xff] %v6518_v50  ;;  %v808_v47 = vrot.slane %v6518_v50, 7  ;;  %v1065_v56 = vsel %vm1025_vm3, %v1062_v59, %v1064_v54  ;;  %v905_v16 = vsel %vm778_vm2, %v809_v19, 0.0 }
 0x15e   : > { %v5317_v14 = vpack.i.bf16 %v984_v35, %v982_v61  ;;  %v806_v35 = vrot.slane %v6532_v11, 7  ;;  %v1079_v30 = vrot.slane %v905_v16, 2  ;;  %v663_v9 = vadd.f32 %v6167_v43, %v627_v1 }
 0x15f   : > { %v6543_v62 = vsel %vm778_vm2, 0.0, %v808_v47  ;;  %v6546_v13 = vsel %vm778_vm2, %v808_v47, %v809_v19  ;;  %v998_v47 = vrot.slane %v905_v16, 1  ;;  %v625_v16 = vmul.f32 %v6165_v42, %v6317_v29 }
 0x160   : > { %8585 = vst [vmem:[#allocation33_spill] sm:$0xff] %v6543_v62  ;;  %8586 = vst [vmem:[#allocation34_spill] sm:$0xff] %v6546_v13  ;;  %v5347_v54 = vpack.i.bf16 %v6546_v13, %v6543_v62  ;;  %v996_v19 = vrot.slane %v6546_v13, 1  ;;  %v1076_v2 = vrot.slane %v6543_v62, 2  ;;  %v1077_v0 = vrot.slane %v6546_v13, 2 }
 0x161   : > { %5283 = vrot.lane.b32.xlu0 %v5277_v49, %s6014_s14  ;;  %5308 = vrot.lane.b32.xlu1 %v5287_v55, %s6013_s11  ;;  %v1061_v49 = vrot.slane %v6475_v27, 2  ;;  %v661_v38 = vadd.f32 %v6167_v43, %v625_v16  ;;  %v695_v1 = vmul.f32 0.01, %v663_v9  ;;  %v5041_v13 = vunpack.i.h.bf16 %v6540_v31 }
 0x162   : > { %v1080_v58 = vsel %vm1025_vm3, %v1077_v0, %v1079_v30 }
 0x165   : > { %5298 = vrot.lane.b32.xlu0 %v5287_v55, %s6016_s16  ;;  %5318 = vrot.lane.b32.xlu1 %v5317_v14, %s6016_s16  ;;  %v1063_v55 = vsel %vm1025_vm3, %v1061_v49, %v1062_v59  ;;  %v6558_v49 = vsel %vm778_vm2, 0.0, %v805_v44 }
 0x166   : > { %v5332_v61 = vpack.i.bf16 %v1065_v56, %v1063_v55  ;;  %8587 = vst [vmem:[#allocation35_spill] sm:$0xff] %v6558_v49  ;;  %v6564_v55 = vsel %vm778_vm2, %v805_v44, %v806_v35  ;;  %v626_v56 = vmul.f32 %v6303_v5, %v6165_v42  ;;  %v999_v5 = vsel %vm944_vm4, %v996_v19, %v998_v47 }
 0x167   : > { %8588 = vst [vmem:[#allocation36_spill] sm:$0xff] %v6564_v55  ;;  %v5357_v44 = vpack.i.bf16 %v6564_v55, %v6558_v49  ;;  %v660_v47 = vadd.f32 %v6167_v43, %v624_v24  ;;  %v991_v30 = vrot.slane %v6564_v55, 1 }
 0x168   : > { %v662_v15 = vadd.f32 %v6167_v43, %v626_v56  ;;  %v904_v56 = vsel %vm778_vm2, %v806_v35, 0.0  ;;  %v5036_v35 = vunpack.i.h.bf16 %v6535_v6 }
 0x169   : > { %5303 = vrot.lane.b32.xlu0 %v5292_v7, %s6018_s18  ;;  %5328 = vrot.lane.b32.xlu1 %v5317_v14, %s6013_s11  ;;  %v692_v24 = vmul.f32 0.01, %v660_v47 }
 0x16a   : > { %v694_v29 = vmul.f32 0.01, %v662_v15 }
 0x16b   : > { %v6625_v23 = vmax.f32 %v660_v47, %v692_v24 }
 0x16d   : > { %5313 = vrot.lane.b32.xlu0 %v5292_v7, %s6012_s10  ;;  %5333 = vrot.lane.b32.xlu1 %v5332_v61, %s6012_s10  ;;  %v995_v7 = vrot.slane %v6543_v62, 1  ;;  %8591 = vst [vmem:[#allocation39_spill] sm:$0xff] %v6625_v23 }
 0x16f   : > { %v6555_v37 = vpop.permute.xlu0 %5048  ;;  %v6560_v59 = vpop.permute.xlu1 %5043  ;;  %v997_v39 = vsel %vm944_vm4, %v995_v7, %v996_v19  ;;  %v1078_v19 = vsel %vm1025_vm3, %v1076_v2, %v1077_v0  ;;  %v5035_v2 = vunpack.i.l.bf16 %v6535_v6  ;;  %v990_v0 = vrot.slane %v6558_v49, 1 }
 0x170   : > { %v5367_v7 = vpack.i.bf16 %v999_v5, %v997_v39  ;;  %v6606_v39 = vpack.i.bf16 %v1080_v58, %v1078_v19  ;;  %v6615_v5 = vmax.f32 %v662_v15, %v694_v29  ;;  %v693_v58 = vmul.f32 0.01, %v661_v38 }
 0x171   : > { %5323 = vrot.lane.b32.xlu0 %v5332_v61, %s6018_s18  ;;  %5348 = vrot.lane.b32.xlu1 %v5347_v54, %s6014_s14  ;;  %v6619_v19 = vmax.f32 %v663_v9, %v695_v1  ;;  %v1887_v6 = vsel %vm1886_vm6, %v6120_v22, %v5035_v2  ;;  %v992_v15 = vsel %vm944_vm4, %v990_v0, %v991_v30  ;;  %v1074_v9 = vrot.slane %v904_v56, 2 }
 0x172   : > { %8589 = vst [vmem:[#allocation37_spill] sm:$0xff] %v6615_v5  ;;  %v1888_v1 = vsel %vm1886_vm6, %v6116_v21, %v5036_v35  ;;  %v6636_v47 = vmax.f32 %v661_v38, %v693_v58  ;;  %v1072_v0 = vrot.slane %v6564_v55, 2  ;;  %v630_v22 = vmul.f32 %v6353_v51, %v6165_v42 }
 0x173   : > { %v6571_v11 = vpop.permute.xlu0 %5053  ;;  %v6575_v50 = vpop.permute.xlu1 %5058  ;;  %8590 = vst [vmem:[#allocation38_spill] sm:$0xff] %v6619_v19  ;;  %v815_v2 = vrot.slane %v6619_v19, 7  ;;  %v1921_v38 = vsel %vm1919_vm7, %v1888_v1, %v5041_v13  ;;  %v5051_v3 = vunpack.i.h.bf16 %v6555_v37 }
 0x174   : > { %8592 = vst [vmem:[#allocation40_spill] sm:$0xff] %v6636_v47  ;;  %v812_v58 = vrot.slane %v6636_v47, 7  ;;  %v1075_v13 = vsel %vm1025_vm3, %v1072_v0, %v1074_v9  ;;  %v5055_v1 = vunpack.i.l.bf16 %v6571_v11 }
 0x175   : > { %5338 = vrot.lane.b32.xlu0 %v5317_v14, %s6015_s15  ;;  %5358 = vrot.lane.b32.xlu1 %v5357_v44, %s6011_s9 }
 0x177   : > { %v6590_v63 = vpop.permute.xlu0 %5068  ;;  %v6593_v14 = vpop.permute.xlu1 %5063 }
 0x178   : > { %v5071_v51 = vunpack.i.h.bf16 %v6590_v63 }
 0x179   : > { %5343 = vrot.lane.b32.xlu0 %v5332_v61, %s6017_s17  ;;  %5368 = vrot.lane.b32.xlu1 %v5367_v7, %s6015_s15  ;;  %v993_v61 = vrot.slane %v904_v56, 1  ;;  %v811_v56 = vrot.slane %v6625_v23, 7 }
 0x17b   : > { %v6602_v40 = vpop.permute.xlu0 %5073  ;;  %v6604_v62 = vpop.permute.xlu1 %5078  ;;  %v994_v29 = vsel %vm944_vm4, %v991_v30, %v993_v61  ;;  %v6668_v47 = vsel %vm778_vm2, 0.0, %v811_v56 }
 0x17c   : > { %v6647_v30 = vpack.i.bf16 %v994_v29, %v992_v15  ;;  %v5056_v29 = vunpack.i.h.bf16 %v6571_v11 }
 0x17d   : > { %5353 = vrot.lane.b32.xlu0 %v5347_v54, %s6011_s9  ;;  %5373 = vrot.lane.b32.xlu1 %v6606_v39, %s6017_s17  ;;  %v5040_v54 = vunpack.i.l.bf16 %v6540_v31  ;;  %v814_v31 = vrot.slane %v6615_v5, 7 }
 0x17f   : > { %v6617_v16 = vpop.permute.xlu0 %5083  ;;  %v6623_v41 = vpop.permute.xlu1 %5093  ;;  %v1920_v61 = vsel %vm1919_vm7, %v1887_v6, %v5040_v54  ;;  %v6652_v35 = vsel %vm778_vm2, 0.0, %v814_v31  ;;  %v6658_v54 = vsel %vm778_vm2, %v815_v2, 0.0 }
 0x180   : > { %v1008_v9 = vrot.slane %v6658_v54, 1 }
 0x181   : > { %5363 = vrot.lane.b32.xlu0 %v5357_v44, %s6014_s14  ;;  %5388 = vrot.lane.b32.xlu1 %v5367_v7, %s6013_s11  ;;  %v1071_v44 = vrot.slane %v6558_v49, 2  ;;  %v1954_v49 = vsel %vm8553_vm8, %v1921_v38, %v5056_v29  ;;  %v5070_v38 = vunpack.i.l.bf16 %v6590_v63 }
 0x183   : > { %v6638_v24 = vpop.permute.xlu0 %5088  ;;  %v6645_v21 = vpop.permute.xlu1 %5108  ;;  %v1073_v15 = vsel %vm1025_vm3, %v1071_v44, %v1072_v0  ;;  %v6684_v44 = vsel %vm778_vm2, %v811_v56, %v812_v58  ;;  %v1005_v0 = vrot.slane %v6652_v35, 1  ;;  %v5050_v56 = vunpack.i.l.bf16 %v6555_v37 }
 0x184   : > { %v5076_v37 = vunpack.i.h.bf16 %v6602_v40 }
 0x185   : > { %5378 = vrot.lane.b32.xlu0 %v5367_v7, %s6016_s16  ;;  %5398 = vrot.lane.b32.xlu1 %v6647_v30, %s6016_s16  ;;  %v6663_v7 = vsel %vm778_vm2, %v814_v31, %v815_v2  ;;  %v6677_v31 = vpack.i.bf16 %v1075_v13, %v1073_v15  ;;  %v1953_v15 = vsel %vm8553_vm8, %v1920_v61, %v5055_v1 }
 0x186   : > { %v6681_v11 = vpack.i.bf16 %v6663_v7, %v6652_v35 }
 0x187   : > { %v5099_v6 = vpop.permute.xlu0 %5098  ;;  %v6670_v19 = vpop.permute.xlu1 %5118 }
 0x188   : > { %v5101_v23 = vunpack.i.h.bf16 %v5099_v6  ;;  %v5100_v5 = vunpack.i.l.bf16 %v5099_v6  ;;  %v1006_v6 = vrot.slane %v6663_v7, 1 }
 0x189   : > { %5383 = vrot.lane.b32.xlu0 %v6606_v39, %s6018_s18  ;;  %5408 = vrot.lane.b32.xlu1 %v6647_v30, %s6013_s11 }
 0x18a   : > { %v1987_v33 = vsel %vm8552_vm9, %v1954_v49, %v5101_v23  ;;  %v1986_v36 = vsel %vm8552_vm9, %v1953_v15, %v5100_v5  ;;  %v5075_v23 = vunpack.i.l.bf16 %v6602_v40  ;;  %v5091_v40 = vunpack.i.h.bf16 %v6638_v24 }
 0x18b   : > { %v5104_v2 = vpop.permute.xlu0 %5103  ;;  %v6692_v27 = vpop.permute.xlu1 %5128 }
 0x18c   : > { %v5106_v13 = vunpack.i.h.bf16 %v5104_v2  ;;  %v5105_v55 = vunpack.i.l.bf16 %v5104_v2  ;;  %v5090_v2 = vunpack.i.l.bf16 %v6638_v24  ;;  %v1086_v24 = vrot.slane %v6652_v35, 2 }
 0x18d   : > { %5393 = vrot.lane.b32.xlu0 %v6606_v39, %s6012_s10  ;;  %5413 = vrot.lane.b32.xlu1 %v6677_v31, %s6012_s10 }
 0x18e   : > { %v2019_v61 = vsel %vm8551_vm10, %v1986_v36, %v5105_v55  ;;  %v2020_v29 = vsel %vm8551_vm10, %v1987_v33, %v5106_v13  ;;  %v628_v33 = vmul.f32 %v6165_v42, %v6358_v45  ;;  %v631_v55 = vmul.f32 %v6361_v46, %v6165_v42 }
 0x18f   : > { %v6708_v49 = vpop.permute.xlu0 %5113  ;;  %v2052_v5 = vsel %vm8549_vm11, %v2019_v61, %v5050_v56  ;;  %v2053_v39 = vsel %vm8549_vm11, %v2020_v29, %v5051_v3  ;;  %v6712_v1 = vpop.permute.xlu1 %5133  ;;  %v1089_v45 = vrot.slane %v6658_v54, 2  ;;  %v6730_v56 = vsel %vm778_vm2, %v812_v58, 0.0 }
 0x190   : > { %v2085_v63 = vsel %vm8548_vm12, %v2052_v5, %v5070_v38  ;;  %v2086_v36 = vsel %vm8548_vm12, %v2053_v39, %v5071_v51  ;;  %v1087_v51 = vrot.slane %v6663_v7, 2  ;;  %v5437_v61 = vpack.i.bf16 %v6684_v44, %v6668_v47 }
 0x191   : > { %5403 = vrot.lane.b32.xlu0 %v6677_v31, %s6018_s18  ;;  %v2118_v3 = vsel %vm8547_vm13, %v2085_v63, %v5075_v23  ;;  %v2119_v15 = vsel %vm8547_vm13, %v2086_v36, %v5076_v37  ;;  %5428 = vrot.lane.b32.xlu1 %v6681_v11, %s6014_s14  ;;  %v1007_v29 = vsel %vm944_vm4, %v1005_v0, %v1006_v6  ;;  %v5096_v63 = vunpack.i.h.bf16 %v6623_v41 }
 0x192   : > { %v2150_v13 = vpack.c.bf16 %v2119_v15, %v2118_v3  ;;  %v1009_v54 = vsel %vm944_vm4, %v1006_v6, %v1008_v9  ;;  %v666_v58 = vadd.f32 %v6167_v43, %v630_v22  ;;  %v1890_v37 = vsel %vm1886_vm6, %v6206_v20, %v5091_v40 }
 0x193   : > { %v6732_v46 = vpop.permute.xlu0 %5123  ;;  %v6736_v38 = vpop.permute.xlu1 %5148  ;;  %v1889_v23 = vsel %vm1886_vm6, %v6216_v34, %v5090_v2  ;;  %v664_v5 = vadd.f32 %v6167_v43, %v628_v33  ;;  %v667_v39 = vadd.f32 %v6167_v43, %v631_v55  ;;  %v5095_v0 = vunpack.i.l.bf16 %v6623_v41 }
 0x194   : > { %4952 = vmatprep.mubr.msk.bf16.mxu1 %vm8546_vm14, %v2150_v13  ;;  %v629_v22 = vmul.f32 %v6165_v42, %v6365_v26  ;;  %v1003_v20 = vrot.slane %v6730_v56, 1  ;;  %v6760_v34 = vpack.i.bf16 %v1009_v54, %v1007_v29  ;;  %v1923_v6 = vsel %vm1919_vm7, %v1890_v37, %v5096_v63 }
 0x195   : > { %5418 = vrot.lane.b32.xlu0 %v6647_v30, %s6015_s15  ;;  %5438 = vrot.lane.b32.xlu1 %v5437_v61, %s6011_s9  ;;  %v1088_v30 = vsel %vm1025_vm3, %v1086_v24, %v1087_v51  ;;  %v1922_v36 = vsel %vm1919_vm7, %v1889_v23, %v5095_v0  ;;  %v1090_v41 = vsel %vm1025_vm3, %v1087_v51, %v1089_v45  ;;  %v698_v55 = vmul.f32 0.01, %v666_v58 }
 0x196   : > { %v5046_v40 = vunpack.i.h.bf16 %v6560_v59  ;;  %v5045_v26 = vunpack.i.l.bf16 %v6560_v59  ;;  %v696_v2 = vmul.f32 0.01, %v664_v5  ;;  %v699_v3 = vmul.f32 0.01, %v667_v39 }
 0x197   : > { %v6758_v9 = vpop.permute.xlu0 %5138  ;;  %v5159_v33 = vpop.permute.xlu1 %5158  ;;  %v1084_v15 = vrot.slane %v6730_v56, 2  ;;  %v665_v13 = vadd.f32 %v6167_v43, %v629_v22  ;;  %v1000_v59 = vrot.slane %v6668_v47, 1  ;;  %v1001_v29 = vrot.slane %v6684_v44, 1 }
 0x198   : > { %v1956_v24 = vsel %vm8553_vm8, %v1923_v6, %v5046_v40  ;;  %v1955_v45 = vsel %vm8553_vm8, %v1922_v36, %v5045_v26  ;;  %v5060_v54 = vunpack.i.l.bf16 %v6575_v50  ;;  %v6784_v37 = vpack.i.bf16 %v1090_v41, %v1088_v30 }
 0x199   : > { %5423 = vrot.lane.b32.xlu0 %v6677_v31, %s6017_s17  ;;  %5448 = vrot.lane.b32.xlu1 %v6760_v34, %s6015_s15  ;;  %v5061_v31 = vunpack.i.h.bf16 %v6575_v50  ;;  %v6786_v23 = vmax.f32 %v666_v58, %v698_v55  ;;  %v6790_v63 = vmax.f32 %v664_v5, %v696_v2  ;;  %v6792_v0 = vmax.f32 %v667_v39, %v699_v3 }
 0x19a   : > { %v1988_v22 = vsel %vm8552_vm9, %v1955_v45, %v5060_v54  ;;  %v697_v50 = vmul.f32 0.01, %v665_v13  ;;  %v1081_v30 = vrot.slane %v6668_v47, 2  ;;  %v5066_v58 = vunpack.i.h.bf16 %v6593_v14 }
 0x19b   : > { %v6776_v51 = vpop.permute.xlu0 %5143  ;;  %v6782_v56 = vpop.permute.xlu1 %5168  ;;  %8593 = vst [vmem:[#allocation41_spill] sm:$0xff] %v6786_v23  ;;  %v1989_v6 = vsel %vm8552_vm9, %v1956_v24, %v5061_v31  ;;  %v5065_v36 = vunpack.i.l.bf16 %v6593_v14  ;;  %v1082_v5 = vrot.slane %v6684_v44, 2  ;;  %v5121_v39 = vunpack.i.h.bf16 %v6670_v19 }
 0x19c   : > { %v5120_v55 = vunpack.i.l.bf16 %v6670_v19  ;;  %v820_v26 = vrot.slane %v6786_v23, 7  ;;  %v1004_v2 = vsel %vm944_vm4, %v1001_v29, %v1003_v20  ;;  %v2022_v14 = vsel %vm8551_vm10, %v1989_v6, %v5066_v58 }
 0x19d   : > { %5433 = vrot.lane.b32.xlu0 %v6681_v11, %s6011_s9  ;;  %5453 = vrot.lane.b32.xlu1 %v6784_v37, %s6017_s17  ;;  %v1002_v11 = vsel %vm944_vm4, %v1000_v59, %v1001_v29  ;;  %v2021_v3 = vsel %vm8551_vm10, %v1988_v22, %v5065_v36  ;;  %v5161_v24 = vunpack.i.h.bf16 %v5159_v33  ;;  %v5160_v45 = vunpack.i.l.bf16 %v5159_v33 }
 0x19e   : > { %v821_v19 = vrot.slane %v6792_v0, 7  ;;  %v6818_v54 = vmax.f32 %v665_v13, %v697_v50  ;;  %v6820_v23 = vpack.i.bf16 %v1004_v2, %v1002_v11  ;;  %v1083_v20 = vsel %vm1025_vm3, %v1081_v30, %v1082_v5 }
 0x19f   : > { %v6801_v41 = vpop.permute.xlu0 %5153  ;;  %v6807_v40 = vpop.permute.xlu1 %5173  ;;  %v2055_v29 = vsel %vm8549_vm11, %v2022_v14, %v5121_v39  ;;  %v2054_v33 = vsel %vm8549_vm11, %v2021_v3, %v5120_v55  ;;  %v6830_v59 = vsel %vm778_vm2, 0.0, %v820_v26  ;;  %v1085_v13 = vsel %vm1025_vm3, %v1082_v5, %v1084_v15 }
 0x1a0   : > { %v2088_v58 = vsel %vm8548_vm12, %v2055_v29, %v5161_v24  ;;  %v2087_v36 = vsel %vm8548_vm12, %v2054_v33, %v5160_v45  ;;  %v5081_v50 = vunpack.i.h.bf16 %v6604_v62  ;;  %v5080_v30 = vunpack.i.l.bf16 %v6604_v62 }
 0x1a1   : > { %5443 = vrot.lane.b32.xlu0 %v5437_v61, %s6014_s14  ;;  %5468 = vrot.lane.b32.xlu1 %v6760_v34, %s6013_s11  ;;  %v5086_v55 = vunpack.i.h.bf16 %v6617_v16  ;;  %v5085_v2 = vunpack.i.l.bf16 %v6617_v16  ;;  %v8594_v3 = vrot.slane %v6790_v63, 7  ;;  %v5126_v62 = vunpack.i.h.bf16 %v6732_v46 }
 0x1a2   : > { %v5125_v14 = vunpack.i.l.bf16 %v6732_v46  ;;  %v6851_v24 = vsel %vm778_vm2, %v821_v19, 0.0  ;;  %v818_v16 = vrot.slane %v6818_v54, 7  ;;  %v1892_v46 = vsel %vm1886_vm6, %v6196_v12, %v5081_v50 }
 0x1a3   : > { %v5164_v31 = vpop.permute.xlu0 %5163  ;;  %v6825_v6 = vpop.permute.xlu1 %5188 }
 0x1a4   : > { %v5166_v22 = vunpack.i.h.bf16 %v5164_v31  ;;  %v5165_v61 = vunpack.i.l.bf16 %v5164_v31  ;;  %v6856_v31 = vsel %vm778_vm2, %v820_v26, %v821_v19  ;;  %v1015_v26 = vrot.slane %v6830_v59, 1 }
 0x1a5   : > { %5458 = vrot.lane.b32.xlu0 %v6760_v34, %s6016_s16  ;;  %5478 = vrot.lane.b32.xlu1 %v6820_v23, %s6016_s16  ;;  %v6846_v34 = vsel %vm778_vm2, 0.0, %v8594_v3  ;;  %v1925_v19 = vsel %vm1919_vm7, %v1892_v46, %v5086_v55  ;;  %v5115_v55 = vunpack.i.l.bf16 %v6708_v49 }
 0x1a6   : > { %v2120_v11 = vsel %vm8547_vm13, %v2087_v36, %v5165_v61  ;;  %v2121_v39 = vsel %vm8547_vm13, %v2088_v58, %v5166_v22  ;;  %v6862_v22 = vpack.i.bf16 %v1085_v13, %v1083_v20  ;;  %v1891_v61 = vsel %vm1886_vm6, %v6190_v8, %v5080_v30 }
 0x1a7   : > { %v5179_v15 = vpop.permute.xlu0 %5178  ;;  %v2151_v5 = vpack.c.bf16 %v2121_v39, %v2120_v11  ;;  %v6853_v45 = vpop.permute.xlu1 %5198  ;;  %v1924_v58 = vsel %vm1919_vm7, %v1891_v61, %v5085_v2  ;;  %v6875_v20 = vpack.i.bf16 %v6856_v31, %v6830_v59  ;;  %v1016_v13 = vrot.slane %v6856_v31, 1 }
 0x1a8   : > { %v5181_v29 = vunpack.i.h.bf16 %v5179_v15  ;;  %v5180_v33 = vunpack.i.l.bf16 %v5179_v15  ;;  %v1958_v12 = vsel %vm8553_vm8, %v1925_v19, %v5126_v62  ;;  %v1957_v8 = vsel %vm8553_vm8, %v1924_v58, %v5125_v14 }
 0x1a9   : > { %4953 = vmatmul.mubr.msk.bf16.vlgmr.msra.gmra.mrb[0].mxu1 %vm8546_vm14, %v2151_v5  ;;  %5463 = vrot.lane.b32.xlu0 %v6784_v37, %s6018_s18  ;;  %v5116_v39 = vunpack.i.h.bf16 %v6708_v49  ;;  %v5141_v15 = vunpack.i.h.bf16 %v6758_v9  ;;  %v5140_v5 = vunpack.i.l.bf16 %v6758_v9  ;;  %v5146_v49 = vunpack.i.h.bf16 %v6776_v51 }
 0x1aa   : > { %5488 = vrot.lane.b32.xlu1 %v6820_v23, %s6013_s11  ;;  %v1991_v2 = vsel %vm8552_vm9, %v1958_v12, %v5181_v29  ;;  %v1990_v3 = vsel %vm8552_vm9, %v1957_v8, %v5180_v33  ;;  %v5145_v29 = vunpack.i.l.bf16 %v6776_v51  ;;  %v1018_v61 = vrot.slane %v6851_v24, 1 }
 0x1ab   : > { %v5184_v36 = vpop.permute.xlu0 %5183  ;;  %v6880_v11 = vpop.permute.xlu1 %5208 }
 0x1ac   : > { %v5186_v50 = vunpack.i.h.bf16 %v5184_v36  ;;  %v5185_v30 = vunpack.i.l.bf16 %v5184_v36  ;;  %v8595_v36 = vrot.slane %v6790_v63, 7 }
 0x1ad   : > { %5473 = vrot.lane.b32.xlu0 %v6784_v37, %s6012_s10 }
 0x1ae   : > { %v2023_v62 = vsel %vm8551_vm10, %v1990_v3, %v5185_v30  ;;  %v2024_v14 = vsel %vm8551_vm10, %v1991_v2, %v5186_v50  ;;  %5493 = vrot.lane.b32.xlu1 %v6862_v22, %s6012_s10  ;;  %v6908_v12 = vsel %vm778_vm2, %v8595_v36, %v818_v16  ;;  %v1099_v50 = vrot.slane %v6851_v24, 2 }
 0x1af   : > { %v2056_v33 = vsel %vm8549_vm11, %v2023_v62, %v5115_v55  ;;  %v2057_v46 = vsel %vm8549_vm11, %v2024_v14, %v5116_v39  ;;  %v6898_v37 = vpop.permute.xlu0 %5193  ;;  %v6901_v9 = vpop.permute.xlu1 %5213  ;;  %v6916_v30 = vsel %vm778_vm2, %v818_v16, 0.0  ;;  %v634_v55 = vmul.f32 %v6435_v60, %v6165_v42 }
 0x1b0   : > { %v2089_v19 = vsel %vm8548_vm12, %v2056_v33, %v5140_v5  ;;  %v2090_v58 = vsel %vm8548_vm12, %v2057_v46, %v5141_v15  ;;  %v6926_v3 = vpack.i.bf16 %v6908_v12, %v6846_v34  ;;  %v1017_v15 = vsel %vm944_vm4, %v1015_v26, %v1016_v13 }
 0x1b1   : > { %5483 = vrot.lane.b32.xlu0 %v6862_v22, %s6018_s18  ;;  %v2122_v51 = vsel %vm8547_vm13, %v2089_v19, %v5145_v29  ;;  %v2123_v8 = vsel %vm8547_vm13, %v2090_v58, %v5146_v49  ;;  %v635_v24 = vmul.f32 %v6443_v53, %v6165_v42  ;;  %v1019_v5 = vsel %vm944_vm4, %v1016_v13, %v1018_v61 }
 0x1b2   : > { %5508 = vrot.lane.b32.xlu1 %v6875_v20, %s6014_s14  ;;  %v2152_v39 = vpack.c.bf16 %v2123_v8, %v2122_v51  ;;  %v1096_v62 = vrot.slane %v6830_v59, 2  ;;  %v1097_v60 = vrot.slane %v6856_v31, 2  ;;  %v632_v14 = vmul.f32 %v6165_v42, %v6440_v28 }
 0x1b3   : > { %v6922_v2 = vpop.permute.xlu0 %5203  ;;  %v6931_v16 = vpop.permute.xlu1 %5228  ;;  %v5171_v49 = vunpack.i.h.bf16 %v6782_v56  ;;  %v5170_v26 = vunpack.i.l.bf16 %v6782_v56  ;;  %v1013_v29 = vrot.slane %v6916_v30, 1  ;;  %v5176_v53 = vunpack.i.h.bf16 %v6807_v40 }
 0x1b4   : > { %4956 = vmatprep.mubr.msk.bf16.mxu1 %vm8546_vm14, %v2152_v39  ;;  %v5175_v13 = vunpack.i.l.bf16 %v6807_v40  ;;  %v670_v28 = vadd.f32 %v6167_v43, %v634_v55  ;;  %v6952_v61 = vpack.i.bf16 %v1019_v5, %v1017_v15  ;;  %v671_v56 = vadd.f32 %v6167_v43, %v635_v24 }
 0x1b5   : > { %5498 = vrot.lane.b32.xlu0 %v6820_v23, %s6015_s15  ;;  %v633_v23 = vmul.f32 %v6165_v42, %v6447_v4  ;;  %v1098_v58 = vsel %vm1025_vm3, %v1096_v62, %v1097_v60  ;;  %v1100_v40 = vsel %vm1025_vm3, %v1097_v60, %v1099_v50  ;;  %v668_v36 = vadd.f32 %v6167_v43, %v632_v14 }
 0x1b6   : > { %5518 = vrot.lane.b32.xlu1 %v6926_v3, %s6011_s9  ;;  %v1894_v51 = vsel %vm1886_vm6, %v6291_v52, %v5171_v49  ;;  %v1893_v8 = vsel %vm1886_vm6, %v6285_v48, %v5170_v26  ;;  %v1010_v39 = vrot.slane %v6846_v34, 1  ;;  %v1011_v42 = vrot.slane %v6908_v12, 1 }
 0x1b7   : > { %v6950_v46 = vpop.permute.xlu0 %5218  ;;  %v5239_v19 = vpop.permute.xlu1 %5238  ;;  %v1926_v4 = vsel %vm1919_vm7, %v1893_v8, %v5175_v13  ;;  %v1927_v55 = vsel %vm1919_vm7, %v1894_v51, %v5176_v53  ;;  %v702_v50 = vmul.f32 0.01, %v670_v28  ;;  %v5111_v52 = vunpack.i.h.bf16 %v6645_v21 }
 0x1b8   : > { %v5110_v15 = vunpack.i.l.bf16 %v6645_v21  ;;  %v703_v24 = vmul.f32 0.01, %v671_v56  ;;  %v6979_v62 = vpack.i.bf16 %v1100_v40, %v1098_v58  ;;  %v700_v49 = vmul.f32 0.01, %v668_v36 }
 0x1b9   : > { %5503 = vrot.lane.b32.xlu0 %v6862_v22, %s6017_s17  ;;  %v669_v22 = vadd.f32 %v6167_v43, %v633_v23  ;;  %v1960_v14 = vsel %vm8553_vm8, %v1927_v55, %v5111_v52  ;;  %v1012_v26 = vsel %vm944_vm4, %v1010_v39, %v1011_v42  ;;  %v5131_v21 = vunpack.i.h.bf16 %v6692_v27 }
 0x1ba   : > { %5528 = vrot.lane.b32.xlu1 %v6952_v61, %s6015_s15  ;;  %v1959_v60 = vsel %vm8553_vm8, %v1926_v4, %v5110_v15  ;;  %v5130_v53 = vunpack.i.l.bf16 %v6692_v27  ;;  %v6990_v43 = vmax.f32 %v670_v28, %v702_v50  ;;  %v1014_v13 = vsel %vm944_vm4, %v1011_v42, %v1013_v29 }
 0x1bb   : > { %v6974_v48 = vpop.permute.xlu0 %5223  ;;  %v6977_v5 = vpop.permute.xlu1 %5248  ;;  %v6995_v58 = vmax.f32 %v671_v56, %v703_v24  ;;  %v701_v40 = vmul.f32 0.01, %v669_v22  ;;  %v1092_v51 = vrot.slane %v6908_v12, 2  ;;  %v1993_v27 = vsel %vm8552_vm9, %v1960_v14, %v5131_v21 }
 0x1bc   : > { %v1992_v8 = vsel %vm8552_vm9, %v1959_v60, %v5130_v53  ;;  %v5201_v39 = vunpack.i.h.bf16 %v6853_v45  ;;  %v5200_v28 = vunpack.i.l.bf16 %v6853_v45  ;;  %v5136_v29 = vunpack.i.h.bf16 %v6712_v1 }
 0x1bd   : > { %5513 = vrot.lane.b32.xlu0 %v6875_v20, %s6011_s9  ;;  %v1091_v20 = vrot.slane %v6846_v34, 2  ;;  %v5135_v56 = vunpack.i.l.bf16 %v6712_v1  ;;  %v5241_v42 = vunpack.i.h.bf16 %v5239_v19  ;;  %v5240_v55 = vunpack.i.l.bf16 %v5239_v19 }
 0x1be   : > { %5533 = vrot.lane.b32.xlu1 %v6979_v62, %s6017_s17  ;;  %v826_v50 = vrot.slane %v6990_v43, 7  ;;  %v7012_v52 = vmax.f32 %v668_v36, %v700_v49  ;;  %v7014_v15 = vpack.i.bf16 %v1014_v13, %v1012_v26  ;;  %v2026_v24 = vsel %vm8551_vm10, %v1993_v27, %v5136_v29 }
 0x1bf   : > { %v6993_v23 = vpop.permute.xlu0 %5233  ;;  %v7003_v4 = vpop.permute.xlu1 %5253  ;;  %v2025_v45 = vsel %vm8551_vm10, %v1992_v8, %v5135_v56  ;;  %v827_v1 = vrot.slane %v6995_v58, 7  ;;  %v7019_v19 = vmax.f32 %v669_v22, %v701_v40  ;;  %v1093_v26 = vsel %vm1025_vm3, %v1091_v20, %v1092_v51 }
 0x1c0   : > { %v2058_v14 = vsel %vm8549_vm11, %v2025_v45, %v5200_v28  ;;  %v8596_v22 = vrot.slane %v6916_v30, 2  ;;  %v5151_v40 = vunpack.i.h.bf16 %v6736_v38  ;;  %v5150_v8 = vunpack.i.l.bf16 %v6736_v38 }
 0x1c1   : > { %5523 = vrot.lane.b32.xlu0 %v6926_v3, %s6014_s14  ;;  %v2059_v3 = vsel %vm8549_vm11, %v2026_v24, %v5201_v39  ;;  %v2091_v49 = vsel %vm8548_vm12, %v2058_v14, %v5240_v55  ;;  %v5156_v28 = vunpack.i.h.bf16 %v6801_v41  ;;  %v7042_v20 = vsel %vm778_vm2, 0.0, %v826_v50 }
 0x1c2   : > { %5548 = vrot.lane.b32.xlu1 %v6952_v61, %s6013_s11  ;;  %v2092_v36 = vsel %vm8548_vm12, %v2059_v3, %v5241_v42  ;;  %v1095_v13 = vsel %vm1025_vm3, %v1092_v51, %v8596_v22  ;;  %v5206_v29 = vunpack.i.h.bf16 %v6922_v2  ;;  %v5205_v38 = vunpack.i.l.bf16 %v6922_v2 }
 0x1c3   : > { %v5244_v60 = vpop.permute.xlu0 %5243  ;;  %v7023_v33 = vpop.permute.xlu1 %5268  ;;  %v823_v56 = vrot.slane %v7012_v52, 7  ;;  %v7048_v42 = vsel %vm778_vm2, %v826_v50, %v827_v1  ;;  %v824_v45 = vrot.slane %v7019_v19, 7  ;;  %v1896_v2 = vsel %vm1886_vm6, %v6267_v18, %v5151_v40 }
 0x1c4   : > { %v5246_v21 = vunpack.i.h.bf16 %v5244_v60  ;;  %v5245_v53 = vunpack.i.l.bf16 %v5244_v60  ;;  %v7056_v60 = vpack.i.bf16 %v1095_v13, %v1093_v26  ;;  %v1895_v50 = vsel %vm1886_vm6, %v6264_v17, %v5150_v8 }
 0x1c5   : > { %5538 = vrot.lane.b32.xlu0 %v6952_v61, %s6016_s16  ;;  %v5155_v61 = vunpack.i.l.bf16 %v6801_v41  ;;  %v1108_v3 = vrot.slane %v7042_v20, 1  ;;  %v5196_v40 = vunpack.i.h.bf16 %v6898_v37  ;;  %v5195_v8 = vunpack.i.l.bf16 %v6898_v37 }
 0x1c6   : > { %v2124_v27 = vsel %vm8547_vm13, %v2091_v49, %v5245_v53  ;;  %v2125_v39 = vsel %vm8547_vm13, %v2092_v36, %v5246_v21  ;;  %5558 = vrot.lane.b32.xlu1 %v7014_v15, %s6016_s16  ;;  %v1929_v21 = vsel %vm1919_vm7, %v1896_v2, %v5156_v28  ;;  %v7068_v53 = vsel %vm778_vm2, %v827_v1, 0.0 }
 0x1c7   : > { %v5259_v30 = vpop.permute.xlu0 %5258  ;;  %v2153_v51 = vpack.c.bf16 %v2125_v39, %v2124_v27  ;;  %v7050_v55 = vpop.permute.xlu1 %5278  ;;  %v1928_v14 = vsel %vm1919_vm7, %v1895_v50, %v5155_v61  ;;  %v7072_v49 = vpack.i.bf16 %v7048_v42, %v7042_v20  ;;  %v1962_v18 = vsel %vm8553_vm8, %v1929_v21, %v5206_v29 }
 0x1c8   : > { %v5261_v24 = vunpack.i.h.bf16 %v5259_v30  ;;  %v5260_v41 = vunpack.i.l.bf16 %v5259_v30  ;;  %v1961_v17 = vsel %vm8553_vm8, %v1928_v14, %v5205_v38  ;;  %v5221_v39 = vunpack.i.h.bf16 %v6950_v46 }
 0x1c9   : > { %4957 = vmatmul.mubr.msk.bf16.gmra.mrb[4].mxu1 %vm8546_vm14, %v2153_v51  ;;  %5543 = vrot.lane.b32.xlu0 %v6979_v62, %s6018_s18  ;;  %v5220_v28 = vunpack.i.l.bf16 %v6950_v46  ;;  %v5226_v37 = vunpack.i.h.bf16 %v6974_v48  ;;  %v5225_v51 = vunpack.i.l.bf16 %v6974_v48  ;;  %v7100_v46 = vsel %vm778_vm2, %v823_v56, %v824_v45 }
 0x1ca   : > { %5568 = vrot.lane.b32.xlu1 %v7014_v15, %s6013_s11  ;;  %v1995_v1 = vsel %vm8552_vm9, %v1962_v18, %v5261_v24  ;;  %v1994_v27 = vsel %vm8552_vm9, %v1961_v17, %v5260_v41  ;;  %v7097_v24 = vsel %vm778_vm2, 0.0, %v823_v56  ;;  %v1111_v48 = vrot.slane %v7068_v53, 1 }
 0x1cb   : > { %v5264_v36 = vpop.permute.xlu0 %5263  ;;  %v7076_v13 = vpop.permute.xlu1 %5288  ;;  %v1113_v18 = vrot.slane %v7042_v20, 2 }
 0x1cc   : > { %v5266_v26 = vunpack.i.h.bf16 %v5264_v36  ;;  %v5265_v22 = vunpack.i.l.bf16 %v5264_v36  ;;  %v1109_v36 = vrot.slane %v7048_v42, 1 }
 0x1cd   : > { %5553 = vrot.lane.b32.xlu0 %v6979_v62, %s6012_s10 }
 0x1ce   : > { %v2027_v61 = vsel %vm8551_vm10, %v1994_v27, %v5265_v22  ;;  %v2028_v30 = vsel %vm8551_vm10, %v1995_v1, %v5266_v26  ;;  %5573 = vrot.lane.b32.xlu1 %v7056_v60, %s6012_s10  ;;  %v1116_v26 = vrot.slane %v7068_v53, 2  ;;  %v910_v22 = vsel %vm778_vm2, %v824_v45, 0.0 }
 0x1cf   : > { %v2060_v29 = vsel %vm8549_vm11, %v2027_v61, %v5195_v8  ;;  %v2061_v38 = vsel %vm8549_vm11, %v2028_v30, %v5196_v40  ;;  %v7094_v62 = vpop.permute.xlu0 %5273  ;;  %v7102_v41 = vpop.permute.xlu1 %5293  ;;  %v5597_v8 = vpack.i.bf16 %v7100_v46, %v7097_v24  ;;  %v1114_v1 = vrot.slane %v7048_v42, 2 }
 0x1d0   : > { %v2093_v2 = vsel %vm8548_vm12, %v2060_v29, %v5220_v28  ;;  %v2094_v50 = vsel %vm8548_vm12, %v2061_v38, %v5221_v39  ;;  %v5251_v27 = vunpack.i.h.bf16 %v6977_v5  ;;  %v5250_v39 = vunpack.i.l.bf16 %v6977_v5 }
 0x1d1   : > { %5563 = vrot.lane.b32.xlu0 %v7056_v60, %s6018_s18  ;;  %v2126_v14 = vsel %vm8547_vm13, %v2093_v2, %v5225_v51  ;;  %v2127_v21 = vsel %vm8547_vm13, %v2094_v50, %v5226_v37  ;;  %v1110_v20 = vsel %vm944_vm4, %v1108_v3, %v1109_v36  ;;  %v1112_v45 = vsel %vm944_vm4, %v1109_v36, %v1111_v48 }
 0x1d2   : > { %5588 = vrot.lane.b32.xlu1 %v7072_v49, %s6014_s14  ;;  %v2154_v56 = vpack.c.bf16 %v2127_v21, %v2126_v14  ;;  %v5256_v53 = vunpack.i.h.bf16 %v7003_v4  ;;  %v5255_v28 = vunpack.i.l.bf16 %v7003_v4  ;;  %v1023_v42 = vrot.slane %v910_v22, 1 }
 0x1d3   : > { %v7115_v17 = vpop.permute.xlu0 %5283  ;;  %v7119_v40 = vpop.permute.xlu1 %5308  ;;  %v5607_v37 = vpack.i.bf16 %v1112_v45, %v1110_v20  ;;  %v1020_v5 = vrot.slane %v7097_v24, 1  ;;  %v1021_v51 = vrot.slane %v7100_v46, 1  ;;  %v1897_v3 = vsel %vm1886_vm6, %v6389_v32, %v5250_v39 }
 0x1d4   : > { %4960 = vmatprep.mubr.msk.bf16.mxu1 %vm8546_vm14, %v2154_v56  ;;  %v1115_v4 = vsel %vm1025_vm3, %v1113_v18, %v1114_v1  ;;  %v1117_v29 = vsel %vm1025_vm3, %v1114_v1, %v1116_v26  ;;  %v1930_v38 = vsel %vm1919_vm7, %v1897_v3, %v5255_v28  ;;  %v5191_v50 = vunpack.i.h.bf16 %v6825_v6 }
 0x1d5   : > { %5578 = vrot.lane.b32.xlu0 %v7014_v15, %s6015_s15  ;;  %v1898_v15 = vsel %vm1886_vm6, %v6393_v57, %v5251_v27  ;;  %v5190_v57 = vunpack.i.l.bf16 %v6825_v6  ;;  %v7155_v14 = vpack.i.bf16 %v1117_v29, %v1115_v4  ;;  %v1024_v21 = vsel %vm944_vm4, %v1021_v51, %v1023_v42 }
 0x1d6   : > { %5598 = vrot.lane.b32.xlu1 %v5597_v8, %s6011_s9  ;;  %v1931_v2 = vsel %vm1919_vm7, %v1898_v15, %v5256_v53  ;;  %v5211_v18 = vunpack.i.h.bf16 %v6880_v11  ;;  %v5210_v6 = vunpack.i.l.bf16 %v6880_v11  ;;  %v1101_v26 = vrot.slane %v7097_v24, 2 }
 0x1d7   : > { %v7134_v61 = vpop.permute.xlu0 %5298  ;;  %v5319_v30 = vpop.permute.xlu1 %5318  ;;  %v1963_v36 = vsel %vm8553_vm8, %v1930_v38, %v5190_v57  ;;  %v1964_v56 = vsel %vm8553_vm8, %v1931_v2, %v5191_v50  ;;  %v1102_v1 = vrot.slane %v7100_v46, 2  ;;  %v1104_v27 = vrot.slane %v910_v22, 2 }
 0x1d8   : > { %v1996_v45 = vsel %vm8552_vm9, %v1963_v36, %v5210_v6  ;;  %v1997_v53 = vsel %vm8552_vm9, %v1964_v56, %v5211_v18  ;;  %v5280_v28 = vunpack.i.l.bf16 %v7050_v55  ;;  %v5216_v42 = vunpack.i.h.bf16 %v6901_v9 }
 0x1d9   : > { %5583 = vrot.lane.b32.xlu0 %v7056_v60, %s6017_s17  ;;  %v1022_v60 = vsel %vm944_vm4, %v1020_v5, %v1021_v51  ;;  %v5215_v5 = vunpack.i.l.bf16 %v6901_v9  ;;  %v5321_v51 = vunpack.i.h.bf16 %v5319_v30  ;;  %v5320_v15 = vunpack.i.l.bf16 %v5319_v30 }
 0x1da   : > { %5608 = vrot.lane.b32.xlu1 %v5607_v37, %s6015_s15  ;;  %v5622_v20 = vpack.i.bf16 %v1024_v21, %v1022_v60  ;;  %v1103_v22 = vsel %vm1025_vm3, %v1101_v26, %v1102_v1  ;;  %v2030_v4 = vsel %vm8551_vm10, %v1997_v53, %v5216_v42  ;;  %v5231_v60 = vunpack.i.h.bf16 %v6931_v16 }
 0x1db   : > { %v7151_v48 = vpop.permute.xlu0 %5303  ;;  %v7153_v32 = vpop.permute.xlu1 %5328  ;;  %v2029_v3 = vsel %vm8551_vm10, %v1996_v45, %v5215_v5  ;;  %v5230_v21 = vunpack.i.l.bf16 %v6931_v16  ;;  %v5236_v18 = vunpack.i.h.bf16 %v6993_v23  ;;  %v5235_v6 = vunpack.i.l.bf16 %v6993_v23 }
 0x1dc   : > { %v2062_v2 = vsel %vm8549_vm11, %v2029_v3, %v5280_v28  ;;  %v5286_v45 = vunpack.i.h.bf16 %v7115_v17  ;;  %v1900_v28 = vsel %vm1886_vm6, %v6379_v25, %v5231_v60  ;;  %v5276_v25 = vunpack.i.h.bf16 %v7094_v62 }
 0x1dd   : > { %5593 = vrot.lane.b32.xlu0 %v7072_v49, %s6011_s9  ;;  %v5281_v49 = vunpack.i.h.bf16 %v7050_v55  ;;  %v1105_v55 = vsel %vm1025_vm3, %v1102_v1, %v1104_v27  ;;  %v2095_v57 = vsel %vm8548_vm12, %v2062_v2, %v5320_v15  ;;  %v1899_v23 = vsel %vm1886_vm6, %v6376_v10, %v5230_v21 }
 0x1de   : > { %5613 = vrot.lane.b32.xlu1 %v7155_v14, %s6017_s17  ;;  %v5627_v27 = vpack.i.bf16 %v1105_v55, %v1103_v22  ;;  %v1932_v42 = vsel %vm1919_vm7, %v1899_v23, %v5235_v6  ;;  %v5300_v2 = vunpack.i.l.bf16 %v7134_v61 }
 0x1df   : > { %v7169_v39 = vpop.permute.xlu0 %5313  ;;  %v7175_v11 = vpop.permute.xlu1 %5333  ;;  %v2063_v38 = vsel %vm8549_vm11, %v2030_v4, %v5281_v49 }
 0x1e1   : > { %5603 = vrot.lane.b32.xlu0 %v5597_v8, %s6014_s14  ;;  %v2096_v8 = vsel %vm8548_vm12, %v2063_v38, %v5321_v51  ;;  %v5301_v38 = vunpack.i.h.bf16 %v7134_v61 }
 0x1e2   : > { %5623 = vrot.lane.b32.xlu1 %v5622_v20, %s6016_s16 }
 0x1e3   : > { %v5324_v29 = vpop.permute.xlu0 %5323  ;;  %v7187_v30 = vpop.permute.xlu1 %5348 }
 0x1e4   : > { %v5326_v9 = vunpack.i.h.bf16 %v5324_v29  ;;  %v5325_v50 = vunpack.i.l.bf16 %v5324_v29  ;;  %v5275_v29 = vunpack.i.l.bf16 %v7094_v62  ;;  %v5305_v62 = vunpack.i.l.bf16 %v7151_v48 }
 0x1e5   : > { %5618 = vrot.lane.b32.xlu0 %v5607_v37, %s6016_s16  ;;  %v5285_v37 = vunpack.i.l.bf16 %v7115_v17  ;;  %v1933_v17 = vsel %vm1919_vm7, %v1900_v28, %v5236_v18 }
 0x1e6   : > { %v2128_v36 = vsel %vm8547_vm13, %v2095_v57, %v5325_v50  ;;  %v2129_v56 = vsel %vm8547_vm13, %v2096_v8, %v5326_v9  ;;  %5633 = vrot.lane.b32.xlu1 %v5622_v20, %s6013_s11  ;;  %v1966_v51 = vsel %vm8553_vm8, %v1933_v17, %v5286_v45  ;;  %v8597_v8 = vld [vmem:[#allocation5_spill] sm:$0xff]  ;;  %v5306_v57 = vunpack.i.h.bf16 %v7151_v48  ;;  %v8598_v48 = vld [vmem:[#allocation4_spill] sm:$0xff] }
 0x1e7   : > { %v5339_v26 = vpop.permute.xlu0 %5338  ;;  %v2155_v1 = vpack.c.bf16 %v2129_v56, %v2128_v36  ;;  %v7201_v53 = vpop.permute.xlu1 %5358  ;;  %v1965_v15 = vsel %vm8553_vm8, %v1932_v42, %v5285_v37  ;;  %v5331_v37 = vunpack.i.h.bf16 %v7153_v32  ;;  %v8599_v42 = vld [vmem:[#allocation27_spill] sm:$0xff] }
 0x1e8   : > { %v5341_v16 = vunpack.i.h.bf16 %v5339_v26  ;;  %v5340_v49 = vunpack.i.l.bf16 %v5339_v26 }
 0x1e9   : > { %4961 = vmatmul.mubr.msk.bf16.gmra.mrb[8].mxu1 %vm8546_vm14, %v2155_v1  ;;  %5628 = vrot.lane.b32.xlu0 %v5627_v27, %s6018_s18  ;;  %v1902_v17 = vsel %vm1886_vm6, %v8599_v42, %v5331_v37  ;;  %v5316_v42 = vunpack.i.h.bf16 %v7169_v39 }
 0x1ea   : > { %5638 = vrot.lane.b32.xlu1 %v5627_v27, %s6012_s10  ;;  %v1999_v10 = vsel %vm8552_vm9, %v1966_v51, %v5341_v16  ;;  %v1998_v55 = vsel %vm8552_vm9, %v1965_v15, %v5340_v49  ;;  %v5330_v16 = vunpack.i.l.bf16 %v7153_v32  ;;  %v5335_v49 = vunpack.i.l.bf16 %v7175_v11 }
 0x1eb   : > { %v5344_v5 = vpop.permute.xlu0 %5343  ;;  %v7214_v4 = vpop.permute.xlu1 %5368 }
 0x1ec   : > { %v5346_v22 = vunpack.i.h.bf16 %v5344_v5  ;;  %v5345_v3 = vunpack.i.l.bf16 %v5344_v5  ;;  %v8600_v5 = vld [vmem:[#allocation26_spill] sm:$0xff] }
 0x1ed   : > { %5648 = vrot.lane.b32.xlu0 %v5622_v20, %s6015_s15  ;;  %v1901_v51 = vsel %vm1886_vm6, %v8600_v5, %v5330_v16 }
 0x1ee   : > { %v2031_v9 = vsel %vm8551_vm10, %v1998_v55, %v5345_v3  ;;  %v2032_v50 = vsel %vm8551_vm10, %v1999_v10, %v5346_v22  ;;  %5643 = vrot.lane.b32.xlu1 %v8597_v8, %s6016_s16  ;;  %v1934_v15 = vsel %vm1919_vm7, %v1901_v51, %v5335_v49  ;;  %v5271_v22 = vunpack.i.h.bf16 %v7023_v33 }
 0x1ef   : > { %v2064_v60 = vsel %vm8549_vm11, %v2031_v9, %v5275_v29  ;;  %v2065_v21 = vsel %vm8549_vm11, %v2032_v50, %v5276_v25  ;;  %v7231_v20 = vpop.permute.xlu0 %5353  ;;  %v7233_v36 = vpop.permute.xlu1 %5373  ;;  %v5291_v10 = vunpack.i.h.bf16 %v7076_v13  ;;  %v5290_v55 = vunpack.i.l.bf16 %v7076_v13 }
 0x1f0   : > { %v2097_v61 = vsel %vm8548_vm12, %v2064_v60, %v5300_v2  ;;  %v2098_v56 = vsel %vm8548_vm12, %v2065_v21, %v5301_v38  ;;  %v5360_v50 = vunpack.i.l.bf16 %v7201_v53 }
 0x1f1   : > { %5653 = vrot.lane.b32.xlu0 %v5627_v27, %s6017_s17  ;;  %v2130_v18 = vsel %vm8547_vm13, %v2097_v61, %v5305_v62  ;;  %v2131_v6 = vsel %vm8547_vm13, %v2098_v56, %v5306_v57  ;;  %v5336_v27 = vunpack.i.h.bf16 %v7175_v11  ;;  %v5296_v57 = vunpack.i.h.bf16 %v7102_v41 }
 0x1f2   : > { %5663 = vrot.lane.b32.xlu1 %v8598_v48, %s6018_s18  ;;  %v2156_v26 = vpack.c.bf16 %v2131_v6, %v2130_v18  ;;  %v5295_v62 = vunpack.i.l.bf16 %v7102_v41  ;;  %v5311_v41 = vunpack.i.h.bf16 %v7119_v40 }
 0x1f3   : > { %v7242_v1 = vpop.permute.xlu0 %5363  ;;  %v7244_v45 = vpop.permute.xlu1 %5388  ;;  %v1935_v32 = vsel %vm1919_vm7, %v1902_v17, %v5336_v27  ;;  %v5310_v27 = vunpack.i.l.bf16 %v7119_v40  ;;  %v5315_v17 = vunpack.i.l.bf16 %v7169_v39  ;;  %v8601_v40 = vld [vmem:[#allocation25_spill] sm:$0xff] }
 0x1f4   : > { %4964 = vmatprep.mubr.msk.bf16.mxu1 %vm8546_vm14, %v2156_v26  ;;  %v1968_v29 = vsel %vm8553_vm8, %v1935_v32, %v5271_v22  ;;  %v5365_v32 = vunpack.i.l.bf16 %v7242_v1 }
 0x1f5   : > { %5658 = vrot.lane.b32.xlu0 %v7155_v14, %s6018_s18  ;;  %v5270_v14 = vunpack.i.l.bf16 %v7023_v33  ;;  %v2001_v9 = vsel %vm8552_vm9, %v1968_v29, %v5291_v10  ;;  %v5361_v33 = vunpack.i.h.bf16 %v7201_v53  ;;  %v1904_v29 = vsel %vm1886_vm6, %v8601_v40, %v5311_v41  ;;  %v8602_v10 = vld [vmem:[#allocation24_spill] sm:$0xff] }
 0x1f6   : > { %v2034_v61 = vsel %vm8551_vm10, %v2001_v9, %v5296_v57 }
 0x1f7   : > { %v7253_v28 = vpop.permute.xlu0 %5378  ;;  %v5399_v23 = vpop.permute.xlu1 %5398  ;;  %v1967_v25 = vsel %vm8553_vm8, %v1934_v15, %v5270_v14  ;;  %v2067_v18 = vsel %vm8549_vm11, %v2034_v61, %v5361_v33  ;;  %v5366_v15 = vunpack.i.h.bf16 %v7242_v1 }
 0x1f8   : > { %v2000_v2 = vsel %vm8552_vm9, %v1967_v25, %v5290_v55  ;;  %v5401_v60 = vunpack.i.h.bf16 %v5399_v23  ;;  %v5400_v21 = vunpack.i.l.bf16 %v5399_v23  ;;  %v1903_v55 = vsel %vm1886_vm6, %v8602_v10, %v5310_v27 }
 0x1f9   : > { %v2033_v13 = vsel %vm8551_vm10, %v2000_v2, %v5295_v62  ;;  %v1936_v39 = vsel %vm1919_vm7, %v1903_v55, %v5315_v17  ;;  %v1937_v2 = vsel %vm1919_vm7, %v1904_v29, %v5316_v42  ;;  %v8603_v29 = vld [vmem:[#allocation36_spill] sm:$0xff]  ;;  %v8604_v55 = vld [vmem:[#allocation35_spill] sm:$0xff] }
 0x1fa   : > { %v2066_v6 = vsel %vm8549_vm11, %v2033_v13, %v5360_v50  ;;  %v2100_v37 = vsel %vm8548_vm12, %v2067_v18, %v5401_v60  ;;  %v1970_v33 = vsel %vm8553_vm8, %v1937_v2, %v5366_v15  ;;  %v1969_v1 = vsel %vm8553_vm8, %v1936_v39, %v5365_v32 }
 0x1fb   : > { %v7263_v3 = vpop.permute.xlu0 %5383  ;;  %v7265_v11 = vpop.permute.xlu1 %5408  ;;  %v2099_v16 = vsel %vm8548_vm12, %v2066_v6, %v5400_v21  ;;  %v5356_v60 = vunpack.i.h.bf16 %v7231_v20  ;;  %v5355_v21 = vunpack.i.l.bf16 %v7231_v20  ;;  %v5380_v18 = vunpack.i.l.bf16 %v7253_v28 }
 0x1fc   : > { %v5410_v15 = vunpack.i.l.bf16 %v7265_v11 }
 0x1fe   : > { %v1905_v39 = vsel %vm1886_vm6, %v8604_v55, %v5410_v15 }
 0x1ff   : > { %v7271_v38 = vpop.permute.xlu0 %5393  ;;  %v7277_v8 = vpop.permute.xlu1 %5413 }
 0x200   : > { %v5416_v32 = vunpack.i.h.bf16 %v7277_v8 }
 0x203   : > { %v5404_v56 = vpop.permute.xlu0 %5403  ;;  %v7285_v53 = vpop.permute.xlu1 %5428 }
 0x204   : > { %v5406_v48 = vunpack.i.h.bf16 %v5404_v56  ;;  %v5405_v26 = vunpack.i.l.bf16 %v5404_v56  ;;  %v5381_v56 = vunpack.i.h.bf16 %v7253_v28 }
 0x206   : > { %v2132_v49 = vsel %vm8547_vm13, %v2099_v16, %v5405_v26  ;;  %v2133_v23 = vsel %vm8547_vm13, %v2100_v37, %v5406_v48  ;;  %v5386_v26 = vunpack.i.h.bf16 %v7263_v3  ;;  %v5385_v37 = vunpack.i.l.bf16 %v7263_v3 }
 0x207   : > { %v5419_v5 = vpop.permute.xlu0 %5418  ;;  %v2157_v51 = vpack.c.bf16 %v2133_v23, %v2132_v49  ;;  %v7297_v22 = vpop.permute.xlu1 %5438 }
 0x208   : > { %v5421_v14 = vunpack.i.h.bf16 %v5419_v5  ;;  %v5420_v25 = vunpack.i.l.bf16 %v5419_v5 }
 0x209   : > { %4965 = vmatmul.mubr.msk.bf16.gmra.mrb[12].mxu1 %vm8546_vm14, %v2157_v51  ;;  %v5411_v51 = vunpack.i.h.bf16 %v7265_v11  ;;  %v5350_v11 = vunpack.i.l.bf16 %v7187_v30 }
 0x20a   : > { %v2003_v13 = vsel %vm8552_vm9, %v1970_v33, %v5421_v14  ;;  %v2002_v61 = vsel %vm8552_vm9, %v1969_v1, %v5420_v25  ;;  %v5415_v14 = vunpack.i.l.bf16 %v7277_v8  ;;  %v5351_v33 = vunpack.i.h.bf16 %v7187_v30 }
 0x20b   : > { %v5424_v9 = vpop.permute.xlu0 %5423  ;;  %v7308_v62 = vpop.permute.xlu1 %5448  ;;  %v1906_v10 = vsel %vm1886_vm6, %v8603_v29, %v5411_v51  ;;  %v5441_v30 = vunpack.i.h.bf16 %v7297_v22  ;;  %v5396_v29 = vunpack.i.h.bf16 %v7271_v38 }
 0x20c   : > { %v5426_v50 = vunpack.i.h.bf16 %v5424_v9  ;;  %v5425_v57 = vunpack.i.l.bf16 %v5424_v9  ;;  %v1938_v2 = vsel %vm1919_vm7, %v1905_v39, %v5415_v14  ;;  %v1939_v9 = vsel %vm1919_vm7, %v1906_v10, %v5416_v32 }
 0x20d   : > { %v5390_v32 = vunpack.i.l.bf16 %v7244_v45  ;;  %v5395_v10 = vunpack.i.l.bf16 %v7271_v38 }
 0x20e   : > { %v2035_v6 = vsel %vm8551_vm10, %v2002_v61, %v5425_v57  ;;  %v2036_v48 = vsel %vm8551_vm10, %v2003_v13, %v5426_v50  ;;  %v1971_v50 = vsel %vm8553_vm8, %v1938_v2, %v5350_v11  ;;  %v1972_v57 = vsel %vm8553_vm8, %v1939_v9, %v5351_v33 }
 0x20f   : > { %v2068_v16 = vsel %vm8549_vm11, %v2035_v6, %v5355_v21  ;;  %v2069_v20 = vsel %vm8549_vm11, %v2036_v48, %v5356_v60  ;;  %v7322_v41 = vpop.permute.xlu0 %5433  ;;  %v7324_v27 = vpop.permute.xlu1 %5453  ;;  %v5371_v60 = vunpack.i.h.bf16 %v7214_v4  ;;  %v5370_v21 = vunpack.i.l.bf16 %v7214_v4 }
 0x210   : > { %v2101_v49 = vsel %vm8548_vm12, %v2068_v16, %v5380_v18  ;;  %v2102_v28 = vsel %vm8548_vm12, %v2069_v20, %v5381_v56  ;;  %v5440_v18 = vunpack.i.l.bf16 %v7297_v22  ;;  %v5376_v48 = vunpack.i.h.bf16 %v7233_v36 }
 0x211   : > { %v2134_v23 = vsel %vm8547_vm13, %v2101_v49, %v5385_v37  ;;  %v2135_v42 = vsel %vm8547_vm13, %v2102_v28, %v5386_v26  ;;  %v2004_v61 = vsel %vm8552_vm9, %v1971_v50, %v5370_v21  ;;  %v2005_v56 = vsel %vm8552_vm9, %v1972_v57, %v5371_v60  ;;  %v8606_v60 = vld [vmem:[#allocation33_spill] sm:$0xff] }
 0x212   : > { %v2158_v17 = vpack.c.bf16 %v2135_v42, %v2134_v23  ;;  %v5375_v26 = vunpack.i.l.bf16 %v7233_v36  ;;  %v2038_v20 = vsel %vm8551_vm10, %v2005_v56, %v5376_v48  ;;  %v5391_v36 = vunpack.i.h.bf16 %v7244_v45  ;;  %v8605_v45 = vld [vmem:[#allocation34_spill] sm:$0xff] }
 0x213   : > { %v7330_v5 = vpop.permute.xlu0 %5443  ;;  %v7332_v3 = vpop.permute.xlu1 %5468  ;;  %v2071_v28 = vsel %vm8549_vm11, %v2038_v20, %v5441_v30  ;;  %v1907_v21 = vsel %vm1886_vm6, %v8606_v60, %v5390_v32 }
 0x214   : > { %4968 = vmatprep.mubr.msk.bf16.mxu1 %vm8546_vm14, %v2158_v17  ;;  %v2037_v4 = vsel %vm8551_vm10, %v2004_v61, %v5375_v26  ;;  %v5446_v2 = vunpack.i.h.bf16 %v7330_v5  ;;  %v5445_v9 = vunpack.i.l.bf16 %v7330_v5  ;;  %v1908_v57 = vsel %vm1886_vm6, %v8605_v45, %v5391_v36 }
 0x215   : > { %v2070_v23 = vsel %vm8549_vm11, %v2037_v4, %v5440_v18  ;;  %v1940_v38 = vsel %vm1919_vm7, %v1907_v21, %v5395_v10  ;;  %v1941_v61 = vsel %vm1919_vm7, %v1908_v57, %v5396_v29 }
 0x216   : > { %v1974_v30 = vsel %vm8553_vm8, %v1941_v61, %v5446_v2  ;;  %v1973_v5 = vsel %vm8553_vm8, %v1940_v38, %v5445_v9  ;;  %v5431_v61 = vunpack.i.h.bf16 %v7285_v53 }
 0x217   : > { %v7339_v25 = vpop.permute.xlu0 %5458  ;;  %v5479_v40 = vpop.permute.xlu1 %5478 }
 0x218   : > { %v5481_v37 = vunpack.i.h.bf16 %v5479_v40  ;;  %v5480_v16 = vunpack.i.l.bf16 %v5479_v40 }
 0x21a   : > { %v2104_v51 = vsel %vm8548_vm12, %v2071_v28, %v5481_v37  ;;  %v2103_v15 = vsel %vm8548_vm12, %v2070_v23, %v5480_v16  ;;  %v5436_v37 = vunpack.i.h.bf16 %v7322_v41  ;;  %v5435_v16 = vunpack.i.l.bf16 %v7322_v41 }
 0x21b   : > { %v7349_v1 = vpop.permute.xlu0 %5463  ;;  %v5460_v28 = vunpack.i.l.bf16 %v7339_v25 }
 0x21c   : > { %v7351_v8 = vpop.permute.xlu1 %5488 }
 0x21d   : > { %v5490_v2 = vunpack.i.l.bf16 %v7351_v8 }
 0x21f   : > { %v7357_v13 = vpop.permute.xlu0 %5473  ;;  %v1909_v60 = vsel %vm1886_vm6, %v6668_v47, %v5490_v2  ;;  %v5450_v47 = vunpack.i.l.bf16 %v7308_v62 }
 0x220   : > { %v7363_v6 = vpop.permute.xlu1 %5493 }
 0x221   : > { %v5496_v9 = vunpack.i.h.bf16 %v7363_v6 }
 0x223   : > { %v5484_v49 = vpop.permute.xlu0 %5483 }
 0x224   : > { %v5486_v42 = vunpack.i.h.bf16 %v5484_v49  ;;  %v5485_v17 = vunpack.i.l.bf16 %v5484_v49  ;;  %v7371_v22 = vpop.permute.xlu1 %5508  ;;  %v5461_v49 = vunpack.i.h.bf16 %v7339_v25 }
 0x226   : > { %v2136_v14 = vsel %vm8547_vm13, %v2103_v15, %v5485_v17  ;;  %v2137_v40 = vsel %vm8547_vm13, %v2104_v51, %v5486_v42  ;;  %v5466_v17 = vunpack.i.h.bf16 %v7349_v1  ;;  %v5465_v51 = vunpack.i.l.bf16 %v7349_v1 }
 0x227   : > { %v2159_v55 = vpack.c.bf16 %v2137_v40, %v2136_v14  ;;  %v5499_v39 = vpop.permute.xlu0 %5498 }
 0x228   : > { %v7383_v33 = vpop.permute.xlu1 %5518  ;;  %v5501_v11 = vunpack.i.h.bf16 %v5499_v39  ;;  %v5500_v50 = vunpack.i.l.bf16 %v5499_v39  ;;  %v5491_v39 = vunpack.i.h.bf16 %v7351_v8  ;;  %v5430_v8 = vunpack.i.l.bf16 %v7285_v53 }
 0x229   : > { %4969 = vmatmul.mubr.msk.bf16.gmra.mrb[16].mxu1 %vm8546_vm14, %v2159_v55  ;;  %v5521_v53 = vunpack.i.h.bf16 %v7383_v33 }
 0x22a   : > { %v2007_v4 = vsel %vm8552_vm9, %v1974_v30, %v5501_v11  ;;  %v2006_v20 = vsel %vm8552_vm9, %v1973_v5, %v5500_v50  ;;  %v5495_v11 = vunpack.i.l.bf16 %v7363_v6  ;;  %v1910_v57 = vsel %vm1886_vm6, %v6684_v44, %v5491_v39 }
 0x22b   : > { %v5504_v56 = vpop.permute.xlu0 %5503  ;;  %v1943_v38 = vsel %vm1919_vm7, %v1910_v57, %v5496_v9  ;;  %v5451_v44 = vunpack.i.h.bf16 %v7308_v62  ;;  %v5475_v39 = vunpack.i.l.bf16 %v7357_v13 }
 0x22c   : > { %v5506_v18 = vunpack.i.h.bf16 %v5504_v56  ;;  %v5505_v48 = vunpack.i.l.bf16 %v5504_v56  ;;  %v7394_v26 = vpop.permute.xlu1 %5528  ;;  %v1942_v21 = vsel %vm1919_vm7, %v1909_v60, %v5495_v11  ;;  %v1976_v5 = vsel %vm8553_vm8, %v1943_v38, %v5431_v61 }
 0x22d   : > { %v1975_v30 = vsel %vm8553_vm8, %v1942_v21, %v5430_v8 }
 0x22e   : > { %v2039_v23 = vsel %vm8551_vm10, %v2006_v20, %v5505_v48  ;;  %v2040_v42 = vsel %vm8551_vm10, %v2007_v4, %v5506_v18  ;;  %v2008_v48 = vsel %vm8552_vm9, %v1975_v30, %v5450_v47  ;;  %v5456_v20 = vunpack.i.h.bf16 %v7324_v27 }
 0x22f   : > { %v2072_v15 = vsel %vm8549_vm11, %v2039_v23, %v5435_v16  ;;  %v2073_v41 = vsel %vm8549_vm11, %v2040_v42, %v5436_v37  ;;  %v7408_v36 = vpop.permute.xlu0 %5513  ;;  %v2009_v37 = vsel %vm8552_vm9, %v1976_v5, %v5451_v44  ;;  %v5520_v16 = vunpack.i.l.bf16 %v7383_v33 }
 0x230   : > { %v7410_v32 = vpop.permute.xlu1 %5533  ;;  %v2105_v14 = vsel %vm8548_vm12, %v2072_v15, %v5460_v28  ;;  %v2106_v25 = vsel %vm8548_vm12, %v2073_v41, %v5461_v49  ;;  %v5455_v49 = vunpack.i.l.bf16 %v7324_v27  ;;  %v2042_v42 = vsel %vm8551_vm10, %v2009_v37, %v5456_v20 }
 0x231   : > { %v2138_v40 = vsel %vm8547_vm13, %v2105_v14, %v5465_v51  ;;  %v2139_v29 = vsel %vm8547_vm13, %v2106_v25, %v5466_v17  ;;  %v2075_v51 = vsel %vm8549_vm11, %v2042_v42, %v5521_v53  ;;  %v5471_v25 = vunpack.i.h.bf16 %v7332_v3 }
 0x232   : > { %v2160_v10 = vpack.c.bf16 %v2139_v29, %v2138_v40  ;;  %v2041_v62 = vsel %vm8551_vm10, %v2008_v48, %v5455_v49  ;;  %v5470_v40 = vunpack.i.l.bf16 %v7332_v3  ;;  %v5515_v5 = vunpack.i.l.bf16 %v7408_v36 }
 0x233   : > { %v7416_v55 = vpop.permute.xlu0 %5523  ;;  %v2074_v15 = vsel %vm8549_vm11, %v2041_v62, %v5520_v16  ;;  %v1912_v3 = vsel %vm1886_vm6, %v6663_v7, %v5471_v25 }
 0x234   : > { %v7418_v1 = vpop.permute.xlu1 %5548  ;;  %4972 = vmatprep.mubr.msk.bf16.mxu1 %vm8546_vm14, %v2160_v10  ;;  %v5476_v10 = vunpack.i.h.bf16 %v7357_v13  ;;  %v5526_v11 = vunpack.i.h.bf16 %v7416_v55  ;;  %v1911_v38 = vsel %vm1886_vm6, %v6652_v35, %v5470_v40 }
 0x235   : > { %v1944_v8 = vsel %vm1919_vm7, %v1911_v38, %v5475_v39 }
 0x236   : > { %v1945_v30 = vsel %vm1919_vm7, %v1912_v3, %v5476_v10 }
 0x237   : > { %v7425_v50 = vpop.permute.xlu0 %5538  ;;  %v1978_v44 = vsel %vm8553_vm8, %v1945_v30, %v5526_v11 }
 0x238   : > { %v5559_v45 = vpop.permute.xlu1 %5558  ;;  %v5540_v62 = vunpack.i.l.bf16 %v7425_v50 }
 0x239   : > { %v5561_v28 = vunpack.i.h.bf16 %v5559_v45  ;;  %v5560_v23 = vunpack.i.l.bf16 %v5559_v45  ;;  %v5525_v45 = vunpack.i.l.bf16 %v7416_v55  ;;  %v5516_v55 = vunpack.i.h.bf16 %v7408_v36 }
 0x23b   : > { %v7435_v56 = vpop.permute.xlu0 %5543  ;;  %v2108_v27 = vsel %vm8548_vm12, %v2075_v51, %v5561_v28  ;;  %v2107_v29 = vsel %vm8548_vm12, %v2074_v15, %v5560_v23  ;;  %v1977_v47 = vsel %vm8553_vm8, %v1944_v8, %v5525_v45  ;;  %v5541_v23 = vunpack.i.h.bf16 %v7425_v50 }
 0x23c   : > { %v7437_v6 = vpop.permute.xlu1 %5568  ;;  %v5545_v51 = vunpack.i.l.bf16 %v7435_v56  ;;  %v5551_v45 = vunpack.i.h.bf16 %v7418_v1 }
 0x23d   : > { %v5571_v48 = vunpack.i.h.bf16 %v7437_v6  ;;  %v5570_v35 = vunpack.i.l.bf16 %v7437_v6 }
 0x23f   : > { %v7443_v18 = vpop.permute.xlu0 %5553  ;;  %v1913_v50 = vsel %vm1886_vm6, %v6846_v34, %v5570_v35  ;;  %v5550_v34 = vunpack.i.l.bf16 %v7418_v1  ;;  %v1916_v35 = vsel %vm1886_vm6, %v6856_v31, %v5551_v45 }
 0x240   : > { %v7449_v4 = vpop.permute.xlu1 %5573 }
 0x241   : > { %v5576_v20 = vunpack.i.h.bf16 %v7449_v4  ;;  %v5575_v49 = vunpack.i.l.bf16 %v7449_v4  ;;  %v1915_v1 = vsel %vm1886_vm6, %v6830_v59, %v5550_v34 }
 0x243   : > { %v5564_v17 = vpop.permute.xlu0 %5563 }
 0x244   : > { %v5566_v41 = vunpack.i.h.bf16 %v5564_v17  ;;  %v5565_v14 = vunpack.i.l.bf16 %v5564_v17  ;;  %v7457_v33 = vpop.permute.xlu1 %5588  ;;  %v5546_v17 = vunpack.i.h.bf16 %v7435_v56  ;;  %v1946_v56 = vsel %vm1919_vm7, %v1913_v50, %v5575_v49 }
 0x245   : > { %v5590_v49 = vunpack.i.l.bf16 %v7457_v33 }
 0x246   : > { %v2140_v2 = vsel %vm8547_vm13, %v2107_v29, %v5565_v14  ;;  %v2141_v9 = vsel %vm8547_vm13, %v2108_v27, %v5566_v41  ;;  %v1914_v14 = vsel %vm1886_vm6, %v6908_v12, %v5571_v48  ;;  %v5510_v12 = vunpack.i.l.bf16 %v7371_v22 }
 0x247   : > { %v2161_v57 = vpack.c.bf16 %v2141_v9, %v2140_v2  ;;  %v5579_v60 = vpop.permute.xlu0 %5578  ;;  %v1947_v29 = vsel %vm1919_vm7, %v1914_v14, %v5576_v20  ;;  %v5511_v2 = vunpack.i.h.bf16 %v7371_v22  ;;  %v5530_v22 = vunpack.i.l.bf16 %v7394_v26 }
 0x248   : > { %v7469_v21 = vpop.permute.xlu1 %5598  ;;  %v5581_v61 = vunpack.i.h.bf16 %v5579_v60  ;;  %v5580_v13 = vunpack.i.l.bf16 %v5579_v60  ;;  %v1979_v60 = vsel %vm8553_vm8, %v1946_v56, %v5510_v12  ;;  %v5591_v20 = vunpack.i.h.bf16 %v7457_v33 }
 0x249   : > { %4973 = vmatmul.mubr.msk.bf16.gmra.mrb[20].mxu1 %vm8546_vm14, %v2161_v57  ;;  %v5555_v57 = vunpack.i.l.bf16 %v7443_v18  ;;  %v1980_v3 = vsel %vm8553_vm8, %v1947_v29, %v5511_v2 }
 0x24a   : > { %v2011_v28 = vsel %vm8552_vm9, %v1978_v44, %v5581_v61  ;;  %v2010_v36 = vsel %vm8552_vm9, %v1977_v47, %v5580_v13  ;;  %v5531_v61 = vunpack.i.h.bf16 %v7394_v26  ;;  %v8607_v13 = vld [vmem:[#allocation30_spill] sm:$0xff]  ;;  %v5601_v47 = vunpack.i.h.bf16 %v7469_v21 }
 0x24b   : > { %v5584_v7 = vpop.permute.xlu0 %5583  ;;  %v5031_v8 = vunpack.i.h.bf16 %v8607_v13  ;;  %v8550_v30 = vunpack.i.l.bf16 %v8607_v13  ;;  %v5535_v26 = vunpack.i.l.bf16 %v7410_v32 }
 0x24c   : > { %v5586_v37 = vunpack.i.h.bf16 %v5584_v7  ;;  %v5585_v53 = vunpack.i.l.bf16 %v5584_v7  ;;  %v7484_v16 = vpop.permute.xlu1 %5608  ;;  %v2013_v44 = vsel %vm8552_vm9, %v1980_v3, %v5531_v61  ;;  %v5600_v7 = vunpack.i.l.bf16 %v7469_v21 }
 0x24e   : > { %v2043_v42 = vsel %vm8551_vm10, %v2010_v36, %v5585_v53  ;;  %v2044_v6 = vsel %vm8551_vm10, %v2011_v28, %v5586_v37  ;;  %v5556_v37 = vunpack.i.h.bf16 %v7443_v18  ;;  %v1948_v53 = vsel %vm1919_vm7, %v1915_v1, %v5555_v57 }
 0x24f   : > { %v2076_v15 = vsel %vm8549_vm11, %v2043_v42, %v5515_v5  ;;  %v2077_v4 = vsel %vm8549_vm11, %v2044_v6, %v5516_v55  ;;  %v7498_v41 = vpop.permute.xlu0 %5593  ;;  %v5536_v55 = vunpack.i.h.bf16 %v7410_v32  ;;  %v2012_v5 = vsel %vm8552_vm9, %v1979_v60, %v5530_v22 }
 0x250   : > { %v7504_v25 = vpop.permute.xlu1 %5613  ;;  %v2109_v40 = vsel %vm8548_vm12, %v2076_v15, %v5540_v62  ;;  %v2110_v27 = vsel %vm8548_vm12, %v2077_v4, %v5541_v23  ;;  %v2045_v21 = vsel %vm8551_vm10, %v2012_v5, %v5535_v26  ;;  %v5611_v18 = vunpack.i.h.bf16 %v7484_v16 }
 0x251   : > { %v2142_v10 = vsel %vm8547_vm13, %v2109_v40, %v5545_v51  ;;  %v2143_v39 = vsel %vm8547_vm13, %v2110_v27, %v5546_v17  ;;  %v2046_v23 = vsel %vm8551_vm10, %v2013_v44, %v5536_v55  ;;  %v2078_v31 = vsel %vm8549_vm11, %v2045_v21, %v5600_v7 }
 0x252   : > { %v2162_v9 = vpack.c.bf16 %v2143_v39, %v2142_v10  ;;  %v2079_v42 = vsel %vm8549_vm11, %v2046_v23, %v5601_v47  ;;  %v5610_v6 = vunpack.i.l.bf16 %v7484_v16  ;;  %v5616_v51 = vunpack.i.h.bf16 %v7504_v25 }
 0x253   : > { %v7515_v11 = vpop.permute.xlu0 %5603  ;;  %v5615_v57 = vunpack.i.l.bf16 %v7504_v25  ;;  %v5596_v55 = vunpack.i.h.bf16 %v7498_v41  ;;  %v5595_v1 = vunpack.i.l.bf16 %v7498_v41 }
 0x254   : > { %v5624_v38 = vpop.permute.xlu1 %5623  ;;  %4976 = vmatprep.mubr.msk.bf16.mxu1 %vm8546_vm14, %v2162_v9  ;;  %v5606_v33 = vunpack.i.h.bf16 %v7515_v11  ;;  %v5605_v2 = vunpack.i.l.bf16 %v7515_v11 }
 0x255   : > { %v5626_v28 = vunpack.i.h.bf16 %v5624_v38  ;;  %v5625_v36 = vunpack.i.l.bf16 %v5624_v38  ;;  %v1949_v38 = vsel %vm1919_vm7, %v1916_v35, %v5556_v37 }
 0x256   : > { %v1982_v44 = vsel %vm8553_vm8, %v1949_v38, %v5606_v33  ;;  %v1981_v47 = vsel %vm8553_vm8, %v1948_v53, %v5605_v2 }
 0x257   : > { %v7533_v48 = vpop.permute.xlu0 %5618  ;;  %v2112_v50 = vsel %vm8548_vm12, %v2079_v42, %v5626_v28  ;;  %v2111_v40 = vsel %vm8548_vm12, %v2078_v31, %v5625_v36 }
 0x258   : > { %v5634_v59 = vpop.permute.xlu1 %5633  ;;  %v5620_v23 = vunpack.i.l.bf16 %v7533_v48  ;;  %v5621_v42 = vunpack.i.h.bf16 %v7533_v48 }
 0x259   : > { %v5636_v62 = vunpack.i.h.bf16 %v5634_v59  ;;  %v5635_v32 = vunpack.i.l.bf16 %v5634_v59 }
 0x25b   : > { %v5629_v17 = vpop.permute.xlu0 %5628  ;;  %v1918_v29 = vsel %vm1886_vm6, %v7100_v46, %v5636_v62  ;;  %v1917_v16 = vsel %vm1886_vm6, %v7097_v24, %v5635_v32 }
 0x25c   : > { %v5631_v15 = vunpack.i.h.bf16 %v5629_v17  ;;  %v5630_v4 = vunpack.i.l.bf16 %v5629_v17  ;;  %v5639_v14 = vpop.permute.xlu1 %5638 }
 0x25d   : > { %v5641_v27 = vunpack.i.h.bf16 %v5639_v14  ;;  %v5640_v56 = vunpack.i.l.bf16 %v5639_v14 }
 0x25e   : > { %v2144_v10 = vsel %vm8547_vm13, %v2111_v40, %v5630_v4  ;;  %v2145_v39 = vsel %vm8547_vm13, %v2112_v50, %v5631_v15 }
 0x25f   : > { %v2163_v12 = vpack.c.bf16 %v2145_v39, %v2144_v10  ;;  %v1950_v34 = vsel %vm1919_vm7, %v1917_v16, %v5640_v56  ;;  %v1951_v9 = vsel %vm1919_vm7, %v1918_v29, %v5641_v27  ;;  %v5649_v45 = vpop.permute.xlu0 %5648  ;;  %v8608_v29 = vld [vmem:[#allocation6_spill] sm:$0xff] }
 0x260   : > { %v1983_v60 = vsel %vm8553_vm8, %v1950_v34, %v5590_v49  ;;  %v1984_v46 = vsel %vm8553_vm8, %v1951_v9, %v5591_v20  ;;  %v5651_v3 = vunpack.i.h.bf16 %v5649_v45  ;;  %v5644_v24 = vpop.permute.xlu1 %5643  ;;  %v5650_v22 = vunpack.i.l.bf16 %v5649_v45  ;;  %v6000_v39 = vld [vmem:[%s8496_s5] sm:$0xff] }
 0x261   : > { %v2016_v61 = vsel %vm8552_vm9, %v1983_v60, %v5610_v6  ;;  %v2017_v11 = vsel %vm8552_vm9, %v1984_v46, %v5611_v18  ;;  %4977 = vmatmul.mubr.msk.bf16.gmra.mrb[24].mxu1 %vm8546_vm14, %v2163_v12  ;;  %v5646_v7 = vunpack.i.h.bf16 %v5644_v24  ;;  %v5645_v26 = vunpack.i.l.bf16 %v5644_v24 }
 0x262   : > { %v2049_v25 = vsel %vm8551_vm10, %v2016_v61, %v5615_v57  ;;  %v2050_v5 = vsel %vm8551_vm10, %v2017_v11, %v5616_v51  ;;  %v2015_v37 = vsel %vm8552_vm9, %v1982_v44, %v5651_v3  ;;  %v2014_v28 = vsel %vm8552_vm9, %v1981_v47, %v5650_v22 }
 0x263   : > { %v5654_v35 = vpop.permute.xlu0 %5653  ;;  %v2082_v59 = vsel %vm8549_vm11, %v2049_v25, %v8550_v30  ;;  %v2083_v36 = vsel %vm8549_vm11, %v2050_v5, %v5031_v8  ;;  %v2409_v16 = vsub.s32 2, %v8608_v29  ;;  %v2445_v10 = vsub.s32 3, %v8608_v29 }
 0x264   : > { %v5656_v20 = vunpack.i.h.bf16 %v5654_v35  ;;  %v5655_v49 = vunpack.i.l.bf16 %v5654_v35  ;;  %v5664_v41 = vpop.permute.xlu1 %5663  ;;  %v2115_v31 = vsel %vm8548_vm12, %v2082_v59, %v5645_v26  ;;  %v2116_v51 = vsel %vm8548_vm12, %v2083_v36, %v5646_v7 }
 0x265   : > { %v5666_v21 = vunpack.i.h.bf16 %v5664_v41  ;;  %v5665_v53 = vunpack.i.l.bf16 %v5664_v41  ;;  %v7603_v2 = vrot.slane %v6000_v39, %v2409_v16  ;;  %v7605_v12 = vrot.slane %v6000_v39, %v2445_v10 }
 0x266   : > { %v2047_v62 = vsel %vm8551_vm10, %v2014_v28, %v5655_v49  ;;  %v2048_v32 = vsel %vm8551_vm10, %v2015_v37, %v5656_v20  ;;  %v6019_v60 = vmov 1983009808   ;;  %v8609_v37 = vld [vmem:[#allocation8_spill] sm:$0xff]  ;;  %v8610_v49 = vld [vmem:[#allocation9_spill] sm:$0xff] }
 0x267   : > { %v2080_v18 = vsel %vm8549_vm11, %v2047_v62, %v5595_v1  ;;  %v2081_v6 = vsel %vm8549_vm11, %v2048_v32, %v5596_v55  ;;  %v5659_v17 = vpop.permute.xlu0 %5658  ;;  %v2148_v4 = vsel %vm8547_vm13, %v2115_v31, %v5665_v53  ;;  %v2149_v14 = vsel %vm8547_vm13, %v2116_v51, %v5666_v21  ;;  %v8611_v21 = vld [vmem:[#allocation10_spill] sm:$0xff]  ;;  %v8612_v62 = vld [vmem:[#allocation11_spill] sm:$0xff] }
 0x268   : > { %v5661_v8 = vunpack.i.h.bf16 %v5659_v17  ;;  %v5660_v33 = vunpack.i.l.bf16 %v5659_v17  ;;  %v2113_v15 = vsel %vm8548_vm12, %v2080_v18, %v5620_v23  ;;  %v2114_v50 = vsel %vm8548_vm12, %v2081_v6, %v5621_v42 }
 0x269   : > { %v2165_v56 = vpack.c.bf16 %v2149_v14, %v2148_v4  ;;  %v2609_v46 = vunpack.c.l.s4 %v6019_v60  ;;  %v8613_v60 = vld [vmem:[#allocation7_spill] sm:$0xff]  ;;  %vm3538_vm12 = vcmask 1046534   ;;  %vm3540_vm11 = vcmask 1047559  }
 0x26a   : > { %v2146_v48 = vsel %vm8547_vm13, %v2113_v15, %v5660_v33  ;;  %v2147_v40 = vsel %vm8547_vm13, %v2114_v50, %v5661_v8  ;;  %vm3536_vm13 = vcmask 1045509  }
 0x26b   : > { %v2164_v27 = vpack.c.bf16 %v2147_v40, %v2146_v48  ;;  %v2610_v5 = vunpack.c.0.s8 %v2609_v46 }
 0x26d   : > { %4980 = vmatprep.mubr.msk.bf16.mxu1 %vm8546_vm14, %v2164_v27  ;;  %v7618_v28 = vsub.s32 %v2610_v5, %v8608_v29 }
 0x26e   : > { %4981 = vmatmul.mubr.msk.bf16.gmra.mrb[28].mxu1 %vm8546_vm14, %v2165_v56  ;;  %vm3534_vm14 = vcmask 1044484  }
 0x27c   : > { %v4954_v34 = vpop.f32.mrb[0].mxu1 }
 0x27d   : > { %v2413_v9 = vmul.f32 %v4954_v34, %v7603_v2  ;;  %v2280_v45 = vpop.f32.mrb[1].mxu1 }
 0x27e   : > { %v2411_v57 = vmul.f32 %v7603_v2, %v2280_v45  ;;  %v4955_v3 = vpop.f32.mrb[2].mxu1 }
 0x27f   : > { %v2449_v24 = vadd.f32 %v7605_v12, %v2413_v9  ;;  %v2414_v38 = vmul.f32 %v4955_v3, %v7603_v2  ;;  %v2283_v61 = vpop.f32.mrb[3].mxu1 }
 0x280   : > { %v2447_v11 = vadd.f32 %v7605_v12, %v2411_v57  ;;  %v2412_v22 = vmul.f32 %v7603_v2, %v2283_v61 }
 0x281   : > { %v2481_v55 = vmul.f32 0.01, %v2449_v24  ;;  %v2450_v1 = vadd.f32 %v7605_v12, %v2414_v38 }
 0x282   : > { %v2479_v25 = vmul.f32 0.01, %v2447_v11  ;;  %v2448_v44 = vadd.f32 %v7605_v12, %v2412_v22 }
 0x283   : > { %v2513_v47 = vmax.f32 %v2449_v24, %v2481_v55  ;;  %v2482_v7 = vmul.f32 0.01, %v2450_v1 }
 0x284   : > { %v2511_v26 = vmax.f32 %v2447_v11, %v2479_v25  ;;  %v2480_v35 = vmul.f32 0.01, %v2448_v44 }
 0x285   : > { %v2545_v59 = vadd.f32 %v2513_v47, %v8609_v37  ;;  %v2514_v20 = vmax.f32 %v2450_v1, %v2482_v7 }
 0x286   : > { %v2543_v41 = vadd.f32 %v2511_v26, %v8610_v49  ;;  %v2512_v36 = vmax.f32 %v2448_v44, %v2480_v35 }
 0x287   : > { %v2546_v53 = vadd.f32 %v2514_v20, %v8611_v21 }
 0x288   : > { %v2575_v23 = vmax.f32 %v2543_v41, %v2545_v59  ;;  %v2544_v32 = vadd.f32 %v2512_v36, %v8612_v62  ;;  %v8614_v62 = vld [vmem:[#allocation3_spill] sm:$0xff] }
 0x28a   : > { %v2607_v42 = vcombine.high %v2575_v23, %v2575_v23  ;;  %v2614_v31 = vrot.slane %v2575_v23, %v7618_v28  ;;  %v2576_v18 = vmax.f32 %v2544_v32, %v2546_v53  ;;  %v8615_v32 = vrot.slane %v8614_v62, 1 }
 0x28c   : > { %v2621_v6 = vrot.slane %v2607_v42, %v7618_v28  ;;  %v2622_v17 = vcombine.high %v2614_v31, %v2614_v31  ;;  %v4765_v51 = vrot.slane %v2614_v31, 9  ;;  %v2624_v8 = vcombine.high %v2576_v18, %v2576_v18  ;;  %v8616_v42 = vld [vmem:[#allocation2_spill] sm:$0xff] }
 0x28d   : > { %v2631_v33 = vrot.slane %v2576_v18, %v7618_v28 }
 0x28e   : > { %v2623_v15 = vcombine.high %v2621_v6, %v2621_v6  ;;  %v4766_v4 = vrot.slane %v2622_v17, 9  ;;  %v4767_v14 = vrot.slane %v2621_v6, 9  ;;  %v3135_v50 = vmax.f32 %v2614_v31, %v4765_v51 }
 0x28f   : > { %v2638_v48 = vrot.slane %v2624_v8, %v7618_v28  ;;  %v2639_v40 = vcombine.high %v2631_v33, %v2631_v33  ;;  %v4769_v27 = vrot.slane %v2631_v33, 9  ;;  %v8617_v31 = vrot.slane %v8616_v42, 1 }
 0x290   : > { %v4768_v56 = vrot.slane %v2623_v15, 9  ;;  %v3136_v16 = vmax.f32 %v2622_v17, %v4766_v4  ;;  %v3137_v10 = vmax.f32 %v2621_v6, %v4767_v14  ;;  %v3275_v46 = vrot.slane %v3135_v50, %v8613_v60 }
 0x291   : > { %v2640_v39 = vcombine.high %v2638_v48, %v2638_v48  ;;  %v4770_v34 = vrot.slane %v2639_v40, 9  ;;  %v4771_v9 = vrot.slane %v2638_v48, 9  ;;  %v3139_v45 = vmax.f32 %v2631_v33, %v4769_v27 }
 0x292   : > { %v3138_v57 = vmax.f32 %v2623_v15, %v4768_v56  ;;  %v3279_v3 = vrot.slane %v3136_v16, %v8613_v60  ;;  %v3283_v24 = vrot.slane %v3137_v10, %v8613_v60  ;;  %v7651_v18 = vsel %vm944_vm4, %v8617_v31, %v8615_v32 }
 0x293   : > { %v4772_v38 = vrot.slane %v2640_v39, 9  ;;  %v3140_v61 = vmax.f32 %v2639_v40, %v4770_v34  ;;  %v3141_v11 = vmax.f32 %v2638_v48, %v4771_v9  ;;  %v3291_v5 = vrot.slane %v3139_v45, %v8613_v60 }
 0x294   : > { %v3287_v22 = vrot.slane %v3138_v57, %v8613_v60  ;;  %v3529_v55 = vsel %vm3528_vm15, %v3279_v3, %v3275_v46  ;;  %v8618_v9 = vrot.slane %v8614_v62, 2  ;;  %v8619_v45 = vrot.slane %v8616_v42, 2 }
 0x295   : > { %v3531_v1 = vsel %vm3530_vm0, %v3283_v24, %v3529_v55  ;;  %v3142_v25 = vmax.f32 %v2640_v39, %v4772_v38  ;;  %v3295_v44 = vrot.slane %v3140_v61, %v8613_v60  ;;  %v3299_v7 = vrot.slane %v3141_v11, %v8613_v60  ;;  %v8620_v11 = vld [vmem:[#allocation12_spill] sm:$0xff] }
 0x296   : > { %v3533_v47 = vsel %vm3532_vm1, %v3287_v22, %v3531_v1  ;;  %v7672_v57 = vsel %vm1025_vm3, %v8619_v45, %v8618_v9 }
 0x297   : > { %v3535_v26 = vsel %vm3534_vm14, %v3291_v5, %v3533_v47  ;;  %v3303_v35 = vrot.slane %v3142_v25, %v8613_v60  ;;  %v8621_v25 = vld [vmem:[#allocation14_spill] sm:$0xff]  ;;  %v8622_v47 = vld [vmem:[#allocation13_spill] sm:$0xff] }
 0x298   : > { %v3537_v37 = vsel %vm3536_vm13, %v3295_v44, %v3535_v26 }
 0x299   : > { %v3539_v59 = vsel %vm3538_vm12, %v3299_v7, %v3537_v37 }
 0x29a   : > { %v3541_v20 = vsel %vm3540_vm11, %v3303_v35, %v3539_v59  ;;  %v8623_v35 = vld [vmem:[#allocation15_spill] sm:$0xff] }
 0x29b   : > { %v3591_v49 = vrot.slane %v3541_v20, 7 }
 0x29c   : > { %v4958_v41 = vpop.f32.mrb[4].mxu1 }
 0x29d   : > { %v2417_v36 = vmul.f32 %v4958_v41, %v7603_v2  ;;  %v2296_v21 = vpop.f32.mrb[5].mxu1  ;;  %v7643_v53 = vsel %vm778_vm2, 0.0, %v3591_v49  ;;  %v3615_v23 = vsel %vm778_vm2, %v3591_v49, 0.0 }
 0x29e   : > { %v2415_v6 = vmul.f32 %v7603_v2, %v2296_v21  ;;  %v4959_v17 = vpop.f32.mrb[6].mxu1  ;;  %v3638_v51 = vrot.slane %v7643_v53, 1  ;;  %v3639_v8 = vrot.slane %v3615_v23, 1  ;;  %v3660_v33 = vrot.slane %v7643_v53, 2 }
 0x29f   : > { %v2453_v15 = vadd.f32 %v7605_v12, %v2417_v36  ;;  %v2418_v4 = vmul.f32 %v4959_v17, %v7603_v2  ;;  %v2299_v14 = vpop.f32.mrb[7].mxu1  ;;  %v3661_v50 = vrot.slane %v3615_v23, 2 }
 0x2a0   : > { %v2451_v48 = vadd.f32 %v7605_v12, %v2415_v6  ;;  %v2416_v40 = vmul.f32 %v7603_v2, %v2299_v14  ;;  %v7661_v27 = vsel %vm944_vm4, %v3638_v51, %v3639_v8 }
 0x2a1   : > { %v2485_v56 = vmul.f32 0.01, %v2453_v15  ;;  %v2454_v16 = vadd.f32 %v7605_v12, %v2418_v4  ;;  %v5667_v10 = vpack.i.bf16 %v7661_v27, %v7651_v18  ;;  %v7675_v46 = vsel %vm1025_vm3, %v3660_v33, %v3661_v50 }
 0x2a2   : > { %v2483_v39 = vmul.f32 0.01, %v2451_v48  ;;  %v2452_v34 = vadd.f32 %v7605_v12, %v2416_v40  ;;  %v5672_v1 = vpack.i.bf16 %v7675_v46, %v7672_v57 }
 0x2a3   : > { %v2517_v3 = vmax.f32 %v2453_v15, %v2485_v56  ;;  %v2486_v24 = vmul.f32 0.01, %v2454_v16  ;;  %5668 = vrot.lane.b32.xlu0 %v5667_v10, %s6013_s11 }
 0x2a4   : > { %v2515_v38 = vmax.f32 %v2451_v48, %v2483_v39  ;;  %v2484_v61 = vmul.f32 0.01, %v2452_v34 }
 0x2a5   : > { %v2549_v22 = vadd.f32 %v2517_v3, %v8620_v11  ;;  %v2518_v55 = vmax.f32 %v2454_v16, %v2486_v24 }
 0x2a6   : > { %v2547_v5 = vadd.f32 %v2515_v38, %v8621_v25  ;;  %v2516_v44 = vmax.f32 %v2452_v34, %v2484_v61 }
 0x2a7   : > { %v2550_v7 = vadd.f32 %v2518_v55, %v8622_v47  ;;  %5673 = vrot.lane.b32.xlu0 %v5672_v1, %s6012_s10 }
 0x2a8   : > { %v2577_v26 = vmax.f32 %v2547_v5, %v2549_v22  ;;  %v2548_v37 = vadd.f32 %v2516_v44, %v8623_v35 }
 0x2aa   : > { %v2641_v59 = vcombine.high %v2577_v26, %v2577_v26  ;;  %v2648_v20 = vrot.slane %v2577_v26, %v7618_v28  ;;  %v2578_v49 = vmax.f32 %v2548_v37, %v2550_v7 }
 0x2ac   : > { %v2655_v41 = vrot.slane %v2641_v59, %v7618_v28  ;;  %v2656_v36 = vcombine.high %v2648_v20, %v2648_v20  ;;  %v4773_v21 = vrot.slane %v2648_v20, 9  ;;  %v2658_v23 = vcombine.high %v2578_v49, %v2578_v49 }
 0x2ad   : > { %v2665_v62 = vrot.slane %v2578_v49, %v7618_v28 }
 0x2ae   : > { %v2657_v32 = vcombine.high %v2655_v41, %v2655_v41  ;;  %v4774_v31 = vrot.slane %v2656_v36, 9  ;;  %v4775_v6 = vrot.slane %v2655_v41, 9  ;;  %v3143_v17 = vmax.f32 %v2648_v20, %v4773_v21 }
 0x2af   : > { %v2672_v51 = vrot.slane %v2658_v23, %v7618_v28  ;;  %v2673_v8 = vcombine.high %v2665_v62, %v2665_v62  ;;  %v4777_v33 = vrot.slane %v2665_v62, 9 }
 0x2b0   : > { %v4776_v15 = vrot.slane %v2657_v32, 9  ;;  %v3144_v4 = vmax.f32 %v2656_v36, %v4774_v31  ;;  %v3145_v14 = vmax.f32 %v2655_v41, %v4775_v6  ;;  %v3307_v10 = vrot.slane %v3143_v17, %v8613_v60 }
 0x2b1   : > { %v2674_v50 = vcombine.high %v2672_v51, %v2672_v51  ;;  %v4778_v48 = vrot.slane %v2673_v8, 9  ;;  %v4779_v40 = vrot.slane %v2672_v51, 9  ;;  %v3147_v56 = vmax.f32 %v2665_v62, %v4777_v33 }
 0x2b2   : > { %v3146_v16 = vmax.f32 %v2657_v32, %v4776_v15  ;;  %v3311_v39 = vrot.slane %v3144_v4, %v8613_v60  ;;  %v3315_v34 = vrot.slane %v3145_v14, %v8613_v60 }
 0x2b3   : > { %v4780_v9 = vrot.slane %v2674_v50, 9  ;;  %v3148_v45 = vmax.f32 %v2673_v8, %v4778_v48  ;;  %v3149_v3 = vmax.f32 %v2672_v51, %v4779_v40  ;;  %v3323_v22 = vrot.slane %v3147_v56, %v8613_v60 }
 0x2b4   : > { %v3319_v24 = vrot.slane %v3146_v16, %v8613_v60  ;;  %v3542_v38 = vsel %vm3528_vm15, %v3311_v39, %v3307_v10 }
 0x2b5   : > { %v3543_v61 = vsel %vm3530_vm0, %v3315_v34, %v3542_v38  ;;  %v3150_v11 = vmax.f32 %v2674_v50, %v4780_v9  ;;  %v3327_v55 = vrot.slane %v3148_v45, %v8613_v60  ;;  %v3331_v25 = vrot.slane %v3149_v3, %v8613_v60  ;;  %v8624_v3 = vld [vmem:[#allocation16_spill] sm:$0xff] }
 0x2b6   : > { %v3544_v1 = vsel %vm3532_vm1, %v3319_v24, %v3543_v61  ;;  %v8625_v61 = vld [vmem:[#allocation18_spill] sm:$0xff] }
 0x2b7   : > { %v3545_v5 = vsel %vm3534_vm14, %v3323_v22, %v3544_v1  ;;  %v3335_v44 = vrot.slane %v3150_v11, %v8613_v60  ;;  %v8626_v22 = vld [vmem:[#allocation17_spill] sm:$0xff] }
 0x2b8   : > { %v3546_v47 = vsel %vm3536_vm13, %v3327_v55, %v3545_v5 }
 0x2b9   : > { %v3547_v7 = vsel %vm3538_vm12, %v3331_v25, %v3546_v47  ;;  %v8627_v25 = vld [vmem:[#allocation19_spill] sm:$0xff] }
 0x2ba   : > { %v3548_v26 = vsel %vm3540_vm11, %v3335_v44, %v3547_v7 }
 0x2bb   : > { %v3592_v35 = vrot.slane %v3548_v26, 7 }
 0x2bc   : > { %v4962_v37 = vpop.f32.mrb[8].mxu1 }
 0x2bd   : > { %v2421_v59 = vmul.f32 %v4962_v37, %v7603_v2  ;;  %v2312_v20 = vpop.f32.mrb[9].mxu1  ;;  %v7706_v49 = vsel %vm778_vm2, 0.0, %v3592_v35  ;;  %v3616_v41 = vsel %vm778_vm2, %v3592_v35, 0.0 }
 0x2be   : > { %v2419_v36 = vmul.f32 %v7603_v2, %v2312_v20  ;;  %v4963_v21 = vpop.f32.mrb[10].mxu1  ;;  %v5677_v23 = vpack.i.bf16 %v7706_v49, %v7643_v53  ;;  %v3641_v62 = vrot.slane %v7706_v49, 1  ;;  %v3642_v32 = vrot.slane %v3616_v41, 1 }
 0x2bf   : > { %v2457_v31 = vadd.f32 %v7605_v12, %v2421_v59  ;;  %v2422_v6 = vmul.f32 %v4963_v21, %v7603_v2  ;;  %v2315_v17 = vpop.f32.mrb[11].mxu1  ;;  %v3663_v51 = vrot.slane %v7706_v49, 2  ;;  %v3664_v8 = vrot.slane %v3616_v41, 2 }
 0x2c0   : > { %v2455_v33 = vadd.f32 %v7605_v12, %v2419_v36  ;;  %v2420_v15 = vmul.f32 %v7603_v2, %v2315_v17  ;;  %5678 = vrot.lane.b32.xlu0 %v5677_v23, %s6014_s14  ;;  %v7720_v4 = vsel %vm944_vm4, %v3641_v62, %v3642_v32 }
 0x2c1   : > { %v2489_v14 = vmul.f32 0.01, %v2457_v31  ;;  %v2458_v50 = vadd.f32 %v7605_v12, %v2422_v6  ;;  %v5682_v48 = vpack.i.bf16 %v7720_v4, %v7661_v27  ;;  %v7726_v40 = vsel %vm1025_vm3, %v3663_v51, %v3664_v8 }
 0x2c2   : > { %v2487_v56 = vmul.f32 0.01, %v2455_v33  ;;  %v2456_v16 = vadd.f32 %v7605_v12, %v2420_v15  ;;  %v5687_v10 = vpack.i.bf16 %v7726_v40, %v7675_v46 }
 0x2c3   : > { %v2521_v39 = vmax.f32 %v2457_v31, %v2489_v14  ;;  %v2490_v34 = vmul.f32 0.01, %v2458_v50 }
 0x2c4   : > { %v2519_v9 = vmax.f32 %v2455_v33, %v2487_v56  ;;  %v2488_v45 = vmul.f32 0.01, %v2456_v16  ;;  %5683 = vrot.lane.b32.xlu0 %v5682_v48, %s6015_s15 }
 0x2c5   : > { %v2553_v24 = vadd.f32 %v2521_v39, %v8624_v3  ;;  %v2522_v38 = vmax.f32 %v2458_v50, %v2490_v34 }
 0x2c6   : > { %v2551_v27 = vadd.f32 %v2519_v9, %v8625_v61  ;;  %v2520_v11 = vmax.f32 %v2456_v16, %v2488_v45 }
 0x2c7   : > { %v2554_v55 = vadd.f32 %v2522_v38, %v8626_v22 }
 0x2c8   : > { %v2579_v1 = vmax.f32 %v2551_v27, %v2553_v24  ;;  %v2552_v5 = vadd.f32 %v2520_v11, %v8627_v25  ;;  %5688 = vrot.lane.b32.xlu0 %v5687_v10, %s6017_s17 }
 0x2ca   : > { %v2675_v46 = vcombine.high %v2579_v1, %v2579_v1  ;;  %v2682_v44 = vrot.slane %v2579_v1, %v7618_v28  ;;  %v2580_v47 = vmax.f32 %v2552_v5, %v2554_v55 }
 0x2cc   : > { %v2689_v7 = vrot.slane %v2675_v46, %v7618_v28  ;;  %v2690_v26 = vcombine.high %v2682_v44, %v2682_v44  ;;  %v4781_v35 = vrot.slane %v2682_v44, 9  ;;  %v2692_v37 = vcombine.high %v2580_v47, %v2580_v47 }
 0x2cd   : > { %v2699_v59 = vrot.slane %v2580_v47, %v7618_v28 }
 0x2ce   : > { %v2691_v20 = vcombine.high %v2689_v7, %v2689_v7  ;;  %v4782_v41 = vrot.slane %v2690_v26, 9  ;;  %v4783_v36 = vrot.slane %v2689_v7, 9  ;;  %v3151_v21 = vmax.f32 %v2682_v44, %v4781_v35 }
 0x2cf   : > { %v2706_v23 = vrot.slane %v2692_v37, %v7618_v28  ;;  %v2707_v62 = vcombine.high %v2699_v59, %v2699_v59  ;;  %v4785_v32 = vrot.slane %v2699_v59, 9 }
 0x2d0   : > { %v4784_v31 = vrot.slane %v2691_v20, 9  ;;  %v3152_v6 = vmax.f32 %v2690_v26, %v4782_v41  ;;  %v3153_v17 = vmax.f32 %v2689_v7, %v4783_v36  ;;  %v3339_v50 = vrot.slane %v3151_v21, %v8613_v60 }
 0x2d1   : > { %v2708_v51 = vcombine.high %v2706_v23, %v2706_v23  ;;  %v4786_v8 = vrot.slane %v2707_v62, 9  ;;  %v4787_v33 = vrot.slane %v2706_v23, 9  ;;  %v3155_v15 = vmax.f32 %v2699_v59, %v4785_v32 }
 0x2d2   : > { %v3154_v14 = vmax.f32 %v2691_v20, %v4784_v31  ;;  %v3343_v48 = vrot.slane %v3152_v6, %v8613_v60  ;;  %v3347_v56 = vrot.slane %v3153_v17, %v8613_v60 }
 0x2d3   : > { %v4788_v16 = vrot.slane %v2708_v51, 9  ;;  %v3156_v10 = vmax.f32 %v2707_v62, %v4786_v8  ;;  %v3157_v39 = vmax.f32 %v2706_v23, %v4787_v33  ;;  %v3355_v24 = vrot.slane %v3155_v15, %v8613_v60 }
 0x2d4   : > { %v3351_v34 = vrot.slane %v3154_v14, %v8613_v60  ;;  %v3549_v9 = vsel %vm3528_vm15, %v3343_v48, %v3339_v50 }
 0x2d5   : > { %v3550_v45 = vsel %vm3530_vm0, %v3347_v56, %v3549_v9  ;;  %v3158_v3 = vmax.f32 %v2708_v51, %v4788_v16  ;;  %v3359_v38 = vrot.slane %v3156_v10, %v8613_v60  ;;  %v3363_v27 = vrot.slane %v3157_v39, %v8613_v60 }
 0x2d6   : > { %v3551_v61 = vsel %vm3532_vm1, %v3351_v34, %v3550_v45  ;;  %v8628_v34 = vld [vmem:[#allocation20_spill] sm:$0xff]  ;;  %v8629_v45 = vld [vmem:[#allocation22_spill] sm:$0xff] }
 0x2d7   : > { %v3552_v11 = vsel %vm3534_vm14, %v3355_v24, %v3551_v61  ;;  %v3367_v22 = vrot.slane %v3158_v3, %v8613_v60 }
 0x2d8   : > { %v3553_v55 = vsel %vm3536_vm13, %v3359_v38, %v3552_v11  ;;  %v8630_v38 = vld [vmem:[#allocation21_spill] sm:$0xff]  ;;  %v8631_v11 = vld [vmem:[#allocation23_spill] sm:$0xff] }
 0x2d9   : > { %v3554_v1 = vsel %vm3538_vm12, %v3363_v27, %v3553_v55 }
 0x2da   : > { %v3555_v25 = vsel %vm3540_vm11, %v3367_v22, %v3554_v1 }
 0x2db   : > { %v3593_v5 = vrot.slane %v3555_v25, 7 }
 0x2dc   : > { %v4966_v46 = vpop.f32.mrb[12].mxu1 }
 0x2dd   : > { %v2425_v44 = vmul.f32 %v4966_v46, %v7603_v2  ;;  %v2328_v47 = vpop.f32.mrb[13].mxu1  ;;  %v7758_v7 = vsel %vm778_vm2, 0.0, %v3593_v5  ;;  %v3617_v26 = vsel %vm778_vm2, %v3593_v5, 0.0 }
 0x2de   : > { %v2423_v35 = vmul.f32 %v7603_v2, %v2328_v47  ;;  %v4967_v37 = vpop.f32.mrb[14].mxu1  ;;  %v5692_v59 = vpack.i.bf16 %v7758_v7, %v7706_v49  ;;  %v3644_v20 = vrot.slane %v7758_v7, 1  ;;  %v3645_v41 = vrot.slane %v3617_v26, 1 }
 0x2df   : > { %v2461_v36 = vadd.f32 %v7605_v12, %v2425_v44  ;;  %v2426_v21 = vmul.f32 %v4967_v37, %v7603_v2  ;;  %v2331_v23 = vpop.f32.mrb[15].mxu1  ;;  %v3666_v62 = vrot.slane %v7758_v7, 2  ;;  %v3667_v32 = vrot.slane %v3617_v26, 2 }
 0x2e0   : > { %v2459_v31 = vadd.f32 %v7605_v12, %v2423_v35  ;;  %v2424_v6 = vmul.f32 %v7603_v2, %v2331_v23  ;;  %5693 = vrot.lane.b32.xlu0 %v5692_v59, %s6011_s9  ;;  %v7772_v17 = vsel %vm944_vm4, %v3644_v20, %v3645_v41 }
 0x2e1   : > { %v2493_v51 = vmul.f32 0.01, %v2461_v36  ;;  %v2462_v8 = vadd.f32 %v7605_v12, %v2426_v21  ;;  %v5697_v33 = vpack.i.bf16 %v7772_v17, %v7720_v4  ;;  %v7779_v50 = vsel %vm1025_vm3, %v3666_v62, %v3667_v32 }
 0x2e2   : > { %v2491_v15 = vmul.f32 0.01, %v2459_v31  ;;  %v2460_v14 = vadd.f32 %v7605_v12, %v2424_v6  ;;  %v5702_v16 = vpack.i.bf16 %v7779_v50, %v7726_v40 }
 0x2e3   : > { %v2525_v48 = vmax.f32 %v2461_v36, %v2493_v51  ;;  %v2494_v56 = vmul.f32 0.01, %v2462_v8  ;;  %5698 = vrot.lane.b32.xlu1 %v5697_v33, %s6013_s11 }
 0x2e4   : > { %v2523_v10 = vmax.f32 %v2459_v31, %v2491_v15  ;;  %v2492_v39 = vmul.f32 0.01, %v2460_v14  ;;  %5708 = vrot.lane.b32.xlu0 %v5697_v33, %s6016_s16 }
 0x2e5   : > { %v2557_v9 = vadd.f32 %v2525_v48, %v8628_v34  ;;  %v2526_v4 = vmax.f32 %v2462_v8, %v2494_v56 }
 0x2e6   : > { %v2555_v3 = vadd.f32 %v2523_v10, %v8629_v45  ;;  %v2524_v24 = vmax.f32 %v2460_v14, %v2492_v39 }
 0x2e7   : > { %v2558_v61 = vadd.f32 %v2526_v4, %v8630_v38  ;;  %5703 = vrot.lane.b32.xlu1 %v5702_v16, %s6012_s10 }
 0x2e8   : > { %v2581_v27 = vmax.f32 %v2555_v3, %v2557_v9  ;;  %v2556_v22 = vadd.f32 %v2524_v24, %v8631_v11  ;;  %5713 = vrot.lane.b32.xlu0 %v5702_v16, %s6018_s18 }
 0x2ea   : > { %v2709_v40 = vcombine.high %v2581_v27, %v2581_v27  ;;  %v2716_v55 = vrot.slane %v2581_v27, %v7618_v28  ;;  %v2582_v1 = vmax.f32 %v2556_v22, %v2558_v61 }
 0x2ec   : > { %v2723_v25 = vrot.slane %v2709_v40, %v7618_v28  ;;  %v2724_v5 = vcombine.high %v2716_v55, %v2716_v55  ;;  %v4789_v46 = vrot.slane %v2716_v55, 9  ;;  %v2726_v44 = vcombine.high %v2582_v1, %v2582_v1 }
 0x2ed   : > { %v2733_v47 = vrot.slane %v2582_v1, %v7618_v28 }
 0x2ee   : > { %v2725_v26 = vcombine.high %v2723_v25, %v2723_v25  ;;  %v4790_v35 = vrot.slane %v2724_v5, 9  ;;  %v4791_v37 = vrot.slane %v2723_v25, 9  ;;  %v3159_v59 = vmax.f32 %v2716_v55, %v4789_v46 }
 0x2ef   : > { %v2740_v20 = vrot.slane %v2726_v44, %v7618_v28  ;;  %v2741_v41 = vcombine.high %v2733_v47, %v2733_v47  ;;  %v4793_v36 = vrot.slane %v2733_v47, 9 }
 0x2f0   : > { %v4792_v21 = vrot.slane %v2725_v26, 9  ;;  %v3160_v23 = vmax.f32 %v2724_v5, %v4790_v35  ;;  %v3161_v62 = vmax.f32 %v2723_v25, %v4791_v37  ;;  %v3371_v33 = vrot.slane %v3159_v59, %v8613_v60 }
 0x2f1   : > { %v2742_v32 = vcombine.high %v2740_v20, %v2740_v20  ;;  %v4794_v31 = vrot.slane %v2741_v41, 9  ;;  %v4795_v6 = vrot.slane %v2740_v20, 9  ;;  %v3163_v51 = vmax.f32 %v2733_v47, %v4793_v36 }
 0x2f2   : > { %v3162_v8 = vmax.f32 %v2725_v26, %v4792_v21  ;;  %v3375_v15 = vrot.slane %v3160_v23, %v8613_v60  ;;  %v3379_v14 = vrot.slane %v3161_v62, %v8613_v60 }
 0x2f3   : > { %v4796_v48 = vrot.slane %v2742_v32, 9  ;;  %v3164_v56 = vmax.f32 %v2741_v41, %v4794_v31  ;;  %v3165_v16 = vmax.f32 %v2740_v20, %v4795_v6  ;;  %v3387_v4 = vrot.slane %v3163_v51, %v8613_v60 }
 0x2f4   : > { %v3383_v10 = vrot.slane %v3162_v8, %v8613_v60  ;;  %v3556_v39 = vsel %vm3528_vm15, %v3375_v15, %v3371_v33 }
 0x2f5   : > { %v3557_v34 = vsel %vm3530_vm0, %v3379_v14, %v3556_v39  ;;  %v3166_v9 = vmax.f32 %v2742_v32, %v4796_v48  ;;  %v3391_v45 = vrot.slane %v3164_v56, %v8613_v60  ;;  %v3395_v24 = vrot.slane %v3165_v16, %v8613_v60  ;;  %v8632_v39 = vld [vmem:[#allocation28_spill] sm:$0xff] }
 0x2f6   : > { %v3558_v3 = vsel %vm3532_vm1, %v3383_v10, %v3557_v34 }
 0x2f7   : > { %v3559_v38 = vsel %vm3534_vm14, %v3387_v4, %v3558_v3  ;;  %v3399_v61 = vrot.slane %v3166_v9, %v8613_v60  ;;  %v5987_v4 = vld [vmem:[%s8494_s3 + $0x8] sm:$0xff]  }
 0x2f8   : > { %v3560_v27 = vsel %vm3536_vm13, %v3391_v45, %v3559_v38  ;;  %v8633_v45 = vld [vmem:[#allocation31_spill] sm:$0xff] }
 0x2f9   : > { %v3561_v11 = vsel %vm3538_vm12, %v3395_v24, %v3560_v27  ;;  %v8634_v24 = vld [vmem:[#allocation29_spill] sm:$0xff]  ;;  %v8635_v27 = vld [vmem:[#allocation32_spill] sm:$0xff] }
 0x2fa   : > { %v3562_v22 = vsel %vm3540_vm11, %v3399_v61, %v3561_v11 }
 0x2fb   : > { %v3594_v40 = vrot.slane %v3562_v22, 7 }
 0x2fc   : > { %v4970_v55 = vpop.f32.mrb[16].mxu1 }
 0x2fd   : > { %v2429_v1 = vmul.f32 %v4970_v55, %v7603_v2  ;;  %v2344_v25 = vpop.f32.mrb[17].mxu1  ;;  %v7812_v5 = vsel %vm778_vm2, 0.0, %v3594_v40  ;;  %v3618_v46 = vsel %vm778_vm2, %v3594_v40, 0.0 }
 0x2fe   : > { %v2427_v44 = vmul.f32 %v7603_v2, %v2344_v25  ;;  %v4971_v47 = vpop.f32.mrb[18].mxu1  ;;  %v5717_v26 = vpack.i.bf16 %v7812_v5, %v7758_v7  ;;  %v3647_v35 = vrot.slane %v7812_v5, 1  ;;  %v3648_v37 = vrot.slane %v3618_v46, 1 }
 0x2ff   : > { %v2465_v59 = vadd.f32 %v7605_v12, %v2429_v1  ;;  %v2430_v20 = vmul.f32 %v4971_v47, %v7603_v2  ;;  %v2347_v41 = vpop.f32.mrb[19].mxu1  ;;  %v3669_v36 = vrot.slane %v7812_v5, 2  ;;  %v3670_v21 = vrot.slane %v3618_v46, 2 }
 0x300   : > { %v2463_v23 = vadd.f32 %v7605_v12, %v2427_v44  ;;  %v2428_v62 = vmul.f32 %v7603_v2, %v2347_v41  ;;  %5718 = vrot.lane.b32.xlu1 %v5717_v26, %s6014_s14  ;;  %v7826_v32 = vsel %vm944_vm4, %v3647_v35, %v3648_v37 }
 0x301   : > { %v2497_v31 = vmul.f32 0.01, %v2465_v59  ;;  %v2466_v6 = vadd.f32 %v7605_v12, %v2430_v20  ;;  %v5722_v51 = vpack.i.bf16 %v7826_v32, %v7772_v17  ;;  %v7832_v8 = vsel %vm1025_vm3, %v3669_v36, %v3670_v21  ;;  %v5986_v17 = vld [vmem:[%s8494_s3] sm:$0xff]  }
 0x302   : > { %v2495_v33 = vmul.f32 0.01, %v2463_v23  ;;  %v2464_v15 = vadd.f32 %v7605_v12, %v2428_v62  ;;  %v5727_v14 = vpack.i.bf16 %v7832_v8, %v7779_v50  ;;  %4984 = vmatprep.subr.bf16.mxu0 %v5986_v17 }
 0x303   : > { %v2529_v48 = vmax.f32 %v2465_v59, %v2497_v31  ;;  %v2498_v56 = vmul.f32 0.01, %v2466_v6  ;;  %4985 = vmatpush3.bf16.msra.mxu0 %v5986_v17 }
 0x304   : > { %v2527_v16 = vmax.f32 %v2463_v23, %v2495_v33  ;;  %v2496_v10 = vmul.f32 0.01, %v2464_v15  ;;  %5723 = vrot.lane.b32.xlu1 %v5722_v51, %s6015_s15  ;;  %4986 = vmatprep.subr.bf16.mxu0 %v5987_v4 }
 0x305   : > { %v2561_v34 = vadd.f32 %v2529_v48, %v8632_v39  ;;  %v2530_v9 = vmax.f32 %v2466_v6, %v2498_v56 }
 0x306   : > { %v2559_v3 = vadd.f32 %v2527_v16, %v8633_v45  ;;  %v2528_v50 = vmax.f32 %v2464_v15, %v2496_v10 }
 0x307   : > { %v2562_v38 = vadd.f32 %v2530_v9, %v8634_v24  ;;  %4987 = vmatpush3.bf16.msra.mxu0 %v5987_v4 }
 0x308   : > { %v2583_v61 = vmax.f32 %v2559_v3, %v2561_v34  ;;  %v2560_v11 = vadd.f32 %v2528_v50, %v8635_v27  ;;  %5728 = vrot.lane.b32.xlu1 %v5727_v14, %s6017_s17  ;;  %v5988_v3 = vld [vmem:[%s8494_s3 + $0x10] sm:$0xff]  }
 0x309   : > { %4988 = vmatprep.subr.bf16.mxu0 %v5988_v3 }
 0x30a   : > { %v2743_v22 = vcombine.high %v2583_v61, %v2583_v61  ;;  %v2750_v40 = vrot.slane %v2583_v61, %v7618_v28  ;;  %v2584_v55 = vmax.f32 %v2560_v11, %v2562_v38 }
 0x30b   : > { %4989 = vmatpush3.bf16.msra.mxu0 %v5988_v3 }
 0x30c   : > { %v2757_v1 = vrot.slane %v2743_v22, %v7618_v28  ;;  %v2758_v25 = vcombine.high %v2750_v40, %v2750_v40  ;;  %v4797_v46 = vrot.slane %v2750_v40, 9  ;;  %v2760_v44 = vcombine.high %v2584_v55, %v2584_v55 }
 0x30d   : > { %v2767_v47 = vrot.slane %v2584_v55, %v7618_v28 }
 0x30e   : > { %v2759_v26 = vcombine.high %v2757_v1, %v2757_v1  ;;  %v4798_v35 = vrot.slane %v2758_v25, 9  ;;  %v4799_v37 = vrot.slane %v2757_v1, 9  ;;  %v3167_v59 = vmax.f32 %v2750_v40, %v4797_v46  ;;  %v5989_v40 = vld [vmem:[%s8494_s3 + $0x18] sm:$0xff]  }
 0x30f   : > { %v2774_v20 = vrot.slane %v2760_v44, %v7618_v28  ;;  %v2775_v41 = vcombine.high %v2767_v47, %v2767_v47  ;;  %v4801_v36 = vrot.slane %v2767_v47, 9  ;;  %4990 = vmatprep.subr.bf16.mxu0 %v5989_v40 }
 0x310   : > { %v4800_v21 = vrot.slane %v2759_v26, 9  ;;  %v3168_v23 = vmax.f32 %v2758_v25, %v4798_v35  ;;  %v3169_v62 = vmax.f32 %v2757_v1, %v4799_v37  ;;  %v3403_v14 = vrot.slane %v3167_v59, %v8613_v60  ;;  %4991 = vmatpush3.bf16.msra.mxu0 %v5989_v40 }
 0x311   : > { %v2776_v31 = vcombine.high %v2774_v20, %v2774_v20  ;;  %v4802_v6 = vrot.slane %v2775_v41, 9  ;;  %v4803_v51 = vrot.slane %v2774_v20, 9  ;;  %v3171_v33 = vmax.f32 %v2767_v47, %v4801_v36  ;;  %v5990_v36 = vld [vmem:[%s8494_s3 + $0x20] ss:$0 sps:$4 sm:$0xff]  }
 0x312   : > { %v3170_v15 = vmax.f32 %v2759_v26, %v4800_v21  ;;  %v3407_v48 = vrot.slane %v3168_v23, %v8613_v60  ;;  %v3411_v56 = vrot.slane %v3169_v62, %v8613_v60  ;;  %5004 = vmatprep.subr.msk.bf16.mxu0 %vm2242_vm5, %v5990_v36 }
 0x313   : > { %v4804_v16 = vrot.slane %v2776_v31, 9  ;;  %v3172_v10 = vmax.f32 %v2775_v41, %v4802_v6  ;;  %v3173_v39 = vmax.f32 %v2774_v20, %v4803_v51  ;;  %v3419_v45 = vrot.slane %v3171_v33, %v8613_v60 }
 0x314   : > { %v3415_v34 = vrot.slane %v3170_v15, %v8613_v60  ;;  %v3563_v9 = vsel %vm3528_vm15, %v3407_v48, %v3403_v14  ;;  %v3986_v14 = vsel %vm2242_vm5, %v5990_v36, 0  ;;  %vm8641_vm5 = vcmask 392192  }
 0x315   : > { %v3564_v17 = vsel %vm3530_vm0, %v3411_v56, %v3563_v9  ;;  %v3174_v4 = vmax.f32 %v2776_v31, %v4804_v16  ;;  %v3423_v50 = vrot.slane %v3172_v10, %v8613_v60  ;;  %v3427_v38 = vrot.slane %v3173_v39, %v8613_v60  ;;  %4993 = vmatpush3.bf16.msra.mxu0 %v3986_v14 }
 0x316   : > { %v3565_v24 = vsel %vm3532_vm1, %v3415_v34, %v3564_v17 }
 0x317   : > { %v3566_v61 = vsel %vm3534_vm14, %v3419_v45, %v3565_v24  ;;  %v3431_v27 = vrot.slane %v3174_v4, %v8613_v60 }
 0x318   : > { %v3567_v11 = vsel %vm3536_vm13, %v3423_v50, %v3566_v61  ;;  %v8636_v50 = vld [vmem:[#allocation37_spill] sm:$0xff] }
 0x319   : > { %v3568_v22 = vsel %vm3538_vm12, %v3427_v38, %v3567_v11  ;;  %v8637_v38 = vld [vmem:[#allocation39_spill] sm:$0xff]  ;;  %v8638_v11 = vld [vmem:[#allocation38_spill] sm:$0xff] }
 0x31a   : > { %v3569_v55 = vsel %vm3540_vm11, %v3431_v27, %v3568_v22 }
 0x31b   : > { %v3595_v1 = vrot.slane %v3569_v55, 7  ;;  %v8639_v55 = vld [vmem:[#allocation40_spill] sm:$0xff] }
 0x31c   : > { %v4974_v25 = vpop.f32.mrb[20].mxu1 }
 0x31d   : > { %v2433_v46 = vmul.f32 %v4974_v25, %v7603_v2  ;;  %v2360_v44 = vpop.f32.mrb[21].mxu1  ;;  %v7876_v47 = vsel %vm778_vm2, 0.0, %v3595_v1  ;;  %v3619_v26 = vsel %vm778_vm2, %v3595_v1, 0.0 }
 0x31e   : > { %v2431_v35 = vmul.f32 %v7603_v2, %v2360_v44  ;;  %v4975_v37 = vpop.f32.mrb[22].mxu1  ;;  %v5732_v59 = vpack.i.bf16 %v7876_v47, %v7812_v5  ;;  %v3650_v20 = vrot.slane %v7876_v47, 1  ;;  %v3651_v41 = vrot.slane %v3619_v26, 1 }
 0x31f   : > { %v2469_v21 = vadd.f32 %v7605_v12, %v2433_v46  ;;  %v2434_v23 = vmul.f32 %v4975_v37, %v7603_v2  ;;  %v2363_v62 = vpop.f32.mrb[23].mxu1  ;;  %v3672_v31 = vrot.slane %v7876_v47, 2  ;;  %v3673_v6 = vrot.slane %v3619_v26, 2 }
 0x320   : > { %v2467_v51 = vadd.f32 %v7605_v12, %v2431_v35  ;;  %v2432_v33 = vmul.f32 %v7603_v2, %v2363_v62  ;;  %5733 = vrot.lane.b32.xlu1 %v5732_v59, %s6011_s9  ;;  %v7893_v15 = vsel %vm944_vm4, %v3650_v20, %v3651_v41 }
 0x321   : > { %v2501_v48 = vmul.f32 0.01, %v2469_v21  ;;  %v2470_v56 = vadd.f32 %v7605_v12, %v2434_v23  ;;  %v5747_v16 = vpack.i.bf16 %v7893_v15, %v7826_v32  ;;  %v7902_v34 = vsel %vm1025_vm3, %v3672_v31, %v3673_v6  ;;  %v5669_v23 = vpop.permute.xlu0 %5668 }
 0x322   : > { %v2499_v10 = vmul.f32 0.01, %v2467_v51  ;;  %v2468_v39 = vadd.f32 %v7605_v12, %v2432_v33  ;;  %v5752_v4 = vpack.i.bf16 %v7902_v34, %v7832_v8 }
 0x323   : > { %v2533_v9 = vmax.f32 %v2469_v21, %v2501_v48  ;;  %v2502_v17 = vmul.f32 0.01, %v2470_v56  ;;  %5748 = vrot.lane.b32.xlu0 %v5747_v16, %s6013_s11 }
 0x324   : > { %v2531_v45 = vmax.f32 %v2467_v51, %v2499_v10  ;;  %v2500_v3 = vmul.f32 0.01, %v2468_v39  ;;  %5738 = vrot.lane.b32.xlu1 %v5747_v16, %s6016_s16 }
 0x325   : > { %v2565_v32 = vadd.f32 %v2533_v9, %v8636_v50  ;;  %v2534_v24 = vmax.f32 %v2470_v56, %v2502_v17 }
 0x326   : > { %v2563_v61 = vadd.f32 %v2531_v45, %v8637_v38  ;;  %v2532_v27 = vmax.f32 %v2468_v39, %v2500_v3 }
 0x327   : > { %v2566_v22 = vadd.f32 %v2534_v24, %v8638_v11  ;;  %5753 = vrot.lane.b32.xlu0 %v5752_v4, %s6012_s10 }
 0x328   : > { %v2585_v40 = vmax.f32 %v2563_v61, %v2565_v32  ;;  %v2564_v1 = vadd.f32 %v2532_v27, %v8639_v55  ;;  %5743 = vrot.lane.b32.xlu1 %v5752_v4, %s6018_s18  ;;  %v7923_v61 = vpop.permute.xlu0 %5673 }
 0x32a   : > { %v2777_v8 = vcombine.high %v2585_v40, %v2585_v40  ;;  %v2784_v25 = vrot.slane %v2585_v40, %v7618_v28  ;;  %v2586_v46 = vmax.f32 %v2564_v1, %v2566_v22 }
 0x32c   : > { %v2791_v44 = vrot.slane %v2777_v8, %v7618_v28  ;;  %v2792_v26 = vcombine.high %v2784_v25, %v2784_v25  ;;  %v4805_v35 = vrot.slane %v2784_v25, 9  ;;  %v2794_v37 = vcombine.high %v2586_v46, %v2586_v46 }
 0x32d   : > { %v2801_v59 = vrot.slane %v2586_v46, %v7618_v28 }
 0x32e   : > { %v2793_v20 = vcombine.high %v2791_v44, %v2791_v44  ;;  %v4806_v41 = vrot.slane %v2792_v26, 9  ;;  %v4807_v36 = vrot.slane %v2791_v44, 9  ;;  %v3175_v21 = vmax.f32 %v2784_v25, %v4805_v35 }
 0x32f   : > { %v2808_v62 = vrot.slane %v2794_v37, %v7618_v28  ;;  %v2809_v31 = vcombine.high %v2801_v59, %v2801_v59  ;;  %v4809_v6 = vrot.slane %v2801_v59, 9  ;;  %v5671_v25 = vunpack.i.h.bf16 %v5669_v23 }
 0x330   : > { %v4808_v51 = vrot.slane %v2793_v20, 9  ;;  %v3176_v33 = vmax.f32 %v2792_v26, %v4806_v41  ;;  %v3177_v14 = vmax.f32 %v2791_v44, %v4807_v36  ;;  %v3435_v9 = vrot.slane %v3175_v21, %v8613_v60 }
 0x331   : > { %v2810_v48 = vcombine.high %v2808_v62, %v2808_v62  ;;  %v4810_v56 = vrot.slane %v2809_v31, 9  ;;  %v4811_v16 = vrot.slane %v2808_v62, 9  ;;  %v3179_v10 = vmax.f32 %v2801_v59, %v4809_v6 }
 0x332   : > { %v3178_v39 = vmax.f32 %v2793_v20, %v4808_v51  ;;  %v3439_v17 = vrot.slane %v3176_v33, %v8613_v60  ;;  %v3443_v4 = vrot.slane %v3177_v14, %v8613_v60  ;;  %v5670_v36 = vunpack.i.l.bf16 %v5669_v23  ;;  %v7936_v21 = vpop.permute.xlu0 %5678 }
 0x333   : > { %v4812_v45 = vrot.slane %v2810_v48, 9  ;;  %v3180_v3 = vmax.f32 %v2809_v31, %v4810_v56  ;;  %v3181_v24 = vmax.f32 %v2808_v62, %v4811_v16  ;;  %v3451_v22 = vrot.slane %v3179_v10, %v8613_v60 }
 0x334   : > { %v3447_v50 = vrot.slane %v3178_v39, %v8613_v60  ;;  %v3570_v32 = vsel %vm3528_vm15, %v3439_v17, %v3435_v9  ;;  %v4978_v38 = vpop.f32.mrb[24].mxu1  ;;  %v7947_v17 = vsel %vm1886_vm6, %v7643_v53, %v5671_v25 }
 0x335   : > { %v3571_v27 = vsel %vm3530_vm0, %v3443_v4, %v3570_v32  ;;  %v3182_v11 = vmax.f32 %v2810_v48, %v4812_v45  ;;  %v2376_v40 = vpop.f32.mrb[25].mxu1  ;;  %v2437_v1 = vmul.f32 %v4978_v38, %v7603_v2  ;;  %v3455_v46 = vrot.slane %v3180_v3, %v8613_v60 }
 0x336   : > { %v3572_v55 = vsel %vm3532_vm1, %v3447_v50, %v3571_v27  ;;  %v4979_v8 = vpop.f32.mrb[26].mxu1  ;;  %v2435_v26 = vmul.f32 %v7603_v2, %v2376_v40  ;;  %v3459_v37 = vrot.slane %v3181_v24, %v8613_v60  ;;  %v3878_v4 = vsel %vm1886_vm6, %v8616_v42, %v5670_v36  ;;  %v8640_v50 = vld [vmem:[#allocation41_spill] sm:$0xff] }
 0x337   : > { %v3573_v44 = vsel %vm3534_vm14, %v3451_v22, %v3572_v55  ;;  %v2379_v35 = vpop.f32.mrb[27].mxu1  ;;  %v2473_v59 = vadd.f32 %v7605_v12, %v2437_v1  ;;  %v2438_v20 = vmul.f32 %v4979_v8, %v7603_v2  ;;  %v3463_v31 = vrot.slane %v3182_v11, %v8613_v60  ;;  %v7957_v22 = vpop.permute.xlu0 %5683 }
 0x338   : > { %v2436_v41 = vmul.f32 %v7603_v2, %v2379_v35  ;;  %v2471_v62 = vadd.f32 %v7605_v12, %v2435_v26  ;;  %v3574_v6 = vsel %vm3536_vm13, %v3455_v46, %v3573_v44  ;;  %v5675_v45 = vunpack.i.l.bf16 %v7923_v61 }
 0x339   : > { %v2505_v51 = vmul.f32 0.01, %v2473_v59  ;;  %v2474_v33 = vadd.f32 %v7605_v12, %v2438_v20  ;;  %v3575_v48 = vsel %vm3538_vm12, %v3459_v37, %v3574_v6  ;;  %v5676_v1 = vunpack.i.h.bf16 %v7923_v61 }
 0x33a   : > { %v2472_v14 = vadd.f32 %v7605_v12, %v2436_v41  ;;  %v2503_v56 = vmul.f32 0.01, %v2471_v62  ;;  %v3576_v16 = vsel %vm3540_vm11, %v3463_v31, %v3575_v48  ;;  %v5681_v44 = vunpack.i.h.bf16 %v7936_v21 }
 0x33b   : > { %v2537_v10 = vmax.f32 %v2473_v59, %v2505_v51  ;;  %v2506_v23 = vmul.f32 0.01, %v2474_v33  ;;  %v3596_v9 = vrot.slane %v3576_v16, 7  ;;  %v5680_v26 = vunpack.i.l.bf16 %v7936_v21 }
 0x33c   : > { %v2504_v39 = vmul.f32 0.01, %v2472_v14  ;;  %v2535_v3 = vmax.f32 %v2471_v62, %v2503_v56  ;;  %v5686_v59 = vunpack.i.h.bf16 %v7957_v22 }
 0x33d   : > { %v2569_v32 = vadd.f32 %v2537_v10, %v8640_v50  ;;  %v2538_v24 = vmax.f32 %v2474_v33, %v2506_v23  ;;  %v7954_v27 = vsel %vm778_vm2, 0.0, %v3596_v9  ;;  %v7962_v40 = vsel %vm778_vm2, %v3596_v9, 0.0 }
 0x33e   : > { %v2536_v38 = vmax.f32 %v2472_v14, %v2504_v39  ;;  %v2567_v11 = vadd.f32 %v2535_v3, %v6790_v63  ;;  %v5757_v53 = vpack.i.bf16 %v7954_v27, %v7876_v47  ;;  %v3653_v55 = vrot.slane %v7954_v27, 1 }
 0x33f   : > { %v2570_v8 = vadd.f32 %v2538_v24, %v6792_v0  ;;  %v3654_v46 = vrot.slane %v7962_v40, 1  ;;  %v7970_v63 = vsel %vm1919_vm7, %v3878_v4, %v5675_v45  ;;  %v3675_v16 = vrot.slane %v7954_v27, 2 }
 0x340   : > { %v2568_v25 = vadd.f32 %v2536_v38, %v6818_v54  ;;  %v2587_v35 = vmax.f32 %v2567_v11, %v2569_v32  ;;  %5758 = vrot.lane.b32.xlu0 %v5757_v53, %s6014_s14 }
 0x341   : > { %v4982_v37 = vpop.f32.mrb[28].mxu1  ;;  %v7978_v54 = vsel %vm944_vm4, %v3653_v55, %v3654_v46 }
 0x342   : > { %v2588_v20 = vmax.f32 %v2568_v25, %v2570_v8  ;;  %v2441_v0 = vmul.f32 %v4982_v37, %v7603_v2  ;;  %v2392_v41 = vpop.f32.mrb[29].mxu1  ;;  %v2811_v36 = vcombine.high %v2587_v35, %v2587_v35  ;;  %v2818_v62 = vrot.slane %v2587_v35, %v7618_v28 }
 0x343   : > { %v2439_v31 = vmul.f32 %v7603_v2, %v2392_v41  ;;  %v4983_v6 = vpop.f32.mrb[30].mxu1  ;;  %v5762_v51 = vpack.i.bf16 %v7978_v54, %v7893_v15 }
 0x344   : > { %v2828_v33 = vcombine.high %v2588_v20, %v2588_v20  ;;  %v2835_v14 = vrot.slane %v2588_v20, %v7618_v28  ;;  %v2477_v48 = vadd.f32 %v7605_v12, %v2441_v0  ;;  %v2395_v56 = vpop.f32.mrb[31].mxu1  ;;  %v2825_v10 = vrot.slane %v2811_v36, %v7618_v28 }
 0x345   : > { %v2826_v23 = vcombine.high %v2818_v62, %v2818_v62  ;;  %v4813_v39 = vrot.slane %v2818_v62, 9  ;;  %v2475_v9 = vadd.f32 %v7605_v12, %v2439_v31  ;;  %5763 = vrot.lane.b32.xlu0 %v5762_v51, %s6015_s15  ;;  %v2442_v37 = vmul.f32 %v4983_v6, %v7603_v2 }
 0x346   : > { %v2842_v4 = vrot.slane %v2828_v33, %v7618_v28  ;;  %v2843_v45 = vcombine.high %v2835_v14, %v2835_v14  ;;  %v4817_v15 = vrot.slane %v2835_v14, 9  ;;  %v2509_v3 = vmul.f32 0.01, %v2477_v48 }
 0x347   : > { %v2827_v50 = vcombine.high %v2825_v10, %v2825_v10  ;;  %v4814_v32 = vrot.slane %v2826_v23, 9  ;;  %v4815_v24 = vrot.slane %v2825_v10, 9  ;;  %v3183_v38 = vmax.f32 %v2818_v62, %v4813_v39 }
 0x348   : > { %v2844_v11 = vcombine.high %v2842_v4, %v2842_v4  ;;  %v4818_v53 = vrot.slane %v2843_v45, 9  ;;  %v4819_v55 = vrot.slane %v2842_v4, 9  ;;  %v3187_v8 = vmax.f32 %v2835_v14, %v4817_v15 }
 0x349   : > { %v4816_v25 = vrot.slane %v2827_v50, 9  ;;  %v3184_v46 = vmax.f32 %v2826_v23, %v4814_v32  ;;  %v3185_v35 = vmax.f32 %v2825_v10, %v4815_v24  ;;  %v3467_v20 = vrot.slane %v3183_v38, %v8613_v60 }
 0x34a   : > { %v4820_v0 = vrot.slane %v2844_v11, 9  ;;  %v3188_v41 = vmax.f32 %v2843_v45, %v4818_v53  ;;  %v3676_v36 = vrot.slane %v7962_v40, 2  ;;  %v2541_v33 = vmax.f32 %v2477_v48, %v2509_v3 }
 0x34b   : > { %v3186_v31 = vmax.f32 %v2827_v50, %v4816_v25  ;;  %v3471_v51 = vrot.slane %v3184_v46, %v8613_v60  ;;  %v3475_v62 = vrot.slane %v3185_v35, %v8613_v60  ;;  %v3189_v39 = vmax.f32 %v2842_v4, %v4819_v55  ;;  %v5689_v50 = vpop.permute.xlu0 %5688 }
 0x34c   : > { %v3190_v30 = vmax.f32 %v2844_v11, %v4820_v0  ;;  %v3483_v14 = vrot.slane %v3187_v8, %v8613_v60  ;;  %v2507_v23 = vmul.f32 0.01, %v2475_v9  ;;  %v2573_v15 = vadd.f32 %v2541_v33, %v6990_v43 }
 0x34d   : > { %v3479_v10 = vrot.slane %v3186_v31, %v8613_v60  ;;  %v3577_v6 = vsel %vm3528_vm15, %v3471_v51, %v3467_v20  ;;  %v2478_v45 = vadd.f32 %v7605_v12, %v2442_v37  ;;  %v2440_v24 = vmul.f32 %v7603_v2, %v2395_v56 }
 0x34e   : > { %v3578_v40 = vsel %vm3530_vm0, %v3475_v62, %v3577_v6  ;;  %v2539_v32 = vmax.f32 %v2475_v9, %v2507_v23  ;;  %v8004_v48 = vsel %vm1025_vm3, %v3675_v16, %v3676_v36  ;;  %v3487_v4 = vrot.slane %v3188_v41, %v8613_v60 }
 0x34f   : > { %v3579_v3 = vsel %vm3532_vm1, %v3479_v10, %v3578_v40  ;;  %v2510_v38 = vmul.f32 0.01, %v2478_v45  ;;  %v5767_v11 = vpack.i.bf16 %v8004_v48, %v7902_v34  ;;  %v3491_v43 = vrot.slane %v3189_v39, %v8613_v60 }
 0x350   : > { %v3580_v53 = vsel %vm3534_vm14, %v3483_v14, %v3579_v3  ;;  %v2571_v55 = vadd.f32 %v2539_v32, %v7012_v52  ;;  %v2476_v9 = vadd.f32 %v7605_v12, %v2440_v24  ;;  %v5685_v2 = vunpack.i.l.bf16 %v7957_v22 }
 0x351   : > { %v2542_v56 = vmax.f32 %v2478_v45, %v2510_v38  ;;  %5768 = vrot.lane.b32.xlu0 %v5767_v11, %s6017_s17  ;;  %v3495_v16 = vrot.slane %v3190_v30, %v8613_v60  ;;  %v3581_v8 = vsel %vm3536_vm13, %v3487_v4, %v3580_v53  ;;  %v3887_v34 = vsel %vm1919_vm7, %v7947_v17, %v5676_v1 }
 0x352   : > { %v2589_v25 = vmax.f32 %v2571_v55, %v2573_v15  ;;  %v2508_v46 = vmul.f32 0.01, %v2476_v9  ;;  %v5694_v35 = vpop.permute.xlu0 %5693  ;;  %v3582_v52 = vsel %vm3538_vm12, %v3491_v43, %v3581_v8  ;;  %v3894_v12 = vsel %vm8553_vm8, %v7970_v63, %v5680_v26 }
 0x353   : > { %v5691_v37 = vunpack.i.h.bf16 %v5689_v50  ;;  %v5690_v20 = vunpack.i.l.bf16 %v5689_v50  ;;  %v3583_v30 = vsel %vm3540_vm11, %v3495_v16, %v3582_v52  ;;  %v3895_v61 = vsel %vm8553_vm8, %v3887_v34, %v5681_v44 }
 0x354   : > { %v2845_v0 = vcombine.high %v2589_v25, %v2589_v25  ;;  %v2852_v17 = vrot.slane %v2589_v25, %v7618_v28  ;;  %v2540_v1 = vmax.f32 %v2476_v9, %v2508_v46  ;;  %v3902_v41 = vsel %vm8552_vm9, %v3894_v12, %v5685_v2 }
 0x355   : > { %v3903_v36 = vsel %vm8552_vm9, %v3895_v61, %v5686_v59  ;;  %v2574_v63 = vadd.f32 %v2542_v56, %v6995_v58  ;;  %v3910_v44 = vsel %vm8551_vm10, %v3902_v41, %v5690_v20  ;;  %v3597_v39 = vrot.slane %v3583_v30, 7 }
 0x356   : > { %v2859_v26 = vrot.slane %v2845_v0, %v7618_v28  ;;  %v2860_v31 = vcombine.high %v2852_v17, %v2852_v17  ;;  %v4821_v51 = vrot.slane %v2852_v17, 9  ;;  %v2572_v21 = vadd.f32 %v2540_v1, %v7019_v19  ;;  %v5709_v62 = vpop.permute.xlu0 %5708 }
 0x357   : > { %v3911_v33 = vsel %vm8551_vm10, %v3903_v36, %v5691_v37  ;;  %v5696_v59 = vunpack.i.h.bf16 %v5694_v35  ;;  %v5695_v15 = vunpack.i.l.bf16 %v5694_v35  ;;  %v5711_v58 = vunpack.i.h.bf16 %v5709_v62  ;;  %vm8642_vm10 = vmmov %vm8641_vm5 }
 0x358   : > { %v2861_v14 = vcombine.high %v2859_v26, %v2859_v26  ;;  %v4822_v23 = vrot.slane %v2860_v31, 9  ;;  %v4823_v10 = vrot.slane %v2859_v26, 9  ;;  %v3191_v22 = vmax.f32 %v2852_v17, %v4821_v51 }
 0x359   : > { %v2590_v6 = vmax.f32 %v2572_v21, %v2574_v63  ;;  %v5710_v32 = vunpack.i.l.bf16 %v5709_v62  ;;  %v8044_v3 = vsel %vm778_vm2, 0.0, %v3597_v39  ;;  %v3918_v16 = vsel %vm8641_vm5, %v3910_v44, %v5695_v15 }
 0x35a   : > { %v4824_v45 = vrot.slane %v2861_v14, 9  ;;  %v3192_v40 = vmax.f32 %v2860_v31, %v4822_v23  ;;  %v3193_v50 = vmax.f32 %v2859_v26, %v4823_v10  ;;  %v3499_v19 = vrot.slane %v3191_v22, %v8613_v60  ;;  %v5714_v38 = vpop.permute.xlu0 %5713 }
 0x35b   : > { %v2862_v24 = vcombine.high %v2590_v6, %v2590_v6  ;;  %v2869_v4 = vrot.slane %v2590_v6, %v7618_v28  ;;  %v5772_v55 = vpack.i.bf16 %v8044_v3, %v7954_v27  ;;  %v3919_v34 = vsel %vm8642_vm10, %v3911_v33, %v5696_v59 }
 0x35c   : > { %v3194_v11 = vmax.f32 %v2861_v14, %v4824_v45  ;;  %v3503_v43 = vrot.slane %v3192_v40, %v8613_v60  ;;  %v3507_v53 = vrot.slane %v3193_v50, %v8613_v60  ;;  %vm8643_vm9 = vcmask 457728  }
 0x35d   : > { %v2876_v9 = vrot.slane %v2862_v24, %v7618_v28  ;;  %v2877_v2 = vcombine.high %v2869_v4, %v2869_v4  ;;  %v4825_v56 = vrot.slane %v2869_v4, 9  ;;  %v3926_v25 = vsel %vm8643_vm9, %v3918_v16, %v5710_v32  ;;  %5773 = vrot.lane.b32.xlu0 %v5772_v55, %s6011_s9  ;;  %vm8644_vm8 = vmmov %vm8643_vm9 }
 0x35e   : > { %v3584_v8 = vsel %vm3528_vm15, %v3503_v43, %v3499_v19  ;;  %v5716_v46 = vunpack.i.h.bf16 %v5714_v38  ;;  %v3927_v37 = vsel %vm8644_vm8, %v3919_v34, %v5711_v58  ;;  %v3511_v28 = vrot.slane %v3194_v11, %v8613_v60 }
 0x35f   : > { %v2878_v35 = vcombine.high %v2876_v9, %v2876_v9  ;;  %v4826_v52 = vrot.slane %v2877_v2, 9  ;;  %v4827_v12 = vrot.slane %v2876_v9, 9  ;;  %v3585_v20 = vsel %vm3530_vm0, %v3507_v53, %v3584_v8 }
 0x360   : > { %v3195_v30 = vmax.f32 %v2869_v4, %v4825_v56  ;;  %v5715_v61 = vunpack.i.l.bf16 %v5714_v38  ;;  %vm8645_vm10 = vcmask 523264   ;;  %v3621_v63 = vsel %vm778_vm2, %v3597_v39, 0.0 }
 0x361   : > { %v4828_v0 = vrot.slane %v2878_v35, 9  ;;  %v3196_v17 = vmax.f32 %v2877_v2, %v4826_v52  ;;  %v3197_v1 = vmax.f32 %v2876_v9, %v4827_v12  ;;  %v3935_v41 = vsel %vm8645_vm10, %v3927_v37, %v5716_v46  ;;  %vm8646_vm9 = vmmov %vm8645_vm10  ;;  %v5699_v9 = vpop.permute.xlu1 %5698 }
 0x362   : > { %v3934_v36 = vsel %vm8646_vm9, %v3926_v25, %v5715_v61  ;;  %v3656_v26 = vrot.slane %v8044_v3, 1  ;;  %v3515_v51 = vrot.slane %v3195_v30, %v8613_v60  ;;  %v3657_v44 = vrot.slane %v3621_v63, 1 }
 0x363   : > { %v3198_v31 = vmax.f32 %v2878_v35, %v4828_v0  ;;  %v3519_v21 = vrot.slane %v3196_v17, %v8613_v60  ;;  %v3942_v62 = vpack.c.bf16 %v3935_v41, %v3934_v36  ;;  %v3678_v33 = vrot.slane %v8044_v3, 2 }
 0x364   : > { %v3679_v14 = vrot.slane %v3621_v63, 2  ;;  %v3586_v23 = vsel %vm3532_vm1, %v3511_v28, %v3585_v20  ;;  %v3523_v10 = vrot.slane %v3197_v1, %v8613_v60  ;;  %vm8647_vm8 = vcmask 588800   ;;  %vm8654_vm1 = vmmov %vm8641_vm5 }
 0x365   : > { %4994 = vmatprep.mubr.msk.bf16.mxu0 %vm8647_vm8, %v3942_v62  ;;  %v3587_v39 = vsel %vm3534_vm14, %v3515_v51, %v3586_v23  ;;  %v3658_v22 = vsel %vm944_vm4, %v3656_v26, %v3657_v44  ;;  %v3527_v59 = vrot.slane %v3198_v31, %v8613_v60  ;;  %v5704_v2 = vpop.permute.xlu1 %5703  ;;  %v5701_v46 = vunpack.i.h.bf16 %v5699_v9  ;;  %vm8655_vm5 = vmmov %vm8654_vm1 }
 0x366   : > { %v3680_v6 = vsel %vm1025_vm3, %v3678_v33, %v3679_v14  ;;  %v3588_v15 = vsel %vm3536_vm13, %v3519_v21, %v3587_v39  ;;  %v5777_v58 = vpack.i.bf16 %v3658_v22, %v7978_v54  ;;  %v5700_v35 = vunpack.i.l.bf16 %v5699_v9 }
 0x367   : > { %v5782_v45 = vpack.i.bf16 %v3680_v6, %v8004_v48  ;;  %v3589_v40 = vsel %vm3538_vm12, %v3523_v10, %v3588_v15  ;;  %v5706_v12 = vunpack.i.h.bf16 %v5704_v2  ;;  %v5705_v37 = vunpack.i.l.bf16 %v5704_v2 }
 0x368   : > { %5778 = vrot.lane.b32.xlu1 %v5777_v58, %s6013_s11  ;;  %5788 = vrot.lane.b32.xlu0 %v5777_v58, %s6016_s16  ;;  %v3590_v50 = vsel %vm3540_vm11, %v3527_v59, %v3589_v40  ;;  %v3881_v0 = vsel %vm1886_vm6, %v7758_v7, %v5701_v46  ;;  %v3880_v17 = vsel %vm1886_vm6, %v7706_v49, %v5700_v35  ;;  %vm8648_vm11 = vcmask 195584  }
 0x369   : > { %v3598_v32 = vrot.slane %v3590_v50, 7  ;;  %v3888_v63 = vsel %vm1919_vm7, %v3880_v17, %v5705_v37  ;;  %v3889_v26 = vsel %vm1919_vm7, %v3881_v0, %v5706_v12  ;;  %vm8649_vm12 = vmmov %vm8648_vm11  ;;  %vm8650_vm13 = vcmask 261120  }
 0x36a   : > { %vm8651_vm14 = vmmov %vm8650_vm13  ;;  %vm8652_vm15 = vcmask 326656   ;;  %vm8656_vm10 = vcmask 457728   ;;  %vm8658_vm8 = vcmask 523264  }
 0x36b   : > { %v3614_v19 = vsel %vm778_vm2, 0.0, %v3598_v32  ;;  %v3622_v24 = vsel %vm778_vm2, %v3598_v32, 0.0  ;;  %vm8653_vm0 = vmmov %vm8652_vm15 }
 0x36c   : > { %5783 = vrot.lane.b32.xlu1 %v5782_v45, %s6012_s10  ;;  %5793 = vrot.lane.b32.xlu0 %v5782_v45, %s6018_s18  ;;  %v5797_v60 = vpack.i.bf16 %v3614_v19, %v8044_v3  ;;  %v3683_v54 = vrot.slane %v3614_v19, 1  ;;  %v3684_v48 = vrot.slane %v3622_v24, 1  ;;  %v3686_v4 = vrot.slane %v3614_v19, 2  ;;  %vm8657_vm9 = vmmov %vm8656_vm10 }
 0x36d   : > { %v3687_v38 = vrot.slane %v3622_v24, 2 }
 0x36e   : > { %v3685_v11 = vsel %vm944_vm4, %v3683_v54, %v3684_v48 }
 0x36f   : > { %v5802_v43 = vpack.i.bf16 %v3685_v11, %v3658_v22  ;;  %v3688_v53 = vsel %vm1025_vm3, %v3686_v4, %v3687_v38  ;;  %v5812_v56 = vpack.i.bf16 %v7651_v18, %v3685_v11 }
 0x370   : > { %5798 = vrot.lane.b32.xlu1 %v5797_v60, %s6014_s14  ;;  %v5807_v55 = vpack.i.bf16 %v3688_v53, %v3680_v6  ;;  %v5817_v8 = vpack.i.bf16 %v7672_v57, %v3688_v53  ;;  %s6022_s14 = smov 80  }
 0x372   : > { %v5719_v16 = vpop.permute.xlu1 %5718 }
 0x373   : > { %v5721_v28 = vunpack.i.h.bf16 %v5719_v16  ;;  %v5720_v20 = vunpack.i.l.bf16 %v5719_v16 }
 0x374   : > { %3821 = vrot.lane.b32.xlu1 %v3614_v19, %s6011_s9 }
 0x375   : > { %v3896_v21 = vsel %vm8648_vm11, %v3888_v63, %v5720_v20  ;;  %v3897_v62 = vsel %vm8649_vm12, %v3889_v26, %v5721_v28  ;;  %vm8659_vm11 = vmmov %vm8658_vm8  ;;  %vm8660_vm12 = vcmask 588800  }
 0x376   : > { %v5724_v34 = vpop.permute.xlu1 %5723 }
 0x377   : > { %v5726_v30 = vunpack.i.h.bf16 %v5724_v34  ;;  %v5725_v61 = vunpack.i.l.bf16 %v5724_v34 }
 0x378   : > { %5803 = vrot.lane.b32.xlu1 %v5802_v43, %s6015_s15 }
 0x379   : > { %v3904_v7 = vsel %vm8650_vm13, %v3896_v21, %v5725_v61  ;;  %v3905_v14 = vsel %vm8651_vm14, %v3897_v62, %v5726_v30  ;;  %vm8661_vm13 = vcmask 195584  }
 0x37a   : > { %v5729_v25 = vpop.permute.xlu1 %5728  ;;  %vm8662_vm14 = vmmov %vm8661_vm13 }
 0x37b   : > { %v5731_v1 = vunpack.i.h.bf16 %v5729_v25  ;;  %v5730_v41 = vunpack.i.l.bf16 %v5729_v25 }
 0x37c   : > { %5808 = vrot.lane.b32.xlu1 %v5807_v55, %s6017_s17 }
 0x37d   : > { %v3912_v49 = vsel %vm8652_vm15, %v3904_v7, %v5730_v41  ;;  %v3913_v23 = vsel %vm8653_vm0, %v3905_v14, %v5731_v1  ;;  %vm8663_vm15 = vcmask 261120  }
 0x37e   : > { %vm8664_vm0 = vmmov %vm8663_vm15 }
 0x380   : > { %5813 = vrot.lane.b32.xlu1 %v5812_v56, %s6016_s16 }
 0x384   : > { %5818 = vrot.lane.b32.xlu1 %v5817_v8, %s6018_s18 }
 0x392   : > { %v5734_v52 = vpop.permute.xlu1 %5733 }
 0x393   : > { %v5736_v31 = vunpack.i.h.bf16 %v5734_v52  ;;  %v5735_v51 = vunpack.i.l.bf16 %v5734_v52 }
 0x395   : > { %v3920_v39 = vsel %vm8654_vm1, %v3912_v49, %v5735_v51  ;;  %v3921_v22 = vsel %vm8655_vm5, %v3913_v23, %v5736_v31  ;;  %v5749_v32 = vpop.permute.xlu0 %5748  ;;  %vm8665_vm1 = vcmask 326656  }
 0x396   : > { %v5739_v36 = vpop.permute.xlu1 %5738  ;;  %v5751_v4 = vunpack.i.h.bf16 %v5749_v32  ;;  %v5750_v38 = vunpack.i.l.bf16 %v5749_v32  ;;  %vm8666_vm5 = vmmov %vm8665_vm1 }
 0x397   : > { %v5741_v44 = vunpack.i.h.bf16 %v5739_v36  ;;  %v5740_v33 = vunpack.i.l.bf16 %v5739_v36 }
 0x398   : > { %v3883_v56 = vsel %vm1886_vm6, %v7876_v47, %v5751_v4  ;;  %v3882_v16 = vsel %vm1886_vm6, %v7812_v5, %v5750_v38 }
 0x399   : > { %v3928_v15 = vsel %vm8656_vm10, %v3920_v39, %v5740_v33  ;;  %v3929_v58 = vsel %vm8657_vm9, %v3921_v22, %v5741_v44  ;;  %v5754_v19 = vpop.permute.xlu0 %5753  ;;  %vm8667_vm10 = vcmask 392192  }
 0x39a   : > { %v5744_v10 = vpop.permute.xlu1 %5743  ;;  %v5756_v11 = vunpack.i.h.bf16 %v5754_v19  ;;  %v5755_v43 = vunpack.i.l.bf16 %v5754_v19  ;;  %vm8668_vm9 = vmmov %vm8667_vm10 }
 0x39b   : > { %v5746_v6 = vunpack.i.h.bf16 %v5744_v10  ;;  %v5745_v59 = vunpack.i.l.bf16 %v5744_v10 }
 0x39c   : > { %v3890_v35 = vsel %vm1919_vm7, %v3882_v16, %v5755_v43  ;;  %v3891_v52 = vsel %vm1919_vm7, %v3883_v56, %v5756_v11 }
 0x39d   : > { %v3936_v45 = vsel %vm8658_vm8, %v3928_v15, %v5745_v59  ;;  %v3937_v40 = vsel %vm8659_vm11, %v3929_v58, %v5746_v6  ;;  %vm8669_vm8 = vcmask 457728  }
 0x39e   : > { %v3943_v50 = vpack.c.bf16 %v3937_v40, %v3936_v45  ;;  %vm8670_vm11 = vmmov %vm8669_vm8 }
 0x3a0   : > { %4995 = vmatmul.mubr.msk.bf16.vlgmr.msra.gmra.mrb[32].mxu0 %vm8660_vm12, %v3943_v50  ;;  %vm8671_vm12 = vcmask 523264  }
 0x3b2   : > { %v5759_v24 = vpop.permute.xlu0 %5758 }
 0x3b3   : > { %v5761_v53 = vunpack.i.h.bf16 %v5759_v24  ;;  %v5760_v55 = vunpack.i.l.bf16 %v5759_v24 }
 0x3b5   : > { %v3898_v28 = vsel %vm8661_vm13, %v3890_v35, %v5760_v55  ;;  %v3899_v20 = vsel %vm8662_vm14, %v3891_v52, %v5761_v53  ;;  %vm8672_vm13 = vmmov %vm8671_vm12  ;;  %vm8673_vm14 = vcmask 588800  }
 0x3b7   : > { %v5764_v60 = vpop.permute.xlu0 %5763 }
 0x3b8   : > { %v5766_v9 = vunpack.i.h.bf16 %v5764_v60  ;;  %v5765_v2 = vunpack.i.l.bf16 %v5764_v60 }
 0x3ba   : > { %v3906_v47 = vsel %vm8663_vm15, %v3898_v28, %v5765_v2  ;;  %v3907_v5 = vsel %vm8664_vm0, %v3899_v20, %v5766_v9  ;;  %vm8674_vm15 = vcmask 195584   ;;  %v8681_v2 = vunpack.i.l.bf16 %v8607_v13  ;;  %v8159_v13 = vld [vmem:[%s8496_s5] sm:$0xff] }
 0x3bb   : > { %vm8675_vm0 = vmmov %vm8674_vm15 }
 0x3c3   : > { %v5769_v54 = vpop.permute.xlu0 %5768 }
 0x3c4   : > { %v5771_v8 = vunpack.i.h.bf16 %v5769_v54  ;;  %v5770_v34 = vunpack.i.l.bf16 %v5769_v54 }
 0x3c6   : > { %v3914_v0 = vsel %vm8665_vm1, %v3906_v47, %v5770_v34  ;;  %v3915_v17 = vsel %vm8666_vm5, %v3907_v5, %v5771_v8  ;;  %vm8676_vm1 = vcmask 261120  }
 0x3c7   : > { %vm8677_vm5 = vmmov %vm8676_vm1 }
 0x3cf   : > { %v5774_v48 = vpop.permute.xlu0 %5773 }
 0x3d0   : > { %v5776_v12 = vunpack.i.h.bf16 %v5774_v48  ;;  %v5775_v37 = vunpack.i.l.bf16 %v5774_v48 }
 0x3d2   : > { %v3923_v36 = vsel %vm8667_vm10, %v3915_v17, %v5776_v12  ;;  %v3922_v63 = vsel %vm8668_vm9, %v3914_v0, %v5775_v37  ;;  %vm8678_vm10 = vcmask 326656   ;;  %v4055_v12 = vsub.s32 4, %v8608_v29  ;;  %v5991_v17 = vld [vmem:[%s8495_s4] sm:$0xff]  }
 0x3d3   : > { %vm8679_vm9 = vmmov %vm8678_vm10  ;;  %v4067_v37 = vsub.s32 5, %v8608_v29 }
 0x3d4   : > { %v8162_v28 = vrot.slane %v8159_v13, %v4055_v12 }
 0x3d5   : > { %v8165_v20 = vrot.slane %v8159_v13, %v4067_v37 }
 0x3da   : > { %v5779_v25 = vpop.permute.xlu1 %5778  ;;  %v5789_v46 = vpop.permute.xlu0 %5788 }
 0x3db   : > { %v5791_v30 = vunpack.i.h.bf16 %v5789_v46  ;;  %v5790_v61 = vunpack.i.l.bf16 %v5789_v46  ;;  %v5781_v23 = vunpack.i.h.bf16 %v5779_v25  ;;  %v5780_v10 = vunpack.i.l.bf16 %v5779_v25 }
 0x3dd   : > { %v3931_v51 = vsel %vm8669_vm8, %v3923_v36, %v5791_v30  ;;  %v3930_v21 = vsel %vm8670_vm11, %v3922_v63, %v5790_v61  ;;  %v3885_v40 = vsel %vm1886_vm6, %v8044_v3, %v5781_v23  ;;  %v3884_v50 = vsel %vm1886_vm6, %v7954_v27, %v5780_v10 }
 0x3de   : > { %v5784_v1 = vpop.permute.xlu1 %5783  ;;  %v5794_v41 = vpop.permute.xlu0 %5793  ;;  %vm8680_vm6 = vcmask 392192   ;;  %v6020_v63 = vmov 0  }
 0x3df   : > { %v5796_v26 = vunpack.i.h.bf16 %v5794_v41  ;;  %v5795_v31 = vunpack.i.l.bf16 %v5794_v41  ;;  %v5786_v39 = vunpack.i.h.bf16 %v5784_v1  ;;  %v5785_v22 = vunpack.i.l.bf16 %v5784_v1  ;;  %vm8682_vm8 = vmmov %vm8680_vm6  ;;  %4524 = vmatprep.subr.bf16.mxu1 %v6020_v63 }
 0x3e0   : > { %4525 = vmatpush1.bf16.msra.mxu1 %v5991_v17 }
 0x3e1   : > { %v3938_v62 = vsel %vm8671_vm12, %v3930_v21, %v5795_v31  ;;  %v3939_v44 = vsel %vm8672_vm13, %v3931_v51, %v5796_v26  ;;  %v3892_v24 = vsel %vm1919_vm7, %v3884_v50, %v5785_v22  ;;  %v3893_v60 = vsel %vm1919_vm7, %v3885_v40, %v5786_v39  ;;  %vm8683_vm12 = vmmov %vm8670_vm11  ;;  %4526 = vmatprep.subr.bf16.mxu1 %v6020_v63 }
 0x3e2   : > { %v3944_v33 = vpack.c.bf16 %v3939_v44, %v3938_v62  ;;  %v5799_v7 = vpop.permute.xlu1 %5798 }
 0x3e3   : > { %v5801_v6 = vunpack.i.h.bf16 %v5799_v7  ;;  %v5800_v59 = vunpack.i.l.bf16 %v5799_v7 }
 0x3e4   : > { %4998 = vmatprep.mubr.msk.bf16.mxu0 %vm8673_vm14, %v3944_v33  ;;  %vm8684_vm14 = vmmov %vm8672_vm13  ;;  %v5992_v33 = vld [vmem:[%s8495_s4 + $0x8] sm:$0xff]  }
 0x3e5   : > { %v3901_v54 = vsel %vm8674_vm15, %v3893_v60, %v5801_v6  ;;  %v3900_v48 = vsel %vm8675_vm0, %v3892_v24, %v5800_v59  ;;  %vm8685_vm15 = vcmask 588800   ;;  %4527 = vmatpush1.bf16.msra.mxu1 %v5992_v33  ;;  %v5993_v59 = vld [vmem:[%s8495_s4 + $0x10] sm:$0xff]   ;;  %v5998_v33 = vld [vmem:[%s8495_s4 + $0x38] sm:$0xff]   ;;  %vm4432_vm0 = vcmask 785408  }
 0x3e6   : > { %v3822_v14 = vpop.permute.xlu1 %3821  ;;  %4528 = vmatprep.subr.bf16.mxu1 %v6020_v63 }
 0x3e9   : > { %4529 = vmatpush1.bf16.msra.mxu1 %v5993_v59 }
 0x3ea   : > { %v5804_v49 = vpop.permute.xlu1 %5803  ;;  %4530 = vmatprep.subr.bf16.mxu1 %v6020_v63 }
 0x3eb   : > { %v5806_v58 = vunpack.i.h.bf16 %v5804_v49  ;;  %v5805_v45 = vunpack.i.l.bf16 %v5804_v49 }
 0x3ed   : > { %v3909_v38 = vsel %vm8676_vm1, %v3901_v54, %v5806_v58  ;;  %v3908_v11 = vsel %vm8677_vm5, %v3900_v48, %v5805_v45  ;;  %vm8688_vm5 = vmmov %vm8680_vm6 }
 0x3ee   : > { %v5809_v15 = vpop.permute.xlu1 %5808 }
 0x3ef   : > { %v5811_v32 = vunpack.i.h.bf16 %v5809_v15  ;;  %v5810_v19 = vunpack.i.l.bf16 %v5809_v15 }
 0x3f1   : > { %v3916_v3 = vsel %vm8678_vm10, %v3908_v11, %v5810_v19  ;;  %v3917_v43 = vsel %vm8679_vm9, %v3909_v38, %v5811_v32  ;;  %v5994_v32 = vld [vmem:[%s8495_s4 + $0x18] sm:$0xff]   ;;  %vm8689_vm10 = vmmov %vm8688_vm5 }
 0x3f2   : > { %v5814_v4 = vpop.permute.xlu1 %5813  ;;  %v3924_v9 = vsel %vm8680_vm6, %v3916_v3, %v3822_v14  ;;  %v3925_v56 = vsel %vm8682_vm8, %v3917_v43, %v8681_v2  ;;  %4531 = vmatpush1.bf16.msra.mxu1 %v5994_v32  ;;  %vm8690_vm9 = vmmov %vm8672_vm13 }
 0x3f3   : > { %v5816_v27 = vunpack.i.h.bf16 %v5814_v4  ;;  %v5815_v53 = vunpack.i.l.bf16 %v5814_v4  ;;  %4532 = vmatprep.subr.bf16.mxu1 %v6020_v63  ;;  %vm8691_vm6 = vmmov %vm8690_vm9 }
 0x3f5   : > { %v3932_v34 = vsel %vm8670_vm11, %v3924_v9, %v5815_v53  ;;  %v3933_v25 = vsel %vm8683_vm12, %v3925_v56, %v5816_v27  ;;  %vm8694_vm12 = vmmov %vm8688_vm5 }
 0x3f6   : > { %v5819_v55 = vpop.permute.xlu1 %5818 }
 0x3f7   : > { %v5821_v16 = vunpack.i.h.bf16 %v5819_v55  ;;  %v5820_v8 = vunpack.i.l.bf16 %v5819_v55  ;;  %v5995_v55 = vld [vmem:[%s8495_s4 + $0x20] sm:$0xff]  }
 0x3f8   : > { %4533 = vmatpush1.bf16.msra.mxu1 %v5995_v55 }
 0x3f9   : > { %v3940_v46 = vsel %vm8672_vm13, %v3932_v34, %v5820_v8  ;;  %v3941_v35 = vsel %vm8684_vm14, %v3933_v25, %v5821_v16  ;;  %4534 = vmatprep.subr.bf16.mxu1 %v6020_v63  ;;  %vm8695_vm13 = vmmov %vm8688_vm5 }
 0x3fa   : > { %v3945_v52 = vpack.c.bf16 %v3941_v35, %v3940_v46  ;;  %vm8696_vm14 = vmmov %vm8691_vm6 }
 0x3fc   : > { %4999 = vmatmul.mubr.msk.bf16.gmra.mrb[36].mxu0 %vm8685_vm15, %v3945_v52  ;;  %vm8697_vm15 = vmmov %vm8691_vm6 }
 0x473   : > { %v4996_v30 = vpop.f32.mrb[32].mxu0 }
 0x474   : > { %v4059_v61 = vmul.f32 %v4996_v30, %v8162_v28  ;;  %v4022_v47 = vpop.f32.mrb[33].mxu0 }
 0x475   : > { %v4057_v5 = vmul.f32 %v8162_v28, %v4022_v47  ;;  %v4997_v0 = vpop.f32.mrb[34].mxu0 }
 0x476   : > { %v4071_v1 = vadd.f32 %v8165_v20, %v4059_v61  ;;  %v4060_v41 = vmul.f32 %v4997_v0, %v8162_v28  ;;  %v4025_v36 = vpop.f32.mrb[35].mxu0 }
 0x477   : > { %v4069_v26 = vadd.f32 %v8165_v20, %v4057_v5  ;;  %v4058_v31 = vmul.f32 %v8162_v28, %v4025_v36  ;;  %v5996_v5 = vld [vmem:[%s8495_s4 + $0x28] sm:$0xff]  }
 0x478   : > { %v4079_v51 = vmul.f32 0.01, %v4071_v1  ;;  %v4072_v21 = vadd.f32 %v8165_v20, %v4060_v41  ;;  %4535 = vmatpush1.bf16.msra.mxu1 %v5996_v5 }
 0x479   : > { %v4077_v62 = vmul.f32 0.01, %v4069_v26  ;;  %v4070_v44 = vadd.f32 %v8165_v20, %v4058_v31  ;;  %4536 = vmatprep.subr.bf16.mxu1 %v6020_v63 }
 0x47a   : > { %v8183_v7 = vmax.f32 %v4071_v1, %v4079_v51  ;;  %v4080_v14 = vmul.f32 0.01, %v4072_v21  ;;  %v5997_v51 = vld [vmem:[%s8495_s4 + $0x30] sm:$0xff]  }
 0x47b   : > { %v8185_v49 = vmax.f32 %v4069_v26, %v4077_v62  ;;  %v4078_v23 = vmul.f32 0.01, %v4070_v44 }
 0x47c   : > { %v4121_v10 = vrot.slane %v8183_v7, 7  ;;  %v8188_v39 = vmax.f32 %v4072_v21, %v4080_v14  ;;  %4537 = vmatpush1.bf16.msra.mxu1 %v5997_v51 }
 0x47d   : > { %v4119_v22 = vrot.slane %v8185_v49, 7  ;;  %v8192_v6 = vmax.f32 %v4070_v44, %v4078_v23  ;;  %4538 = vmatprep.subr.bf16.mxu1 %v6020_v63 }
 0x47e   : > { %v4122_v15 = vrot.slane %v8188_v39, 7  ;;  %v8199_v58 = vsel %vm778_vm2, 0.0, %v4121_v10  ;;  %v4145_v45 = vsel %vm778_vm2, %v4121_v10, 0.0  ;;  %v5999_v10 = vld [vmem:[%s8495_s4 + $0x40] sm:$0xff]  }
 0x47f   : > { %v8203_v40 = vsel %vm778_vm2, 0.0, %v4119_v22  ;;  %v4143_v50 = vsel %vm778_vm2, %v4119_v22, 0.0  ;;  %v4120_v54 = vrot.slane %v8192_v6, 7  ;;  %v4193_v48 = vrot.slane %v4145_v45, 2 }
 0x480   : > { %v4165_v19 = vrot.slane %v8203_v40, 1  ;;  %v4166_v24 = vrot.slane %v4143_v50, 1  ;;  %v8212_v60 = vsel %vm778_vm2, 0.0, %v4122_v15  ;;  %v4146_v4 = vsel %vm778_vm2, %v4122_v15, 0.0  ;;  %4539 = vmatpush1.bf16.msra.mxu1 %v5998_v33 }
 0x481   : > { %v5822_v38 = vpack.i.bf16 %v8212_v60, %v8199_v58  ;;  %v4192_v11 = vrot.slane %v8199_v58, 2  ;;  %v4186_v3 = vrot.slane %v8203_v40, 2  ;;  %v4187_v43 = vrot.slane %v4143_v50, 2  ;;  %4540 = vmatprep.subr.bf16.mxu1 %v6020_v63 }
 0x482   : > { %v8221_v27 = vsel %vm778_vm2, 0.0, %v4120_v54  ;;  %v4144_v53 = vsel %vm778_vm2, %v4120_v54, 0.0  ;;  %v4172_v16 = vrot.slane %v4145_v45, 1  ;;  %v4175_v8 = vrot.slane %v4146_v4, 1 }
 0x483   : > { %v4190_v9 = vrot.slane %v4144_v53, 2  ;;  %5823 = vrot.lane.b32.xlu1 %v5822_v38, %s6011_s9  ;;  %v5827_v2 = vpack.i.bf16 %v8221_v27, %v8203_v40  ;;  %v4189_v56 = vrot.slane %v8221_v27, 2  ;;  %v4167_v34 = vsel %vm944_vm4, %v4165_v19, %v4166_v24 }
 0x484   : > { %v4174_v25 = vrot.slane %v8212_v60, 1  ;;  %v4196_v46 = vrot.slane %v4146_v4, 2  ;;  %v4194_v52 = vsel %vm1025_vm3, %v4192_v11, %v4193_v48  ;;  %v5832_v12 = vpack.i.bf16 %v8199_v58, %v8221_v27  ;;  %4541 = vmatpush1.bf16.msra.mxu1 %v5999_v10 }
 0x485   : > { %5828 = vrot.lane.b32.xlu0 %v5827_v2, %s6011_s9  ;;  %v4191_v35 = vsel %vm1025_vm3, %v4189_v56, %v4190_v9  ;;  %v4188_v30 = vsel %vm1025_vm3, %v4186_v3, %v4187_v43  ;;  %v4171_v61 = vrot.slane %v8199_v58, 1  ;;  %v4195_v47 = vrot.slane %v8212_v60, 2 }
 0x486   : > { %v4451_v37 = vpack.c.bf16 %v4194_v52, %v4191_v35  ;;  %v5837_v0 = vpack.i.bf16 %v4167_v34, %v7651_v18  ;;  %v8249_v17 = vsel %vm944_vm4, %v4174_v25, %v4175_v8  ;;  %v5842_v1 = vpack.i.bf16 %v4188_v30, %v7672_v57 }
 0x487   : > { %5833 = vrot.lane.b32.xlu1 %v5832_v12, %s6021_s25  ;;  %v4169_v41 = vrot.slane %v4144_v53, 1  ;;  %v4173_v36 = vsel %vm944_vm4, %v4171_v61, %v4172_v16  ;;  %v8256_v26 = vsel %vm1025_vm3, %v4195_v47, %v4196_v46  ;;  %v4168_v31 = vrot.slane %v8221_v27, 1 }
 0x488   : > { %4847 = vmatprep.mubr.msk.bf16.mxu1 %vm1919_vm7, %v4451_v37  ;;  %v5847_v21 = vpack.i.bf16 %v8249_v17, %v4173_v36  ;;  %v5852_v62 = vpack.i.bf16 %v8256_v26, %v4194_v52  ;;  %v5862_v14 = vpack.i.bf16 %v4191_v35, %v4188_v30  ;;  %v5877_v59 = vpack.i.bf16 %v4194_v52, %v4191_v35 }
 0x489   : > { %5838 = vrot.lane.b32.xlu0 %v5837_v0, %s6012_s10  ;;  %v4170_v44 = vsel %vm944_vm4, %v4168_v31, %v4169_v41 }
 0x48a   : > { %v5857_v23 = vpack.i.bf16 %v4170_v44, %v4167_v34  ;;  %v5867_v22 = vpack.i.bf16 %v4173_v36, %v4170_v44 }
 0x48b   : > { %5843 = vrot.lane.b32.xlu1 %v5842_v1, %s6015_s15 }
 0x48d   : > { %5848 = vrot.lane.b32.xlu0 %v5847_v21, %s6018_s18 }
 0x48f   : > { %5853 = vrot.lane.b32.xlu1 %v5852_v62, %s6022_s14 }
 0x491   : > { %5863 = vrot.lane.b32.xlu0 %v5862_v14, %s6022_s14 }
 0x493   : > { %5858 = vrot.lane.b32.xlu1 %v5857_v23, %s6018_s18 }
 0x495   : > { %5868 = vrot.lane.b32.xlu0 %v5867_v22, %s6023_s29 }
 0x497   : > { %5873 = vrot.lane.b32.xlu1 %v5867_v22, %s6012_s10 }
 0x499   : > { %5878 = vrot.lane.b32.xlu0 %v5877_v59, %s6015_s15 }
 0x4cf   : > { %v5000_v15 = vpop.f32.mrb[36].mxu0 }
 0x4d0   : > { %v4063_v45 = vmul.f32 %v5000_v15, %v8162_v28  ;;  %v4038_v50 = vpop.f32.mrb[37].mxu0 }
 0x4d1   : > { %v4061_v32 = vmul.f32 %v8162_v28, %v4038_v50  ;;  %v5001_v19 = vpop.f32.mrb[38].mxu0 }
 0x4d2   : > { %v4075_v24 = vadd.f32 %v8165_v20, %v4063_v45  ;;  %v4064_v63 = vmul.f32 %v5001_v19, %v8162_v28  ;;  %v4041_v54 = vpop.f32.mrb[39].mxu0 }
 0x4d3   : > { %v4073_v48 = vadd.f32 %v8165_v20, %v4061_v32  ;;  %v4062_v4 = vmul.f32 %v8162_v28, %v4041_v54 }
 0x4d4   : > { %v4083_v38 = vmul.f32 0.01, %v4075_v24  ;;  %v4076_v11 = vadd.f32 %v8165_v20, %v4064_v63 }
 0x4d5   : > { %v4081_v3 = vmul.f32 0.01, %v4073_v48  ;;  %v4074_v43 = vadd.f32 %v8165_v20, %v4062_v4 }
 0x4d6   : > { %v8290_v53 = vmax.f32 %v4075_v24, %v4083_v38  ;;  %v4084_v55 = vmul.f32 0.01, %v4076_v11 }
 0x4d7   : > { %v8292_v9 = vmax.f32 %v4073_v48, %v4081_v3  ;;  %v4082_v2 = vmul.f32 0.01, %v4074_v43 }
 0x4d8   : > { %v8294_v56 = vmax.f32 %v4076_v11, %v4084_v55  ;;  %v4125_v16 = vrot.slane %v8290_v53, 7 }
 0x4d9   : > { %v4123_v8 = vrot.slane %v8292_v9, 7  ;;  %v8299_v34 = vmax.f32 %v4074_v43, %v4082_v2 }
 0x4da   : > { %v4126_v28 = vrot.slane %v8294_v56, 7  ;;  %v8309_v35 = vsel %vm778_vm2, 0.0, %v4125_v16  ;;  %v4149_v52 = vsel %vm778_vm2, %v4125_v16, 0.0 }
 0x4db   : > { %v8302_v25 = vsel %vm778_vm2, 0.0, %v4123_v8  ;;  %v4147_v20 = vsel %vm778_vm2, %v4123_v8, 0.0  ;;  %v4124_v12 = vrot.slane %v8299_v34, 7  ;;  %v4205_v41 = vrot.slane %v4149_v52, 2 }
 0x4dc   : > { %v8306_v46 = vsel %vm778_vm2, 0.0, %v4126_v28  ;;  %v5882_v37 = vpack.i.bf16 %v8302_v25, %v8212_v60  ;;  %v4178_v61 = vrot.slane %v4147_v20, 1  ;;  %v4150_v47 = vsel %vm778_vm2, %v4126_v28, 0.0 }
 0x4dd   : > { %v5887_v30 = vpack.i.bf16 %v8306_v46, %v8309_v35  ;;  %v4177_v5 = vrot.slane %v8302_v25, 1  ;;  %v8320_v0 = vsel %vm778_vm2, 0.0, %v4124_v12  ;;  %v4148_v1 = vsel %vm778_vm2, %v4124_v12, 0.0  ;;  %vm8686_vm2 = vmmov %vm8676_vm1 }
 0x4de   : > { %5883 = vrot.lane.b32.xlu0 %v5882_v37, %s6021_s25  ;;  %v4209_v36 = vrot.slane %v8306_v46, 1  ;;  %v4202_v31 = vrot.slane %v4148_v1, 2  ;;  %v4210_v51 = vrot.slane %v4150_v47, 1  ;;  %v5892_v21 = vpack.i.bf16 %v8320_v0, %v8302_v25  ;;  %vm8692_vm8 = vmmov %vm8686_vm2 }
 0x4df   : > { %5888 = vrot.lane.b32.xlu1 %v5887_v30, %s6011_s9  ;;  %v5897_v62 = vpack.i.bf16 %v8309_v35, %v8320_v0  ;;  %v4204_v44 = vrot.slane %v8309_v35, 2  ;;  %v4199_v33 = vrot.slane %v4147_v20, 2  ;;  %v4179_v14 = vsel %vm944_vm4, %v4177_v5, %v4178_v61  ;;  %vm8693_vm11 = vmmov %vm8686_vm2 }
 0x4e0   : > { %v4198_v23 = vrot.slane %v8302_v25, 2  ;;  %v4201_v10 = vrot.slane %v8320_v0, 2  ;;  %v4184_v22 = vrot.slane %v4149_v52, 1  ;;  %v4183_v59 = vrot.slane %v8309_v35, 1 }
 0x4e1   : > { %v5907_v45 = vpack.i.bf16 %v4179_v14, %v8249_v17  ;;  %v4211_v50 = vsel %vm944_vm4, %v4209_v36, %v4210_v51  ;;  %v8343_v32 = vsel %vm1025_vm3, %v4204_v44, %v4205_v41  ;;  %v4181_v19 = vrot.slane %v4148_v1, 1 }
 0x4e2   : > { %5893 = vrot.lane.b32.xlu0 %v5892_v21, %s6011_s9  ;;  %v8338_v15 = vsel %vm1025_vm3, %v4201_v10, %v4202_v31  ;;  %v8346_v24 = vsel %vm1025_vm3, %v4198_v23, %v4199_v33  ;;  %v4180_v63 = vrot.slane %v8320_v0, 1  ;;  %v4185_v17 = vsel %vm944_vm4, %v4183_v59, %v4184_v22  ;;  %s4854_s9 = sshll.u32 %s8708_s22, 6 }
 0x4e3   : > { %5898 = vrot.lane.b32.xlu1 %v5897_v62, %s6021_s25  ;;  %v4455_v54 = vpack.c.bf16 %v8343_v32, %v8338_v15  ;;  %v5917_v48 = vpack.i.bf16 %v4211_v50, %v4185_v17  ;;  %v5912_v4 = vpack.i.bf16 %v8346_v24, %v8256_v26  ;;  %v5927_v11 = vpack.i.bf16 %v8338_v15, %v8346_v24 }
 0x4e4   : > { %v4182_v38 = vsel %vm944_vm4, %v4180_v63, %v4181_v19  ;;  %v4212_v43 = vrot.slane %v8306_v46, 2  ;;  %v4213_v55 = vrot.slane %v4150_v47, 2  ;;  %v5947_v28 = vpack.i.bf16 %v8343_v32, %v8338_v15 }
 0x4e5   : > { %v5922_v3 = vpack.i.bf16 %v4182_v38, %v4179_v14  ;;  %v5932_v2 = vpack.i.bf16 %v4185_v17, %v4182_v38  ;;  %v5952_v37 = vpack.i.bf16 %v8616_v42, %v8306_v46  ;;  %v5957_v30 = vpack.i.bf16 %v7651_v18, %v4211_v50 }
 0x4e6   : > { %5908 = vrot.lane.b32.xlu0 %v5907_v45, %s6012_s10  ;;  %v8365_v16 = vsel %vm1025_vm3, %v4212_v43, %v4213_v55  ;;  %vm8687_vm3 = vmmov %vm8676_vm1  ;;  %vm4423_vm4 = vcmask 654336   ;;  %vm4441_vm1 = vcmask 916480  }
 0x4e7   : > { %5903 = vrot.lane.b32.xlu1 %v5907_v45, %s6023_s29  ;;  %v5942_v20 = vpack.i.bf16 %v8365_v16, %v8343_v32 }
 0x4ea   : > { %5918 = vrot.lane.b32.xlu0 %v5917_v48, %s6018_s18 }
 0x4eb   : > { %5913 = vrot.lane.b32.xlu1 %v5912_v4, %s6015_s15 }
 0x4ee   : > { %5928 = vrot.lane.b32.xlu0 %v5927_v11, %s6022_s14 }
 0x4ef   : > { %5923 = vrot.lane.b32.xlu1 %v5922_v3, %s6018_s18  ;;  %s8470_s18 = scalar_lea.vmem %s8497_s6, %s4854_s9 }
 0x4f2   : > { %5933 = vrot.lane.b32.xlu0 %v5932_v2, %s6023_s29 }
 0x4f3   : > { %5938 = vrot.lane.b32.xlu1 %v5932_v2, %s6012_s10 }
 0x4f5   : > { %v8369_v8 = vpop.permute.xlu1 %5823 }
 0x4f6   : > { %5948 = vrot.lane.b32.xlu0 %v5947_v28, %s6015_s15 }
 0x4f7   : > { %v5829_v52 = vpop.permute.xlu0 %5828  ;;  %5943 = vrot.lane.b32.xlu1 %v5942_v20, %s6022_s14 }
 0x4f8   : > { %v5831_v33 = vunpack.i.h.bf16 %v5829_v52  ;;  %v5830_v14 = vunpack.i.l.bf16 %v5829_v52 }
 0x4f9   : > { %v5834_v12 = vpop.permute.xlu1 %5833 }
 0x4fa   : > { %5953 = vrot.lane.b32.xlu0 %v5952_v37, %s6021_s25  ;;  %v5836_v19 = vunpack.i.h.bf16 %v5834_v12  ;;  %v5835_v63 = vunpack.i.l.bf16 %v5834_v12 }
 0x4fb   : > { %v5839_v61 = vpop.permute.xlu0 %5838  ;;  %5958 = vrot.lane.b32.xlu1 %v5957_v30, %s6023_s29 }
 0x4fc   : > { %v5841_v5 = vunpack.i.h.bf16 %v5839_v61  ;;  %v5840_v1 = vunpack.i.l.bf16 %v5839_v61 }
 0x4fd   : > { %v5844_v47 = vpop.permute.xlu1 %5843 }
 0x4fe   : > { %v5846_v36 = vunpack.i.h.bf16 %v5844_v47  ;;  %v5845_v31 = vunpack.i.l.bf16 %v5844_v47  ;;  %v4392_v21 = vsel %vm1919_vm7, %v8203_v40, %v5841_v5  ;;  %v4391_v46 = vsel %vm1919_vm7, %v8616_v42, %v5840_v1 }
 0x4ff   : > { %v5849_v41 = vpop.permute.xlu0 %5848  ;;  %v5826_v1 = vunpack.i.h.bf16 %v8369_v8 }
 0x500   : > { %v4400_v18 = vsel %vm8686_vm2, %v4392_v21, %v5846_v36  ;;  %v4399_v44 = vsel %vm8687_vm3, %v4391_v46, %v5845_v31  ;;  %v4453_v31 = vpack.c.bf16 %v8346_v24, %v8256_v26  ;;  %v5825_v21 = vunpack.i.l.bf16 %v8369_v8  ;;  %vm8698_vm3 = vmmov %vm8686_vm2 }
 0x501   : > { %v5854_v51 = vpop.permute.xlu1 %5853  ;;  %v4407_v40 = vsel %vm8688_vm5, %v4399_v44, %v5830_v14  ;;  %v4408_v50 = vsel %vm8689_vm10, %v4400_v18, %v5831_v33  ;;  %v5851_v46 = vunpack.i.h.bf16 %v5849_v41  ;;  %v5850_v18 = vunpack.i.l.bf16 %v5849_v41  ;;  %vm8699_vm10 = vmmov %vm8688_vm5 }
 0x502   : > { %v5856_v44 = vunpack.i.h.bf16 %v5854_v51 }
 0x503   : > { %v5864_v62 = vpop.permute.xlu0 %5863 }
 0x504   : > { %v5866_v59 = vunpack.i.h.bf16 %v5864_v62  ;;  %v5865_v45 = vunpack.i.l.bf16 %v5864_v62 }
 0x505   : > { %v5859_v23 = vpop.permute.xlu1 %5858 }
 0x506   : > { %v5861_v10 = vunpack.i.h.bf16 %v5859_v23  ;;  %v5860_v22 = vunpack.i.l.bf16 %v5859_v23 }
 0x507   : > { %v5869_v42 = vpop.permute.xlu0 %5868 }
 0x508   : > { %v4415_v17 = vsel %vm8690_vm9, %v4407_v40, %v5860_v22  ;;  %v4416_v48 = vsel %vm8691_vm6, %v4408_v50, %v5861_v10  ;;  %v5871_v11 = vunpack.i.h.bf16 %v5869_v42  ;;  %v5870_v3 = vunpack.i.l.bf16 %v5869_v42  ;;  %vm8700_vm9 = vmmov %vm8691_vm6 }
 0x509   : > { %v4424_v4 = vsel %vm4423_vm4, %v4415_v17, %v5865_v45  ;;  %v4425_v38 = vsel %vm4423_vm4, %v4416_v48, %v5866_v59  ;;  %v5874_v43 = vpop.permute.xlu1 %5873 }
 0x50a   : > { %v4433_v55 = vsel %vm4432_vm0, %v4424_v4, %v5835_v63  ;;  %v4434_v2 = vsel %vm4432_vm0, %v4425_v38, %v5836_v19  ;;  %v5876_v28 = vunpack.i.h.bf16 %v5874_v43  ;;  %v5875_v20 = vunpack.i.l.bf16 %v5874_v43 }
 0x50b   : > { %v4442_v52 = vsel %vm4441_vm1, %v4433_v55, %v5870_v3  ;;  %v4443_v12 = vsel %vm4441_vm1, %v4434_v2, %v5871_v11  ;;  %v5879_v37 = vpop.permute.xlu0 %5878 }
 0x50c   : > { %v4450_v30 = vpack.c.bf16 %v4443_v12, %v4442_v52  ;;  %v4394_v61 = vsel %vm1919_vm7, %v8199_v58, %v5876_v28  ;;  %v4393_v47 = vsel %vm1919_vm7, %v8221_v27, %v5875_v20  ;;  %v5881_v5 = vunpack.i.h.bf16 %v5879_v37 }
 0x50d   : > { %v5880_v36 = vunpack.i.l.bf16 %v5879_v37  ;;  %v5855_v27 = vunpack.i.l.bf16 %v5854_v51 }
 0x50e   : > { %v4402_v62 = vsel %vm8692_vm8, %v4394_v61, %v5881_v5  ;;  %4557 = vmatmul.mubr.bf16.vlgmr.msra.gmra.mrb[32].mxu1 %v4450_v30  ;;  %vm8701_vm8 = vmmov %vm8686_vm2 }
 0x50f   : > { %v4401_v58 = vsel %vm8693_vm11, %v4393_v47, %v5880_v36  ;;  %v4410_v33 = vsel %vm8694_vm12, %v4402_v62, %v5826_v1  ;;  %4848 = vmatprep.mubr.msk.bf16.mxu1 %vm1919_vm7, %v4453_v31  ;;  %vm8702_vm11 = vmmov %vm8686_vm2 }
 0x510   : > { %v4409_v14 = vsel %vm8695_vm13, %v4401_v58, %v5825_v21  ;;  %v4418_v23 = vsel %vm8696_vm14, %v4410_v33, %v5851_v46  ;;  %vm8703_vm12 = vmmov %vm8688_vm5 }
 0x511   : > { %v4417_v26 = vsel %vm8697_vm15, %v4409_v14, %v5850_v18  ;;  %v4427_v24 = vsel %vm4423_vm4, %v4418_v23, %v5856_v44  ;;  %vm8704_vm13 = vmmov %vm8688_vm5 }
 0x512   : > { %v4426_v8 = vsel %vm4423_vm4, %v4417_v26, %v5855_v27  ;;  %vm8705_vm14 = vmmov %vm8691_vm6 }
 0x513   : > { %vm8706_vm15 = vmmov %vm8691_vm6 }
 0x550   : > { %v5884_v10 = vpop.permute.xlu0 %5883 }
 0x551   : > { %v8415_v41 = vpop.permute.xlu1 %5888  ;;  %v5886_v45 = vunpack.i.h.bf16 %v5884_v10  ;;  %v5885_v40 = vunpack.i.l.bf16 %v5884_v10 }
 0x553   : > { %v4436_v63 = vsel %vm4432_vm0, %v4427_v24, %v5886_v45  ;;  %v4435_v17 = vsel %vm4432_vm0, %v4426_v8, %v5885_v40 }
 0x554   : > { %v5894_v22 = vpop.permute.xlu0 %5893 }
 0x555   : > { %v5899_v59 = vpop.permute.xlu1 %5898  ;;  %v5896_v30 = vunpack.i.h.bf16 %v5894_v22  ;;  %v5895_v61 = vunpack.i.l.bf16 %v5894_v22 }
 0x556   : > { %v5901_v18 = vunpack.i.h.bf16 %v5899_v59  ;;  %v5900_v15 = vunpack.i.l.bf16 %v5899_v59 }
 0x558   : > { %v5909_v50 = vpop.permute.xlu0 %5908 }
 0x559   : > { %v5904_v42 = vpop.permute.xlu1 %5903  ;;  %v5911_v48 = vunpack.i.h.bf16 %v5909_v50  ;;  %v5910_v4 = vunpack.i.l.bf16 %v5909_v50 }
 0x55a   : > { %v5906_v51 = vunpack.i.h.bf16 %v5904_v42  ;;  %v5905_v19 = vunpack.i.l.bf16 %v5904_v42  ;;  %v4457_v42 = vpack.c.bf16 %v7672_v57, %v8365_v16 }
 0x55b   : > { %v4396_v20 = vsel %vm1919_vm7, %v8302_v25, %v5911_v48  ;;  %v4395_v52 = vsel %vm1919_vm7, %v8212_v60, %v5910_v4 }
 0x55c   : > { %v4444_v38 = vsel %vm4441_vm1, %v4435_v17, %v5905_v19  ;;  %v4445_v11 = vsel %vm4441_vm1, %v4436_v63, %v5906_v51  ;;  %v5919_v3 = vpop.permute.xlu0 %5918  ;;  %v5891_v51 = vunpack.i.h.bf16 %v8415_v41  ;;  %v5890_v19 = vunpack.i.l.bf16 %v8415_v41 }
 0x55d   : > { %v5914_v43 = vpop.permute.xlu1 %5913  ;;  %v4452_v55 = vpack.c.bf16 %v4445_v11, %v4444_v38  ;;  %v5921_v48 = vunpack.i.h.bf16 %v5919_v3  ;;  %v5920_v4 = vunpack.i.l.bf16 %v5919_v3 }
 0x55e   : > { %v5916_v2 = vunpack.i.h.bf16 %v5914_v43  ;;  %v5915_v28 = vunpack.i.l.bf16 %v5914_v43 }
 0x55f   : > { %4565 = vmatmul.mubr.bf16.gmra.mrb[36].mxu1 %v4452_v55 }
 0x560   : > { %v4403_v12 = vsel %vm8686_vm2, %v4395_v52, %v5915_v28  ;;  %v4404_v37 = vsel %vm8698_vm3, %v4396_v20, %v5916_v2  ;;  %4849 = vmatprep.mubr.msk.bf16.mxu1 %vm1919_vm7, %v4455_v54  ;;  %v5929_v47 = vpop.permute.xlu0 %5928 }
 0x561   : > { %v5924_v5 = vpop.permute.xlu1 %5923  ;;  %v5931_v25 = vunpack.i.h.bf16 %v5929_v47  ;;  %v5930_v31 = vunpack.i.l.bf16 %v5929_v47  ;;  %v4411_v60 = vsel %vm8688_vm5, %v4403_v12, %v5895_v61  ;;  %v4412_v21 = vsel %vm8699_vm10, %v4404_v37, %v5896_v30 }
 0x562   : > { %v5926_v1 = vunpack.i.h.bf16 %v5924_v5  ;;  %v5925_v36 = vunpack.i.l.bf16 %v5924_v5 }
 0x564   : > { %v4420_v46 = vsel %vm8700_vm9, %v4412_v21, %v5926_v1  ;;  %v4419_v62 = vsel %vm8691_vm6, %v4411_v60, %v5925_v36  ;;  %v5934_v44 = vpop.permute.xlu0 %5933  ;;  %v4591_v36 = vsub.s32 6, %v8608_v29 }
 0x565   : > { %v4429_v32 = vsel %vm4423_vm4, %v4420_v46, %v5931_v25  ;;  %v4428_v54 = vsel %vm4423_vm4, %v4419_v62, %v5930_v31  ;;  %v5939_v58 = vpop.permute.xlu1 %5938  ;;  %v5936_v33 = vunpack.i.h.bf16 %v5934_v44  ;;  %v5935_v27 = vunpack.i.l.bf16 %v5934_v44 }
 0x566   : > { %v5941_v14 = vunpack.i.h.bf16 %v5939_v58  ;;  %v5940_v23 = vunpack.i.l.bf16 %v5939_v58  ;;  %v4437_v26 = vsel %vm4432_vm0, %v4428_v54, %v5900_v15  ;;  %v4438_v24 = vsel %vm4432_vm0, %v4429_v32, %v5901_v18 }
 0x567   : > { %v4446_v8 = vsel %vm4441_vm1, %v4437_v26, %v5935_v27  ;;  %v4447_v10 = vsel %vm4441_vm1, %v4438_v24, %v5936_v33  ;;  %v4603_v25 = vsub.s32 7, %v8608_v29  ;;  %v4592_v31 = vrot.slane %v8159_v13, %v4591_v36 }
 0x568   : > { %v5949_v22 = vpop.permute.xlu0 %5948  ;;  %v4454_v45 = vpack.c.bf16 %v4447_v10, %v4446_v8  ;;  %v4398_v63 = vsel %vm1919_vm7, %v8309_v35, %v5941_v14  ;;  %v4397_v17 = vsel %vm1919_vm7, %v8320_v0, %v5940_v23 }
 0x569   : > { %v5944_v59 = vpop.permute.xlu1 %5943  ;;  %v5951_v40 = vunpack.i.h.bf16 %v5949_v22  ;;  %v5950_v50 = vunpack.i.l.bf16 %v5949_v22  ;;  %v4604_v60 = vrot.slane %v8159_v13, %v4603_v25 }
 0x56a   : > { %4573 = vmatmul.mubr.bf16.gmra.mrb[40].mxu1 %v4454_v45  ;;  %v5946_v41 = vunpack.i.h.bf16 %v5944_v59  ;;  %v5945_v43 = vunpack.i.l.bf16 %v5944_v59 }
 0x56b   : > { %v4405_v38 = vsel %vm8701_vm8, %v4397_v17, %v5950_v50  ;;  %v4406_v11 = vsel %vm8702_vm11, %v4398_v63, %v5951_v40  ;;  %4850 = vmatprep.mubr.msk.bf16.mxu1 %vm1919_vm7, %v4457_v42 }
 0x56c   : > { %v4413_v57 = vsel %vm8703_vm12, %v4405_v38, %v5890_v19  ;;  %v4414_v16 = vsel %vm8704_vm13, %v4406_v11, %v5891_v51  ;;  %v5954_v55 = vpop.permute.xlu0 %5953 }
 0x56d   : > { %v5959_v35 = vpop.permute.xlu1 %5958  ;;  %v4421_v2 = vsel %vm8705_vm14, %v4413_v57, %v5920_v4  ;;  %v4422_v0 = vsel %vm8706_vm15, %v4414_v16, %v5921_v48  ;;  %v5956_v28 = vunpack.i.h.bf16 %v5954_v55  ;;  %v5955_v3 = vunpack.i.l.bf16 %v5954_v55 }
 0x56e   : > { %v4430_v20 = vsel %vm4423_vm4, %v4421_v2, %v5945_v43  ;;  %v4431_v52 = vsel %vm4423_vm4, %v4422_v0, %v5946_v41  ;;  %v5961_v12 = vunpack.i.h.bf16 %v5959_v35  ;;  %v5960_v37 = vunpack.i.l.bf16 %v5959_v35 }
 0x56f   : > { %v4439_v30 = vsel %vm4432_vm0, %v4430_v20, %v5955_v3  ;;  %v4440_v61 = vsel %vm4432_vm0, %v4431_v52, %v5956_v28 }
 0x570   : > { %v4448_v47 = vsel %vm4441_vm1, %v4439_v30, %v5960_v37  ;;  %v4449_v5 = vsel %vm4441_vm1, %v4440_v61, %v5961_v12 }
 0x571   : > { %v4456_v1 = vpack.c.bf16 %v4449_v5, %v4448_v47 }
 0x573   : > { %4581 = vmatmul.mubr.bf16.gmra.mrb[44].mxu1 %v4456_v1 }
 0x5e1   : > { %v4558_v21 = vpop.f32.mrb[32].mxu1 }
 0x5e2   : > { %v4593_v46 = vmul.f32 %v4592_v31, %v4558_v21  ;;  %v4560_v62 = vpop.f32.mrb[33].mxu1 }
 0x5e3   : > { %v4561_v18 = vpop.f32.mrb[34].mxu1 }
 0x5e4   : > { %v4605_v15 = vadd.f32 %v4604_v60, %v4593_v46  ;;  %v4594_v32 = vmul.f32 %v4592_v31, %v4561_v18  ;;  %v4563_v54 = vpop.f32.mrb[35].mxu1 }
 0x5e6   : > { %v4613_v44 = vmul.f32 0.01, %v4605_v15  ;;  %v4606_v58 = vadd.f32 %v4604_v60, %v4594_v32 }
 0x5e8   : > { %v4621_v33 = vmax.f32 %v4605_v15, %v4613_v44  ;;  %v4614_v27 = vmul.f32 0.01, %v4606_v58 }
 0x5ea   : > { %v4629_v29 = vadd.f32 %v4621_v33, %v8185_v49  ;;  %v4622_v13 = vmax.f32 %v4606_v58, %v4614_v27 }
 0x5ec   : > { %4637 = vst [vmem:[%s8470_s18] sm:$0xff] %v4629_v29  ;;  %v4630_v14 = vadd.f32 %v4622_v13, %v8192_v6 }
 0x5ee   : > { %4638 = vst [vmem:[%s8470_s18 + $0x8] sm:$0xff] %v4630_v14 }
 0x632   : > { %v4566_v23 = vpop.f32.mrb[36].mxu1 }
 0x633   : > { %v4595_v26 = vmul.f32 %v4592_v31, %v4566_v23  ;;  %v4568_v24 = vpop.f32.mrb[37].mxu1 }
 0x634   : > { %v4569_v8 = vpop.f32.mrb[38].mxu1 }
 0x635   : > { %v4607_v10 = vadd.f32 %v4604_v60, %v4595_v26  ;;  %v4596_v22 = vmul.f32 %v4592_v31, %v4569_v8  ;;  %v4571_v59 = vpop.f32.mrb[39].mxu1 }
 0x637   : > { %v4615_v45 = vmul.f32 0.01, %v4607_v10  ;;  %v4608_v40 = vadd.f32 %v4604_v60, %v4596_v22 }
 0x639   : > { %v4623_v50 = vmax.f32 %v4607_v10, %v4615_v45  ;;  %v4616_v42 = vmul.f32 0.01, %v4608_v40 }
 0x63b   : > { %v4631_v49 = vadd.f32 %v4623_v50, %v8183_v7  ;;  %v4624_v51 = vmax.f32 %v4608_v40, %v4616_v42 }
 0x63d   : > { %4639 = vst [vmem:[%s8470_s18 + $0x10] sm:$0xff] %v4631_v49  ;;  %v4632_v19 = vadd.f32 %v4624_v51, %v8188_v39  ;;  %v4574_v6 = vpop.f32.mrb[40].mxu1 }
 0x63e   : > { %v4597_v63 = vmul.f32 %v4592_v31, %v4574_v6  ;;  %v4576_v17 = vpop.f32.mrb[41].mxu1 }
 0x63f   : > { %4640 = vst [vmem:[%s8470_s18 + $0x18] sm:$0xff] %v4632_v19  ;;  %v4577_v48 = vpop.f32.mrb[42].mxu1 }
 0x640   : > { %v4609_v4 = vadd.f32 %v4604_v60, %v4597_v63  ;;  %v4598_v38 = vmul.f32 %v4592_v31, %v4577_v48  ;;  %v4579_v11 = vpop.f32.mrb[43].mxu1 }
 0x642   : > { %v4617_v57 = vmul.f32 0.01, %v4609_v4  ;;  %v4610_v16 = vadd.f32 %v4604_v60, %v4598_v38 }
 0x644   : > { %v4625_v41 = vmax.f32 %v4609_v4, %v4617_v57  ;;  %v4618_v43 = vmul.f32 0.01, %v4610_v16 }
 0x646   : > { %v4633_v7 = vadd.f32 %v4625_v41, %v8292_v9  ;;  %v4626_v55 = vmax.f32 %v4610_v16, %v4618_v43  ;;  %v4582_v35 = vpop.f32.mrb[44].mxu1 }
 0x647   : > { %v4599_v39 = vmul.f32 %v4592_v31, %v4582_v35  ;;  %v4584_v2 = vpop.f32.mrb[45].mxu1 }
 0x648   : > { %4641 = vst [vmem:[%s8470_s18 + $0x20] sm:$0xff] %v4633_v7  ;;  %v4634_v0 = vadd.f32 %v4626_v55, %v8299_v34  ;;  %v4585_v28 = vpop.f32.mrb[46].mxu1 }
 0x649   : > { %v4611_v3 = vadd.f32 %v4604_v60, %v4599_v39  ;;  %v4600_v20 = vmul.f32 %v4592_v31, %v4585_v28  ;;  %v4587_v52 = vpop.f32.mrb[47].mxu1 }
 0x64a   : > { %4642 = vst [vmem:[%s8470_s18 + $0x28] sm:$0xff] %v4634_v0 }
 0x64b   : > { %v4619_v12 = vmul.f32 0.01, %v4611_v3  ;;  %v4612_v37 = vadd.f32 %v4604_v60, %v4600_v20 }
 0x64d   : > { %v4627_v30 = vmax.f32 %v4611_v3, %v4619_v12  ;;  %v4620_v61 = vmul.f32 0.01, %v4612_v37 }
 0x64f   : > { %v4635_v9 = vadd.f32 %v4627_v30, %v8290_v53  ;;  %v4628_v47 = vmax.f32 %v4612_v37, %v4620_v61 }
 0x651   : > { %4643 = vst [vmem:[%s8470_s18 + $0x30] sm:$0xff] %v4635_v9  ;;  %v4636_v5 = vadd.f32 %v4628_v47, %v8294_v56 }
 0x653   : > { %4644 = vst [vmem:[%s8470_s18 + $0x38] sm:$0xff] %v4636_v5 }
 0x654 PF: > { %s16_s21 = sadd.s32 1, %s6008_s21  }
 0x655   : > { %p13_p4 = scmp.ge.s32.totalorder %s16_s21, 4  }
 0x657   :  { %15 = sbr.rel (!%p13_p4) target bundleno = 1 (0x1), region = 74 }

</bundles_post_ra>
